<compile_context>
chip_gen: v6e
topology: v6e:2x2x1
jax: 0.10.0
libtpu: 0.0.40
codegen_flags: <defaults>
</compile_context>

<pallas_src>
import math

import numpy as np

import jax
import jax.numpy as jnp
from jax import lax
from jax.experimental import pallas as pl
from jax.experimental.pallas import tpu as pltpu

HIDDEN = 32      # self.hiddenDim
FFN = 64         # encoder FFN width
SEQ = 8          # token sequence length
VOCAB = 64       # synthetic vocab
CLS_NUM = 7      # clsNum
LAST = False     # last=False -> take hidden state at position 0 (CLS)
T_MAX = 4        # fixed speaker-history bucket (prevents per-call recompiles)
LANES = 128      # lane width of the packed parameter slab / logits

# ---------------------------------------------------------------------------
# Packed parameter-slab layout (row offsets; every block starts 8-row aligned)
# ---------------------------------------------------------------------------
ENC_TOK = 0                         # (VOCAB, H)  token embedding
ENC_POS = ENC_TOK + VOCAB           # (SEQ, H)    position embedding
ENC_QKV = ENC_POS + SEQ             # (H, 3H)     [wq/sqrt(H) | wk | wv@wo]
ENC_W1 = ENC_QKV + HIDDEN           # (H, FFN)
ENC_W2 = ENC_W1 + HIDDEN            # (FFN, H)
ENC_VEC = ENC_W2 + FFN              # 8 rows: b1, b2, ln1_g, ln1_b, ln2_g, ln2_b
ENC_ROWS = ENC_VEC + 8              # 208 rows per encoder

CTX_BASE = 0
SPK_BASE = ENC_ROWS                 # 208
GRU_BASE = 2 * ENC_ROWS             # 416
GRU_W_IH1 = GRU_BASE                # (H, 3H) padded to 128 lanes, gate order [r|z|n]
GRU_W_HH1 = GRU_BASE + HIDDEN
GRU_W_IH2 = GRU_BASE + 2 * HIDDEN
GRU_W_HH2 = GRU_BASE + 3 * HIDDEN
GRU_BIAS = GRU_BASE + 4 * HIDDEN    # 8 rows: bih1, bhh1, bih2, bhh2
GRU_ROWS = 4 * HIDDEN + 8           # 136

CLS_BASE = GRU_BASE + GRU_ROWS      # 552
CLS_W = CLS_BASE                    # (H, CLS_NUM) padded to 128 lanes
CLS_B = CLS_BASE + HIDDEN           # 584 (bias row)
SLAB_ROWS = CLS_B + 8               # 592 rows x 128 lanes x f32  (~296 KB)


# ---------------------------------------------------------------------------
# In-kernel helpers
# ---------------------------------------------------------------------------
def _layernorm(x, gamma, beta, eps=1e-5):
    mu = jnp.mean(x, axis=-1, keepdims=True)
    var = jnp.mean((x - mu) ** 2, axis=-1, keepdims=True)
    return (x - mu) * lax.rsqrt(var + eps) * gamma + beta


def _encode_cls(tok, slab, base):
    """Single-head transformer encoder layer; returns only the CLS row of each
    sequence.  Parameters are read with static slices from the packed slab.

    tok : (Nseq, L) int32 token ids (already loaded values).
    Returns (Nseq, H) float32.
    """
    nseq, seq_len = tok.shape
    rows = nseq * seq_len
    cls_pos = seq_len - 1 if LAST else 0

    tok_emb = slab[base + ENC_TOK:base + ENC_TOK + VOCAB, 0:HIDDEN]
    pos_emb = slab[base + ENC_POS:base + ENC_POS + SEQ, 0:HIDDEN]
    wqkv = slab[base + ENC_QKV:base + ENC_QKV + HIDDEN, 0:3 * HIDDEN]
    w1 = slab[base + ENC_W1:base + ENC_W1 + HIDDEN, 0:FFN]
    w2 = slab[base + ENC_W2:base + ENC_W2 + FFN, 0:HIDDEN]
    b1 = slab[base + ENC_VEC + 0:base + ENC_VEC + 1, 0:FFN]
    b2 = slab[base + ENC_VEC + 1:base + ENC_VEC + 2, 0:HIDDEN]
    g1 = slab[base + ENC_VEC + 2:base + ENC_VEC + 3, 0:HIDDEN]
    be1 = slab[base + ENC_VEC + 3:base + ENC_VEC + 4, 0:HIDDEN]
    g2 = slab[base + ENC_VEC + 4:base + ENC_VEC + 5, 0:HIDDEN]
    be2 = slab[base + ENC_VEC + 5:base + ENC_VEC + 6, 0:HIDDEN]

    # Embedding lookup fused in-kernel: one-hot(ids) @ tok_emb on the MXU.
    oh = (tok[:, :, None] ==
          lax.broadcasted_iota(jnp.int32, (nseq, seq_len, VOCAB), 2)
          ).astype(jnp.float32)
    x = jnp.dot(oh.reshape(rows, VOCAB), tok_emb,
                preferred_element_type=jnp.float32)                  # (rows, H)
    pos = jnp.broadcast_to(pos_emb[None, :, :],
                           (nseq, seq_len, HIDDEN)).reshape(rows, HIDDEN)
    x = x + pos

    # Fused QKV projection (scale folded into q-block, wo folded into v-block).
    qkv = jnp.dot(x, wqkv, preferred_element_type=jnp.float32)       # (rows, 3H)
    q3 = qkv[:, 0:HIDDEN].reshape(nseq, seq_len, HIDDEN)[:, cls_pos:cls_pos + 1, :]
    k3 = qkv[:, HIDDEN:2 * HIDDEN].reshape(nseq, seq_len, HIDDEN)
    v3 = qkv[:, 2 * HIDDEN:3 * HIDDEN].reshape(nseq, seq_len, HIDDEN)

    s = jnp.einsum('nqd,nkd->nqk', q3, k3,
                   preferred_element_type=jnp.float32)               # (Nseq,1,L)
    s = s - jnp.max(s, axis=-1, keepdims=True)
    pa = jnp.exp(s)
    pa = pa * pl.reciprocal(jnp.sum(pa, axis=-1, keepdims=True), approx=True)
    attn = jnp.einsum('nqk,nkd->nqd', pa, v3,
                      preferred_element_type=jnp.float32).reshape(nseq, HIDDEN)

    x_cls = x.reshape(nseq, seq_len, HIDDEN)[:, cls_pos, :]          # (Nseq, H)
    h = _layernorm(x_cls + attn, g1, be1)
    # TODO(synk): jax.nn.gelu default (tanh approx) differs slightly from
    #             PyTorch's exact-erf GELU; acceptable for the synthetic encoder.
    f = jnp.dot(h, w1, preferred_element_type=jnp.float32) + b1
    f = jax.nn.gelu(f)
    f = jnp.dot(f, w2, preferred_element_type=jnp.float32) + b2
    return _layernorm(h + f, g2, be2)                                # (Nseq, H)


def _gru_cell(ig, h, whh, bhh):
    """PyTorch nn.GRU cell with precomputed input gates.

    ig: (B, 128) = [i_r | i_z | i_n | pad]; h: (B, H); whh: (H, 128); bhh: (1, 128).
    n = tanh(i_n + r * (h @ Whh_n + bhh_n));  h' = (1 - z) * n + z * h.
    """
    hg = jnp.dot(h, whh, preferred_element_type=jnp.float32) + bhh   # (B, 128)
    r = jax.nn.sigmoid(ig[:, 0:HIDDEN] + hg[:, 0:HIDDEN])
    z = jax.nn.sigmoid(ig[:, HIDDEN:2 * HIDDEN] + hg[:, HIDDEN:2 * HIDDEN])
    n = jnp.tanh(ig[:, 2 * HIDDEN:3 * HIDDEN] + r * hg[:, 2 * HIDDEN:3 * HIDDEN])
    return (1.0 - z) * n + z * h


# ---------------------------------------------------------------------------
# Fused kernel: encoders + GRU + classifier in one launch
# ---------------------------------------------------------------------------
def erc_fused_kernel(tok_ref, len_ref, slab_ref, out_ref):
    B = len_ref.shape[0]

    # Token rows: [0:B] context, then speaker rows laid out (t, b) -> B + t*B + b.
    ctx_tok = tok_ref[0:B, :]
    spk_tok = tok_ref[B:B + T_MAX * B, :]

    # --- encoders (all sequences in one shot, CLS rows only) ----------------
    ctx_cls = _encode_cls(ctx_tok, slab_ref, CTX_BASE)      # (B, H)
    spk_cls = _encode_cls(spk_tok, slab_ref, SPK_BASE)      # (T*B, H)

    # --- 2-layer GRU, batched over B, padded steps masked -------------------
    wih1 = slab_ref[GRU_W_IH1:GRU_W_IH1 + HIDDEN, :]        # (H, 128), cols>=96 zero
    whh1 = slab_ref[GRU_W_HH1:GRU_W_HH1 + HIDDEN, :]
    wih2 = slab_ref[GRU_W_IH2:GRU_W_IH2 + HIDDEN, :]
    whh2 = slab_ref[GRU_W_HH2:GRU_W_HH2 + HIDDEN, :]
    bih1 = slab_ref[GRU_BIAS + 0:GRU_BIAS + 1, :]
    bhh1 = slab_ref[GRU_BIAS + 1:GRU_BIAS + 2, :]
    bih2 = slab_ref[GRU_BIAS + 2:GRU_BIAS + 3, :]
    bhh2 = slab_ref[GRU_BIAS + 3:GRU_BIAS + 4, :]

    # Layer-1 input projection hoisted out of the recurrence (one lane-dense
    # matmul for all T*B timesteps).
    proj1 = jnp.dot(spk_cls, wih1,
                    preferred_element_type=jnp.float32) + bih1       # (T*B, 128)

    # Validity masks hoisted out of the loop (lens > t, pre-broadcast to H).
    lens = len_ref[...]                                              # (B, 1) int32
    t_iota = lax.broadcasted_iota(jnp.int32, (T_MAX, B, 1), 0)
    valid = jnp.broadcast_to(lens[None, :, :] > t_iota, (T_MAX, B, HIDDEN))

    h1 = jnp.zeros((B, HIDDEN), jnp.float32)     # self.h0 = zeros(2, 1, H)
    h2 = jnp.zeros((B, HIDDEN), jnp.float32)
    # nn.GRU inter-layer dropout(0.3) is training-only -> no-op at inference.
    for t in range(T_MAX):                       # fixed trip count (no recompiles)
        h1n = _gru_cell(proj1[t * B:(t + 1) * B, :], h1, whh1, bhh1)
        ig2 = jnp.dot(h1n, wih2, preferred_element_type=jnp.float32) + bih2
        h2n = _gru_cell(ig2, h2, whh2, bhh2)
        h1 = jnp.where(valid[t], h1n, h1)
        h2 = jnp.where(valid[t], h2n, h2)
    # empty speaker history (len == 0) leaves h2 == 0 == torch.zeros(1, H).

    # --- classifier: (context + speaker) @ W.T + b  (128-lane padded) -------
    wcls = slab_ref[CLS_W:CLS_W + HIDDEN, :]                          # (H, 128)
    bcls = slab_ref[CLS_B:CLS_B + 1, :]                               # (1, 128)
    logits = jnp.dot(ctx_cls + h2, wcls,
                     preferred_element_type=jnp.float32) + bcls       # (B, 128)
    out_ref[...] = logits.astype(out_ref.dtype)


def erc_forward(tokens, lens, param_slab):
    """tokens: ((1+T_MAX)*B, L) int32; lens: (B, 1) int32; slab: (592, 128) f32."""
    B = lens.shape[0]
    vmem = pl.BlockSpec(memory_space=pltpu.MemorySpace.VMEM)
    logits_padded = pl.pallas_call(
        erc_fused_kernel,
        out_shape=jax.ShapeDtypeStruct((B, LANES), jnp.float32),
        in_specs=[vmem, vmem, vmem],
        out_specs=vmem,
    )(tokens, lens, param_slab)
    return logits_padded[:, :CLS_NUM]


# ---------------------------------------------------------------------------
# Host-side parameter packing (deterministic synthetic weights)
# ---------------------------------------------------------------------------
def _dense(key, shape, scale=0.02):
    return np.asarray(jax.random.normal(key, shape, jnp.float32) * scale)


def _fill_encoder(slab, base, key):
    ks = jax.random.split(key, 8)
    tok_emb = _dense(ks[0], (VOCAB, HIDDEN))
    pos_emb = _dense(ks[1], (SEQ, HIDDEN))
    wq = _dense(ks[2], (HIDDEN, HIDDEN))
    wk = _dense(ks[3], (HIDDEN, HIDDEN))
    wv = _dense(ks[4], (HIDDEN, HIDDEN))
    wo = _dense(ks[5], (HIDDEN, HIDDEN))
    w1 = _dense(ks[6], (HIDDEN, FFN))
    w2 = _dense(ks[7], (FFN, HIDDEN))

    slab[base + ENC_TOK:base + ENC_TOK + VOCAB, 0:HIDDEN] = tok_emb
    slab[base + ENC_POS:base + ENC_POS + SEQ, 0:HIDDEN] = pos_emb
    inv_sqrt = 1.0 / math.sqrt(HIDDEN)
    slab[base + ENC_QKV:base + ENC_QKV + HIDDEN, 0:HIDDEN] = wq * inv_sqrt
    slab[base + ENC_QKV:base + ENC_QKV + HIDDEN, HIDDEN:2 * HIDDEN] = wk
    slab[base + ENC_QKV:base + ENC_QKV + HIDDEN, 2 * HIDDEN:3 * HIDDEN] = wv @ wo
    slab[base + ENC_W1:base + ENC_W1 + HIDDEN, 0:FFN] = w1
    slab[base + ENC_W2:base + ENC_W2 + FFN, 0:HIDDEN] = w2
    # biases stay zero; LayerNorm gammas = 1.
    slab[base + ENC_VEC + 2, 0:HIDDEN] = 1.0   # ln1_gamma
    slab[base + ENC_VEC + 4, 0:HIDDEN] = 1.0   # ln2_gamma


def _fill_gru(slab, key):
    # PyTorch nn.GRU: weight_ih / weight_hh are (3H, H) with gate order [r,z,n].
    # Stored pre-transposed + gate-concatenated as (H, 3H) padded to 128 lanes
    # so each timestep does one lane-dense matmul per weight.
    ks = jax.random.split(key, 8)
    bound = 1.0 / math.sqrt(HIDDEN)

    def u(k, shape):
        return np.asarray(jax.random.uniform(k, shape, jnp.float32, -bound, bound))

    slab[GRU_W_IH1:GRU_W_IH1 + HIDDEN, 0:3 * HIDDEN] = u(ks[0], (HIDDEN, 3 * HIDDEN))
    slab[GRU_W_HH1:GRU_W_HH1 + HIDDEN, 0:3 * HIDDEN] = u(ks[1], (HIDDEN, 3 * HIDDEN))
    slab[GRU_W_IH2:GRU_W_IH2 + HIDDEN, 0:3 * HIDDEN] = u(ks[4], (HIDDEN, 3 * HIDDEN))
    slab[GRU_W_HH2:GRU_W_HH2 + HIDDEN, 0:3 * HIDDEN] = u(ks[5], (HIDDEN, 3 * HIDDEN))
    slab[GRU_BIAS + 0, 0:3 * HIDDEN] = u(ks[2], (3 * HIDDEN,))   # bias_ih_l0
    slab[GRU_BIAS + 1, 0:3 * HIDDEN] = u(ks[3], (3 * HIDDEN,))   # bias_hh_l0
    slab[GRU_BIAS + 2, 0:3 * HIDDEN] = u(ks[6], (3 * HIDDEN,))   # bias_ih_l1
    slab[GRU_BIAS + 3, 0:3 * HIDDEN] = u(ks[7], (3 * HIDDEN,))   # bias_hh_l1


def _fill_classifier(slab, key):
    w = _dense(key, (CLS_NUM, HIDDEN))            # self.W: Linear(H, clsNum)
    slab[CLS_W:CLS_W + HIDDEN, 0:CLS_NUM] = w.T   # stored transposed, lane-padded
    # bias row (CLS_B) stays zero.


def build_param_slab(key):
    slab = np.zeros((SLAB_ROWS, LANES), np.float32)
    kc, ks, kg, kw = jax.random.split(key, 4)
    _fill_encoder(slab, CTX_BASE, kc)   # context_model (synthetic)
    _fill_encoder(slab, SPK_BASE, ks)   # speaker_model (synthetic)
    _fill_gru(slab, kg)                 # speakerGRU (2 layers)
    _fill_classifier(slab, kw)          # self.W
    return jnp.asarray(slab)


def _prepare_inputs(batch_input_tokens, batch_speaker_tokens, seq_len):
    """Build one packed token array ((1+T_MAX)*B, L) in (context | t-major
    speaker) order plus per-batch history lengths (B, 1).  T is padded to the
    fixed T_MAX bucket so the kernel shape never changes between calls."""
    B = int(batch_input_tokens.shape[0])
    toks = np.zeros(((1 + T_MAX) * B, seq_len), np.int32)
    toks[0:B, :] = np.asarray(batch_input_tokens, np.int32)
    lens = np.zeros((B, 1), np.int32)
    for b, s in enumerate(batch_speaker_tokens):
        s = np.asarray(s, np.int32).reshape(-1, seq_len) if s.size else \
            np.zeros((0, seq_len), np.int32)
        n = int(s.shape[0])
        if n > T_MAX:
            # TODO(synk): histories longer than the T_MAX bucket are truncated
            #             to the most recent T_MAX utterances; raise T_MAX for
            #             production conversation lengths.
            s = s[-T_MAX:]
            n = T_MAX
        lens[b, 0] = n
        for t in range(n):
            toks[B + t * B + b, :] = s[t]
    return jnp.asarray(toks), jnp.asarray(lens)


class ERCModelPallas:
    """JAX/Pallas re-implementation of ERC_model.forward (single fused launch)."""

    def __init__(self, key, cls_num=CLS_NUM, last=LAST):
        assert cls_num == CLS_NUM and last == LAST
        self.param_slab = build_param_slab(key)

    def __call__(self, batch_input_tokens, batch_speaker_tokens):
        # batch_input_tokens: (B, L) int32; batch_speaker_tokens: list of (n_i, L)
        tokens, lens = _prepare_inputs(
            batch_input_tokens, batch_speaker_tokens, batch_input_tokens.shape[1])
        return erc_forward(tokens, lens, self.param_slab)


if __name__ == "__main__":
    key = jax.random.PRNGKey(0)
    k_model, k_tok, k_spk = jax.random.split(key, 3)

    model = ERCModelPallas(k_model)

    B, L = 2, SEQ
    batch_input_tokens = jax.random.randint(k_tok, (B, L), 0, VOCAB, jnp.int32)
    batch_speaker_tokens = [
        jax.random.randint(k_spk, (3, L), 0, VOCAB, jnp.int32),  # 3 prior utts
        jnp.zeros((0, L), jnp.int32),                            # empty-speaker branch
    ]

    logits = model(batch_input_tokens, batch_speaker_tokens)
    logits = jax.block_until_ready(logits)
    assert logits.shape == (B, CLS_NUM), logits.shape
    assert bool(jnp.all(jnp.isfinite(logits)))
    print("KERNEL_OK")
</pallas_src>

<mosaic_0001>
module attributes {stable_mosaic.version = 11 : i64} {
  func.func @erc_fused_kernel(%arg0: memref<10x8xi32, #tpu.memory_space<vmem>>, %arg1: memref<2x1xi32, #tpu.memory_space<vmem>>, %arg2: memref<592x128xf32, #tpu.memory_space<vmem>>, %arg3: memref<2x128xf32, #tpu.memory_space<vmem>>) attributes {dimension_semantics = [], scalar_prefetch = 0 : i64, scratch_operands = 0 : i64, tpu.core_type = #tpu.core_type<tc>} {
    %c0 = arith.constant 0 : index
    %c0_0 = arith.constant 0 : index
    %0 = vector.load %arg0[%c0, %c0_0] : memref<10x8xi32, #tpu.memory_space<vmem>>, vector<2x8xi32>
    %c2 = arith.constant 2 : index
    %c0_1 = arith.constant 0 : index
    %1 = vector.load %arg0[%c2, %c0_1] : memref<10x8xi32, #tpu.memory_space<vmem>>, vector<8x8xi32>
    %c0_2 = arith.constant 0 : index
    %c0_3 = arith.constant 0 : index
    %2 = vector.load %arg2[%c0_2, %c0_3] : memref<592x128xf32, #tpu.memory_space<vmem>>, vector<64x32xf32>
    %c64 = arith.constant 64 : index
    %c0_4 = arith.constant 0 : index
    %3 = vector.load %arg2[%c64, %c0_4] : memref<592x128xf32, #tpu.memory_space<vmem>>, vector<8x32xf32>
    %c72 = arith.constant 72 : index
    %c0_5 = arith.constant 0 : index
    %4 = vector.load %arg2[%c72, %c0_5] : memref<592x128xf32, #tpu.memory_space<vmem>>, vector<32x96xf32>
    %c104 = arith.constant 104 : index
    %c0_6 = arith.constant 0 : index
    %5 = vector.load %arg2[%c104, %c0_6] : memref<592x128xf32, #tpu.memory_space<vmem>>, vector<32x64xf32>
    %c136 = arith.constant 136 : index
    %c0_7 = arith.constant 0 : index
    %6 = vector.load %arg2[%c136, %c0_7] : memref<592x128xf32, #tpu.memory_space<vmem>>, vector<64x32xf32>
    %c200 = arith.constant 200 : index
    %c0_8 = arith.constant 0 : index
    %7 = vector.load %arg2[%c200, %c0_8] : memref<592x128xf32, #tpu.memory_space<vmem>>, vector<1x64xf32>
    %c201 = arith.constant 201 : index
    %c0_9 = arith.constant 0 : index
    %8 = vector.load %arg2[%c201, %c0_9] : memref<592x128xf32, #tpu.memory_space<vmem>>, vector<1x32xf32>
    %c202 = arith.constant 202 : index
    %c0_10 = arith.constant 0 : index
    %9 = vector.load %arg2[%c202, %c0_10] : memref<592x128xf32, #tpu.memory_space<vmem>>, vector<1x32xf32>
    %c203 = arith.constant 203 : index
    %c0_11 = arith.constant 0 : index
    %10 = vector.load %arg2[%c203, %c0_11] : memref<592x128xf32, #tpu.memory_space<vmem>>, vector<1x32xf32>
    %c204 = arith.constant 204 : index
    %c0_12 = arith.constant 0 : index
    %11 = vector.load %arg2[%c204, %c0_12] : memref<592x128xf32, #tpu.memory_space<vmem>>, vector<1x32xf32>
    %c205 = arith.constant 205 : index
    %c0_13 = arith.constant 0 : index
    %12 = vector.load %arg2[%c205, %c0_13] : memref<592x128xf32, #tpu.memory_space<vmem>>, vector<1x32xf32>
    %13 = vector.shape_cast %0 : vector<2x8xi32> to vector<2x8x1xi32>
    %14 = tpu.iota {dimensions = array<i32: 2>} : vector<2x8x64xi32>
    %15 = vector.broadcast %13 : vector<2x8x1xi32> to vector<2x8x64xi32>
    %16 = arith.cmpi eq, %15, %14 : vector<2x8x64xi32>
    %17 = arith.extui %16 : vector<2x8x64xi1> to vector<2x8x64xi32>
    %18 = arith.sitofp %17 : vector<2x8x64xi32> to vector<2x8x64xf32>
    %19 = vector.shape_cast %18 : vector<2x8x64xf32> to vector<16x64xf32>
    %cst = arith.constant dense<0.000000e+00> : vector<16x32xf32>
    %20 = tpu.matmul %19, %2, %cst {dimension_numbers = #tpu.dot_dimension_numbers<[1], [0], [0], [1], [0, 0, 1, 1], [], []>} : vector<16x64xf32>, vector<64x32xf32>, vector<16x32xf32> -> vector<16x32xf32>
    %21 = vector.shape_cast %3 : vector<8x32xf32> to vector<1x8x32xf32>
    %22 = vector.shape_cast %21 : vector<1x8x32xf32> to vector<1x8x32xf32>
    %23 = vector.broadcast %22 : vector<1x8x32xf32> to vector<2x8x32xf32>
    %24 = vector.shape_cast %23 : vector<2x8x32xf32> to vector<16x32xf32>
    %25 = arith.addf %20, %24 : vector<16x32xf32>
    %cst_14 = arith.constant dense<0.000000e+00> : vector<16x96xf32>
    %26 = tpu.matmul %25, %4, %cst_14 {dimension_numbers = #tpu.dot_dimension_numbers<[1], [0], [0], [1], [0, 0, 1, 1], [], []>} : vector<16x32xf32>, vector<32x96xf32>, vector<16x96xf32> -> vector<16x96xf32>
    %27 = vector.extract_strided_slice %26 {offsets = [0, 0], sizes = [16, 32], strides = [1, 1]} : vector<16x96xf32> to vector<16x32xf32>
    %28 = vector.shape_cast %27 : vector<16x32xf32> to vector<2x8x32xf32>
    %29 = vector.extract_strided_slice %28 {offsets = [0, 0, 0], sizes = [2, 1, 32], strides = [1, 1, 1]} : vector<2x8x32xf32> to vector<2x1x32xf32>
    %30 = vector.extract_strided_slice %26 {offsets = [0, 32], sizes = [16, 32], strides = [1, 1]} : vector<16x96xf32> to vector<16x32xf32>
    %31 = vector.shape_cast %30 : vector<16x32xf32> to vector<2x8x32xf32>
    %32 = vector.extract_strided_slice %26 {offsets = [0, 64], sizes = [16, 32], strides = [1, 1]} : vector<16x96xf32> to vector<16x32xf32>
    %33 = vector.shape_cast %32 : vector<16x32xf32> to vector<2x8x32xf32>
    "tpu.trace_start"() <{level = 10 : i32, message = "nqd,nkd->nqk"}> : () -> ()
    %cst_15 = arith.constant dense<0.000000e+00> : vector<2x1x8xf32>
    %34 = tpu.matmul %29, %31, %cst_15 {dimension_numbers = #tpu.dot_dimension_numbers<[2], [2], [1], [1], [0, 0, 0, 1, 1, 1], [0], [0]>} : vector<2x1x32xf32>, vector<2x8x32xf32>, vector<2x1x8xf32> -> vector<2x1x8xf32>
    "tpu.trace_stop"() : () -> ()
    %cst_16 = arith.constant dense<0xFF800000> : vector<2x1xf32>
    %35 = vector.multi_reduction <maximumf>, %34, %cst_16 [2] : vector<2x1x8xf32> to vector<2x1xf32>
    %36 = vector.shape_cast %35 : vector<2x1xf32> to vector<2x1x1xf32>
    %37 = vector.broadcast %36 : vector<2x1x1xf32> to vector<2x1x8xf32>
    %38 = arith.subf %34, %37 : vector<2x1x8xf32>
    %39 = math.exp %38 : vector<2x1x8xf32>
    %cst_17 = arith.constant dense<0.000000e+00> : vector<2x1xf32>
    %40 = vector.multi_reduction <add>, %39, %cst_17 [2] : vector<2x1x8xf32> to vector<2x1xf32>
    %41 = vector.shape_cast %40 : vector<2x1xf32> to vector<2x1x1xf32>
    %42 = tpu.reciprocal %41 {approx = true} : vector<2x1x1xf32> -> vector<2x1x1xf32>
    %43 = vector.broadcast %42 : vector<2x1x1xf32> to vector<2x1x8xf32>
    %44 = arith.mulf %39, %43 : vector<2x1x8xf32>
    "tpu.trace_start"() <{level = 10 : i32, message = "nqk,nkd->nqd"}> : () -> ()
    %cst_18 = arith.constant dense<0.000000e+00> : vector<2x1x32xf32>
    %45 = tpu.matmul %44, %33, %cst_18 {dimension_numbers = #tpu.dot_dimension_numbers<[2], [1], [1], [2], [0, 0, 0, 1, 1, 2], [0], [0]>} : vector<2x1x8xf32>, vector<2x8x32xf32>, vector<2x1x32xf32> -> vector<2x1x32xf32>
    "tpu.trace_stop"() : () -> ()
    %46 = vector.shape_cast %45 : vector<2x1x32xf32> to vector<2x32xf32>
    %47 = vector.shape_cast %25 : vector<16x32xf32> to vector<2x8x32xf32>
    %48 = vector.extract_strided_slice %47 {offsets = [0, 0, 0], sizes = [2, 1, 32], strides = [1, 1, 1]} : vector<2x8x32xf32> to vector<2x1x32xf32>
    %49 = vector.shape_cast %48 : vector<2x1x32xf32> to vector<2x32xf32>
    %50 = arith.addf %49, %46 : vector<2x32xf32>
    %cst_19 = arith.constant dense<0.000000e+00> : vector<2xf32>
    %51 = vector.multi_reduction <add>, %50, %cst_19 [1] : vector<2x32xf32> to vector<2xf32>
    %52 = vector.shape_cast %51 : vector<2xf32> to vector<2x1xf32>
    %cst_20 = arith.constant 3.200000e+01 : f32
    %53 = vector.broadcast %cst_20 : f32 to vector<2x1xf32>
    %54 = arith.divf %52, %53 : vector<2x1xf32>
    %55 = vector.broadcast %54 : vector<2x1xf32> to vector<2x32xf32>
    %56 = arith.subf %50, %55 : vector<2x32xf32>
    %57 = arith.mulf %56, %56 : vector<2x32xf32>
    %cst_21 = arith.constant dense<0.000000e+00> : vector<2xf32>
    %58 = vector.multi_reduction <add>, %57, %cst_21 [1] : vector<2x32xf32> to vector<2xf32>
    %59 = vector.shape_cast %58 : vector<2xf32> to vector<2x1xf32>
    %cst_22 = arith.constant 3.200000e+01 : f32
    %60 = vector.broadcast %cst_22 : f32 to vector<2x1xf32>
    %61 = arith.divf %59, %60 : vector<2x1xf32>
    %62 = vector.broadcast %54 : vector<2x1xf32> to vector<2x32xf32>
    %63 = arith.subf %50, %62 : vector<2x32xf32>
    %cst_23 = arith.constant 9.99999974E-6 : f32
    %64 = vector.broadcast %cst_23 : f32 to vector<2x1xf32>
    %65 = arith.addf %61, %64 : vector<2x1xf32>
    %66 = math.rsqrt %65 : vector<2x1xf32>
    %67 = vector.broadcast %66 : vector<2x1xf32> to vector<2x32xf32>
    %68 = arith.mulf %63, %67 : vector<2x32xf32>
    %69 = vector.broadcast %9 : vector<1x32xf32> to vector<2x32xf32>
    %70 = arith.mulf %68, %69 : vector<2x32xf32>
    %71 = vector.broadcast %10 : vector<1x32xf32> to vector<2x32xf32>
    %72 = arith.addf %70, %71 : vector<2x32xf32>
    %cst_24 = arith.constant dense<0.000000e+00> : vector<2x64xf32>
    %73 = tpu.matmul %72, %5, %cst_24 {dimension_numbers = #tpu.dot_dimension_numbers<[1], [0], [0], [1], [0, 0, 1, 1], [], []>} : vector<2x32xf32>, vector<32x64xf32>, vector<2x64xf32> -> vector<2x64xf32>
    %74 = vector.broadcast %7 : vector<1x64xf32> to vector<2x64xf32>
    %75 = arith.addf %73, %74 : vector<2x64xf32>
    %76 = arith.mulf %75, %75 : vector<2x64xf32>
    %77 = arith.mulf %75, %76 : vector<2x64xf32>
    %cst_25 = arith.constant 4.471500e-02 : f32
    %78 = vector.broadcast %cst_25 : f32 to vector<2x64xf32>
    %79 = arith.mulf %78, %77 : vector<2x64xf32>
    %80 = arith.addf %75, %79 : vector<2x64xf32>
    %cst_26 = arith.constant 0.797884583 : f32
    %81 = vector.broadcast %cst_26 : f32 to vector<2x64xf32>
    %82 = arith.mulf %81, %80 : vector<2x64xf32>
    %83 = math.tanh %82 : vector<2x64xf32>
    %cst_27 = arith.constant 1.000000e+00 : f32
    %84 = vector.broadcast %cst_27 : f32 to vector<2x64xf32>
    %85 = arith.addf %84, %83 : vector<2x64xf32>
    %cst_28 = arith.constant 5.000000e-01 : f32
    %86 = vector.broadcast %cst_28 : f32 to vector<2x64xf32>
    %87 = arith.mulf %86, %85 : vector<2x64xf32>
    %88 = arith.mulf %75, %87 : vector<2x64xf32>
    %cst_29 = arith.constant dense<0.000000e+00> : vector<2x32xf32>
    %89 = tpu.matmul %88, %6, %cst_29 {dimension_numbers = #tpu.dot_dimension_numbers<[1], [0], [0], [1], [0, 0, 1, 1], [], []>} : vector<2x64xf32>, vector<64x32xf32>, vector<2x32xf32> -> vector<2x32xf32>
    %90 = vector.broadcast %8 : vector<1x32xf32> to vector<2x32xf32>
    %91 = arith.addf %89, %90 : vector<2x32xf32>
    %92 = arith.addf %72, %91 : vector<2x32xf32>
    %cst_30 = arith.constant dense<0.000000e+00> : vector<2xf32>
    %93 = vector.multi_reduction <add>, %92, %cst_30 [1] : vector<2x32xf32> to vector<2xf32>
    %94 = vector.shape_cast %93 : vector<2xf32> to vector<2x1xf32>
    %cst_31 = arith.constant 3.200000e+01 : f32
    %95 = vector.broadcast %cst_31 : f32 to vector<2x1xf32>
    %96 = arith.divf %94, %95 : vector<2x1xf32>
    %97 = vector.broadcast %96 : vector<2x1xf32> to vector<2x32xf32>
    %98 = arith.subf %92, %97 : vector<2x32xf32>
    %99 = arith.mulf %98, %98 : vector<2x32xf32>
    %cst_32 = arith.constant dense<0.000000e+00> : vector<2xf32>
    %100 = vector.multi_reduction <add>, %99, %cst_32 [1] : vector<2x32xf32> to vector<2xf32>
    %101 = vector.shape_cast %100 : vector<2xf32> to vector<2x1xf32>
    %cst_33 = arith.constant 3.200000e+01 : f32
    %102 = vector.broadcast %cst_33 : f32 to vector<2x1xf32>
    %103 = arith.divf %101, %102 : vector<2x1xf32>
    %104 = vector.broadcast %96 : vector<2x1xf32> to vector<2x32xf32>
    %105 = arith.subf %92, %104 : vector<2x32xf32>
    %cst_34 = arith.constant 9.99999974E-6 : f32
    %106 = vector.broadcast %cst_34 : f32 to vector<2x1xf32>
    %107 = arith.addf %103, %106 : vector<2x1xf32>
    %108 = math.rsqrt %107 : vector<2x1xf32>
    %109 = vector.broadcast %108 : vector<2x1xf32> to vector<2x32xf32>
    %110 = arith.mulf %105, %109 : vector<2x32xf32>
    %111 = vector.broadcast %11 : vector<1x32xf32> to vector<2x32xf32>
    %112 = arith.mulf %110, %111 : vector<2x32xf32>
    %113 = vector.broadcast %12 : vector<1x32xf32> to vector<2x32xf32>
    %114 = arith.addf %112, %113 : vector<2x32xf32>
    %c208 = arith.constant 208 : index
    %c0_35 = arith.constant 0 : index
    %115 = vector.load %arg2[%c208, %c0_35] : memref<592x128xf32, #tpu.memory_space<vmem>>, vector<64x32xf32>
    %c272 = arith.constant 272 : index
    %c0_36 = arith.constant 0 : index
    %116 = vector.load %arg2[%c272, %c0_36] : memref<592x128xf32, #tpu.memory_space<vmem>>, vector<8x32xf32>
    %c280 = arith.constant 280 : index
    %c0_37 = arith.constant 0 : index
    %117 = vector.load %arg2[%c280, %c0_37] : memref<592x128xf32, #tpu.memory_space<vmem>>, vector<32x96xf32>
    %c312 = arith.constant 312 : index
    %c0_38 = arith.constant 0 : index
    %118 = vector.load %arg2[%c312, %c0_38] : memref<592x128xf32, #tpu.memory_space<vmem>>, vector<32x64xf32>
    %c344 = arith.constant 344 : index
    %c0_39 = arith.constant 0 : index
    %119 = vector.load %arg2[%c344, %c0_39] : memref<592x128xf32, #tpu.memory_space<vmem>>, vector<64x32xf32>
    %c408 = arith.constant 408 : index
    %c0_40 = arith.constant 0 : index
    %120 = vector.load %arg2[%c408, %c0_40] : memref<592x128xf32, #tpu.memory_space<vmem>>, vector<1x64xf32>
    %c409 = arith.constant 409 : index
    %c0_41 = arith.constant 0 : index
    %121 = vector.load %arg2[%c409, %c0_41] : memref<592x128xf32, #tpu.memory_space<vmem>>, vector<1x32xf32>
    %c410 = arith.constant 410 : index
    %c0_42 = arith.constant 0 : index
    %122 = vector.load %arg2[%c410, %c0_42] : memref<592x128xf32, #tpu.memory_space<vmem>>, vector<1x32xf32>
    %c411 = arith.constant 411 : index
    %c0_43 = arith.constant 0 : index
    %123 = vector.load %arg2[%c411, %c0_43] : memref<592x128xf32, #tpu.memory_space<vmem>>, vector<1x32xf32>
    %c412 = arith.constant 412 : index
    %c0_44 = arith.constant 0 : index
    %124 = vector.load %arg2[%c412, %c0_44] : memref<592x128xf32, #tpu.memory_space<vmem>>, vector<1x32xf32>
    %c413 = arith.constant 413 : index
    %c0_45 = arith.constant 0 : index
    %125 = vector.load %arg2[%c413, %c0_45] : memref<592x128xf32, #tpu.memory_space<vmem>>, vector<1x32xf32>
    %126 = vector.shape_cast %1 : vector<8x8xi32> to vector<8x8x1xi32>
    %127 = tpu.iota {dimensions = array<i32: 2>} : vector<8x8x64xi32>
    %128 = vector.broadcast %126 : vector<8x8x1xi32> to vector<8x8x64xi32>
    %129 = arith.cmpi eq, %128, %127 : vector<8x8x64xi32>
    %130 = arith.extui %129 : vector<8x8x64xi1> to vector<8x8x64xi32>
    %131 = arith.sitofp %130 : vector<8x8x64xi32> to vector<8x8x64xf32>
    %132 = vector.shape_cast %131 : vector<8x8x64xf32> to vector<64x64xf32>
    %cst_46 = arith.constant dense<0.000000e+00> : vector<64x32xf32>
    %133 = tpu.matmul %132, %115, %cst_46 {dimension_numbers = #tpu.dot_dimension_numbers<[1], [0], [0], [1], [0, 0, 1, 1], [], []>} : vector<64x64xf32>, vector<64x32xf32>, vector<64x32xf32> -> vector<64x32xf32>
    %134 = vector.shape_cast %116 : vector<8x32xf32> to vector<1x8x32xf32>
    %135 = vector.shape_cast %134 : vector<1x8x32xf32> to vector<1x8x32xf32>
    %136 = vector.broadcast %135 : vector<1x8x32xf32> to vector<8x8x32xf32>
    %137 = vector.shape_cast %136 : vector<8x8x32xf32> to vector<64x32xf32>
    %138 = arith.addf %133, %137 : vector<64x32xf32>
    %cst_47 = arith.constant dense<0.000000e+00> : vector<64x96xf32>
    %139 = tpu.matmul %138, %117, %cst_47 {dimension_numbers = #tpu.dot_dimension_numbers<[1], [0], [0], [1], [0, 0, 1, 1], [], []>} : vector<64x32xf32>, vector<32x96xf32>, vector<64x96xf32> -> vector<64x96xf32>
    %140 = vector.extract_strided_slice %139 {offsets = [0, 0], sizes = [64, 32], strides = [1, 1]} : vector<64x96xf32> to vector<64x32xf32>
    %141 = vector.shape_cast %140 : vector<64x32xf32> to vector<8x8x32xf32>
    %142 = vector.extract_strided_slice %141 {offsets = [0, 0, 0], sizes = [8, 1, 32], strides = [1, 1, 1]} : vector<8x8x32xf32> to vector<8x1x32xf32>
    %143 = vector.extract_strided_slice %139 {offsets = [0, 32], sizes = [64, 32], strides = [1, 1]} : vector<64x96xf32> to vector<64x32xf32>
    %144 = vector.shape_cast %143 : vector<64x32xf32> to vector<8x8x32xf32>
    %145 = vector.extract_strided_slice %139 {offsets = [0, 64], sizes = [64, 32], strides = [1, 1]} : vector<64x96xf32> to vector<64x32xf32>
    %146 = vector.shape_cast %145 : vector<64x32xf32> to vector<8x8x32xf32>
    "tpu.trace_start"() <{level = 10 : i32, message = "nqd,nkd->nqk"}> : () -> ()
    %cst_48 = arith.constant dense<0.000000e+00> : vector<8x1x8xf32>
    %147 = tpu.matmul %142, %144, %cst_48 {dimension_numbers = #tpu.dot_dimension_numbers<[2], [2], [1], [1], [0, 0, 0, 1, 1, 1], [0], [0]>} : vector<8x1x32xf32>, vector<8x8x32xf32>, vector<8x1x8xf32> -> vector<8x1x8xf32>
    "tpu.trace_stop"() : () -> ()
    %cst_49 = arith.constant dense<0xFF800000> : vector<8x1xf32>
    %148 = vector.multi_reduction <maximumf>, %147, %cst_49 [2] : vector<8x1x8xf32> to vector<8x1xf32>
    %149 = vector.shape_cast %148 : vector<8x1xf32> to vector<8x1x1xf32>
    %150 = vector.broadcast %149 : vector<8x1x1xf32> to vector<8x1x8xf32>
    %151 = arith.subf %147, %150 : vector<8x1x8xf32>
    %152 = math.exp %151 : vector<8x1x8xf32>
    %cst_50 = arith.constant dense<0.000000e+00> : vector<8x1xf32>
    %153 = vector.multi_reduction <add>, %152, %cst_50 [2] : vector<8x1x8xf32> to vector<8x1xf32>
    %154 = vector.shape_cast %153 : vector<8x1xf32> to vector<8x1x1xf32>
    %155 = tpu.reciprocal %154 {approx = true} : vector<8x1x1xf32> -> vector<8x1x1xf32>
    %156 = vector.broadcast %155 : vector<8x1x1xf32> to vector<8x1x8xf32>
    %157 = arith.mulf %152, %156 : vector<8x1x8xf32>
    "tpu.trace_start"() <{level = 10 : i32, message = "nqk,nkd->nqd"}> : () -> ()
    %cst_51 = arith.constant dense<0.000000e+00> : vector<8x1x32xf32>
    %158 = tpu.matmul %157, %146, %cst_51 {dimension_numbers = #tpu.dot_dimension_numbers<[2], [1], [1], [2], [0, 0, 0, 1, 1, 2], [0], [0]>} : vector<8x1x8xf32>, vector<8x8x32xf32>, vector<8x1x32xf32> -> vector<8x1x32xf32>
    "tpu.trace_stop"() : () -> ()
    %159 = vector.shape_cast %158 : vector<8x1x32xf32> to vector<8x32xf32>
    %160 = vector.shape_cast %138 : vector<64x32xf32> to vector<8x8x32xf32>
    %161 = vector.extract_strided_slice %160 {offsets = [0, 0, 0], sizes = [8, 1, 32], strides = [1, 1, 1]} : vector<8x8x32xf32> to vector<8x1x32xf32>
    %162 = vector.shape_cast %161 : vector<8x1x32xf32> to vector<8x32xf32>
    %163 = arith.addf %162, %159 : vector<8x32xf32>
    %cst_52 = arith.constant dense<0.000000e+00> : vector<8xf32>
    %164 = vector.multi_reduction <add>, %163, %cst_52 [1] : vector<8x32xf32> to vector<8xf32>
    %165 = vector.shape_cast %164 : vector<8xf32> to vector<8x1xf32>
    %cst_53 = arith.constant 3.200000e+01 : f32
    %166 = vector.broadcast %cst_53 : f32 to vector<8x1xf32>
    %167 = arith.divf %165, %166 : vector<8x1xf32>
    %168 = vector.broadcast %167 : vector<8x1xf32> to vector<8x32xf32>
    %169 = arith.subf %163, %168 : vector<8x32xf32>
    %170 = arith.mulf %169, %169 : vector<8x32xf32>
    %cst_54 = arith.constant dense<0.000000e+00> : vector<8xf32>
    %171 = vector.multi_reduction <add>, %170, %cst_54 [1] : vector<8x32xf32> to vector<8xf32>
    %172 = vector.shape_cast %171 : vector<8xf32> to vector<8x1xf32>
    %cst_55 = arith.constant 3.200000e+01 : f32
    %173 = vector.broadcast %cst_55 : f32 to vector<8x1xf32>
    %174 = arith.divf %172, %173 : vector<8x1xf32>
    %175 = vector.broadcast %167 : vector<8x1xf32> to vector<8x32xf32>
    %176 = arith.subf %163, %175 : vector<8x32xf32>
    %cst_56 = arith.constant 9.99999974E-6 : f32
    %177 = vector.broadcast %cst_56 : f32 to vector<8x1xf32>
    %178 = arith.addf %174, %177 : vector<8x1xf32>
    %179 = math.rsqrt %178 : vector<8x1xf32>
    %180 = vector.broadcast %179 : vector<8x1xf32> to vector<8x32xf32>
    %181 = arith.mulf %176, %180 : vector<8x32xf32>
    %182 = vector.broadcast %122 : vector<1x32xf32> to vector<8x32xf32>
    %183 = arith.mulf %181, %182 : vector<8x32xf32>
    %184 = vector.broadcast %123 : vector<1x32xf32> to vector<8x32xf32>
    %185 = arith.addf %183, %184 : vector<8x32xf32>
    %cst_57 = arith.constant dense<0.000000e+00> : vector<8x64xf32>
    %186 = tpu.matmul %185, %118, %cst_57 {dimension_numbers = #tpu.dot_dimension_numbers<[1], [0], [0], [1], [0, 0, 1, 1], [], []>} : vector<8x32xf32>, vector<32x64xf32>, vector<8x64xf32> -> vector<8x64xf32>
    %187 = vector.broadcast %120 : vector<1x64xf32> to vector<8x64xf32>
    %188 = arith.addf %186, %187 : vector<8x64xf32>
    %189 = arith.mulf %188, %188 : vector<8x64xf32>
    %190 = arith.mulf %188, %189 : vector<8x64xf32>
    %cst_58 = arith.constant 4.471500e-02 : f32
    %191 = vector.broadcast %cst_58 : f32 to vector<8x64xf32>
    %192 = arith.mulf %191, %190 : vector<8x64xf32>
    %193 = arith.addf %188, %192 : vector<8x64xf32>
    %cst_59 = arith.constant 0.797884583 : f32
    %194 = vector.broadcast %cst_59 : f32 to vector<8x64xf32>
    %195 = arith.mulf %194, %193 : vector<8x64xf32>
    %196 = math.tanh %195 : vector<8x64xf32>
    %cst_60 = arith.constant 1.000000e+00 : f32
    %197 = vector.broadcast %cst_60 : f32 to vector<8x64xf32>
    %198 = arith.addf %197, %196 : vector<8x64xf32>
    %cst_61 = arith.constant 5.000000e-01 : f32
    %199 = vector.broadcast %cst_61 : f32 to vector<8x64xf32>
    %200 = arith.mulf %199, %198 : vector<8x64xf32>
    %201 = arith.mulf %188, %200 : vector<8x64xf32>
    %cst_62 = arith.constant dense<0.000000e+00> : vector<8x32xf32>
    %202 = tpu.matmul %201, %119, %cst_62 {dimension_numbers = #tpu.dot_dimension_numbers<[1], [0], [0], [1], [0, 0, 1, 1], [], []>} : vector<8x64xf32>, vector<64x32xf32>, vector<8x32xf32> -> vector<8x32xf32>
    %203 = vector.broadcast %121 : vector<1x32xf32> to vector<8x32xf32>
    %204 = arith.addf %202, %203 : vector<8x32xf32>
    %205 = arith.addf %185, %204 : vector<8x32xf32>
    %cst_63 = arith.constant dense<0.000000e+00> : vector<8xf32>
    %206 = vector.multi_reduction <add>, %205, %cst_63 [1] : vector<8x32xf32> to vector<8xf32>
    %207 = vector.shape_cast %206 : vector<8xf32> to vector<8x1xf32>
    %cst_64 = arith.constant 3.200000e+01 : f32
    %208 = vector.broadcast %cst_64 : f32 to vector<8x1xf32>
    %209 = arith.divf %207, %208 : vector<8x1xf32>
    %210 = vector.broadcast %209 : vector<8x1xf32> to vector<8x32xf32>
    %211 = arith.subf %205, %210 : vector<8x32xf32>
    %212 = arith.mulf %211, %211 : vector<8x32xf32>
    %cst_65 = arith.constant dense<0.000000e+00> : vector<8xf32>
    %213 = vector.multi_reduction <add>, %212, %cst_65 [1] : vector<8x32xf32> to vector<8xf32>
    %214 = vector.shape_cast %213 : vector<8xf32> to vector<8x1xf32>
    %cst_66 = arith.constant 3.200000e+01 : f32
    %215 = vector.broadcast %cst_66 : f32 to vector<8x1xf32>
    %216 = arith.divf %214, %215 : vector<8x1xf32>
    %217 = vector.broadcast %209 : vector<8x1xf32> to vector<8x32xf32>
    %218 = arith.subf %205, %217 : vector<8x32xf32>
    %cst_67 = arith.constant 9.99999974E-6 : f32
    %219 = vector.broadcast %cst_67 : f32 to vector<8x1xf32>
    %220 = arith.addf %216, %219 : vector<8x1xf32>
    %221 = math.rsqrt %220 : vector<8x1xf32>
    %222 = vector.broadcast %221 : vector<8x1xf32> to vector<8x32xf32>
    %223 = arith.mulf %218, %222 : vector<8x32xf32>
    %224 = vector.broadcast %124 : vector<1x32xf32> to vector<8x32xf32>
    %225 = arith.mulf %223, %224 : vector<8x32xf32>
    %226 = vector.broadcast %125 : vector<1x32xf32> to vector<8x32xf32>
    %227 = arith.addf %225, %226 : vector<8x32xf32>
    %c416 = arith.constant 416 : index
    %c0_68 = arith.constant 0 : index
    %228 = vector.load %arg2[%c416, %c0_68] : memref<592x128xf32, #tpu.memory_space<vmem>>, vector<32x128xf32>
    %c448 = arith.constant 448 : index
    %c0_69 = arith.constant 0 : index
    %229 = vector.load %arg2[%c448, %c0_69] : memref<592x128xf32, #tpu.memory_space<vmem>>, vector<32x128xf32>
    %c480 = arith.constant 480 : index
    %c0_70 = arith.constant 0 : index
    %230 = vector.load %arg2[%c480, %c0_70] : memref<592x128xf32, #tpu.memory_space<vmem>>, vector<32x128xf32>
    %c512 = arith.constant 512 : index
    %c0_71 = arith.constant 0 : index
    %231 = vector.load %arg2[%c512, %c0_71] : memref<592x128xf32, #tpu.memory_space<vmem>>, vector<32x128xf32>
    %c544 = arith.constant 544 : index
    %c0_72 = arith.constant 0 : index
    %232 = vector.load %arg2[%c544, %c0_72] : memref<592x128xf32, #tpu.memory_space<vmem>>, vector<1x128xf32>
    %c545 = arith.constant 545 : index
    %c0_73 = arith.constant 0 : index
    %233 = vector.load %arg2[%c545, %c0_73] : memref<592x128xf32, #tpu.memory_space<vmem>>, vector<1x128xf32>
    %c546 = arith.constant 546 : index
    %c0_74 = arith.constant 0 : index
    %234 = vector.load %arg2[%c546, %c0_74] : memref<592x128xf32, #tpu.memory_space<vmem>>, vector<1x128xf32>
    %c547 = arith.constant 547 : index
    %c0_75 = arith.constant 0 : index
    %235 = vector.load %arg2[%c547, %c0_75] : memref<592x128xf32, #tpu.memory_space<vmem>>, vector<1x128xf32>
    %cst_76 = arith.constant dense<0.000000e+00> : vector<8x128xf32>
    %236 = tpu.matmul %227, %228, %cst_76 {dimension_numbers = #tpu.dot_dimension_numbers<[1], [0], [0], [1], [0, 0, 1, 1], [], []>} : vector<8x32xf32>, vector<32x128xf32>, vector<8x128xf32> -> vector<8x128xf32>
    %237 = vector.broadcast %232 : vector<1x128xf32> to vector<8x128xf32>
    %238 = arith.addf %236, %237 : vector<8x128xf32>
    %c0_77 = arith.constant 0 : index
    %c0_78 = arith.constant 0 : index
    %239 = vector.load %arg1[%c0_77, %c0_78] : memref<2x1xi32, #tpu.memory_space<vmem>>, vector<2x1xi32>
    %240 = tpu.iota {dimensions = array<i32: 0>} : vector<4x2x1xi32>
    %241 = vector.shape_cast %239 : vector<2x1xi32> to vector<1x2x1xi32>
    %242 = vector.broadcast %241 : vector<1x2x1xi32> to vector<4x2x1xi32>
    %243 = arith.cmpi sgt, %242, %240 : vector<4x2x1xi32>
    %244 = vector.shape_cast %243 : vector<4x2x1xi1> to vector<4x2x1xi1>
    %245 = vector.broadcast %244 : vector<4x2x1xi1> to vector<4x2x32xi1>
    %cst_79 = arith.constant 0.000000e+00 : f32
    %246 = vector.broadcast %cst_79 : f32 to vector<2x32xf32>
    %cst_80 = arith.constant 0.000000e+00 : f32
    %247 = vector.broadcast %cst_80 : f32 to vector<2x32xf32>
    %248 = vector.extract_strided_slice %238 {offsets = [0, 0], sizes = [2, 128], strides = [1, 1]} : vector<8x128xf32> to vector<2x128xf32>
    %cst_81 = arith.constant dense<0.000000e+00> : vector<2x128xf32>
    %249 = tpu.matmul %246, %229, %cst_81 {dimension_numbers = #tpu.dot_dimension_numbers<[1], [0], [0], [1], [0, 0, 1, 1], [], []>} : vector<2x32xf32>, vector<32x128xf32>, vector<2x128xf32> -> vector<2x128xf32>
    %250 = vector.broadcast %233 : vector<1x128xf32> to vector<2x128xf32>
    %251 = arith.addf %249, %250 : vector<2x128xf32>
    %252 = vector.extract_strided_slice %248 {offsets = [0, 0], sizes = [2, 32], strides = [1, 1]} : vector<2x128xf32> to vector<2x32xf32>
    %253 = vector.extract_strided_slice %251 {offsets = [0, 0], sizes = [2, 32], strides = [1, 1]} : vector<2x128xf32> to vector<2x32xf32>
    %254 = arith.addf %252, %253 : vector<2x32xf32>
    %255 = arith.negf %254 : vector<2x32xf32>
    %256 = math.exp %255 : vector<2x32xf32>
    %cst_82 = arith.constant 1.000000e+00 : f32
    %257 = vector.broadcast %cst_82 : f32 to vector<2x32xf32>
    %258 = arith.addf %257, %256 : vector<2x32xf32>
    %259 = arith.divf %257, %258 : vector<2x32xf32>
    %260 = vector.extract_strided_slice %248 {offsets = [0, 32], sizes = [2, 32], strides = [1, 1]} : vector<2x128xf32> to vector<2x32xf32>
    %261 = vector.extract_strided_slice %251 {offsets = [0, 32], sizes = [2, 32], strides = [1, 1]} : vector<2x128xf32> to vector<2x32xf32>
    %262 = arith.addf %260, %261 : vector<2x32xf32>
    %263 = arith.negf %262 : vector<2x32xf32>
    %264 = math.exp %263 : vector<2x32xf32>
    %cst_83 = arith.constant 1.000000e+00 : f32
    %265 = vector.broadcast %cst_83 : f32 to vector<2x32xf32>
    %266 = arith.addf %265, %264 : vector<2x32xf32>
    %267 = arith.divf %265, %266 : vector<2x32xf32>
    %268 = vector.extract_strided_slice %248 {offsets = [0, 64], sizes = [2, 32], strides = [1, 1]} : vector<2x128xf32> to vector<2x32xf32>
    %269 = vector.extract_strided_slice %251 {offsets = [0, 64], sizes = [2, 32], strides = [1, 1]} : vector<2x128xf32> to vector<2x32xf32>
    %270 = arith.mulf %259, %269 : vector<2x32xf32>
    %271 = arith.addf %268, %270 : vector<2x32xf32>
    %272 = math.tanh %271 : vector<2x32xf32>
    %cst_84 = arith.constant 1.000000e+00 : f32
    %273 = vector.broadcast %cst_84 : f32 to vector<2x32xf32>
    %274 = arith.subf %273, %267 : vector<2x32xf32>
    %275 = arith.mulf %274, %272 : vector<2x32xf32>
    %276 = arith.mulf %267, %246 : vector<2x32xf32>
    %277 = arith.addf %275, %276 : vector<2x32xf32>
    %cst_85 = arith.constant dense<0.000000e+00> : vector<2x128xf32>
    %278 = tpu.matmul %277, %230, %cst_85 {dimension_numbers = #tpu.dot_dimension_numbers<[1], [0], [0], [1], [0, 0, 1, 1], [], []>} : vector<2x32xf32>, vector<32x128xf32>, vector<2x128xf32> -> vector<2x128xf32>
    %279 = vector.broadcast %234 : vector<1x128xf32> to vector<2x128xf32>
    %280 = arith.addf %278, %279 : vector<2x128xf32>
    %cst_86 = arith.constant dense<0.000000e+00> : vector<2x128xf32>
    %281 = tpu.matmul %247, %231, %cst_86 {dimension_numbers = #tpu.dot_dimension_numbers<[1], [0], [0], [1], [0, 0, 1, 1], [], []>} : vector<2x32xf32>, vector<32x128xf32>, vector<2x128xf32> -> vector<2x128xf32>
    %282 = vector.broadcast %235 : vector<1x128xf32> to vector<2x128xf32>
    %283 = arith.addf %281, %282 : vector<2x128xf32>
    %284 = vector.extract_strided_slice %280 {offsets = [0, 0], sizes = [2, 32], strides = [1, 1]} : vector<2x128xf32> to vector<2x32xf32>
    %285 = vector.extract_strided_slice %283 {offsets = [0, 0], sizes = [2, 32], strides = [1, 1]} : vector<2x128xf32> to vector<2x32xf32>
    %286 = arith.addf %284, %285 : vector<2x32xf32>
    %287 = arith.negf %286 : vector<2x32xf32>
    %288 = math.exp %287 : vector<2x32xf32>
    %cst_87 = arith.constant 1.000000e+00 : f32
    %289 = vector.broadcast %cst_87 : f32 to vector<2x32xf32>
    %290 = arith.addf %289, %288 : vector<2x32xf32>
    %291 = arith.divf %289, %290 : vector<2x32xf32>
    %292 = vector.extract_strided_slice %280 {offsets = [0, 32], sizes = [2, 32], strides = [1, 1]} : vector<2x128xf32> to vector<2x32xf32>
    %293 = vector.extract_strided_slice %283 {offsets = [0, 32], sizes = [2, 32], strides = [1, 1]} : vector<2x128xf32> to vector<2x32xf32>
    %294 = arith.addf %292, %293 : vector<2x32xf32>
    %295 = arith.negf %294 : vector<2x32xf32>
    %296 = math.exp %295 : vector<2x32xf32>
    %cst_88 = arith.constant 1.000000e+00 : f32
    %297 = vector.broadcast %cst_88 : f32 to vector<2x32xf32>
    %298 = arith.addf %297, %296 : vector<2x32xf32>
    %299 = arith.divf %297, %298 : vector<2x32xf32>
    %300 = vector.extract_strided_slice %280 {offsets = [0, 64], sizes = [2, 32], strides = [1, 1]} : vector<2x128xf32> to vector<2x32xf32>
    %301 = vector.extract_strided_slice %283 {offsets = [0, 64], sizes = [2, 32], strides = [1, 1]} : vector<2x128xf32> to vector<2x32xf32>
    %302 = arith.mulf %291, %301 : vector<2x32xf32>
    %303 = arith.addf %300, %302 : vector<2x32xf32>
    %304 = math.tanh %303 : vector<2x32xf32>
    %cst_89 = arith.constant 1.000000e+00 : f32
    %305 = vector.broadcast %cst_89 : f32 to vector<2x32xf32>
    %306 = arith.subf %305, %299 : vector<2x32xf32>
    %307 = arith.mulf %306, %304 : vector<2x32xf32>
    %308 = arith.mulf %299, %247 : vector<2x32xf32>
    %309 = arith.addf %307, %308 : vector<2x32xf32>
    %310 = vector.extract_strided_slice %245 {offsets = [0, 0, 0], sizes = [1, 2, 32], strides = [1, 1, 1]} : vector<4x2x32xi1> to vector<1x2x32xi1>
    %311 = vector.shape_cast %310 : vector<1x2x32xi1> to vector<2x32xi1>
    %312 = arith.select %311, %277, %246 : vector<2x32xi1>, vector<2x32xf32>
    %313 = vector.extract_strided_slice %245 {offsets = [0, 0, 0], sizes = [1, 2, 32], strides = [1, 1, 1]} : vector<4x2x32xi1> to vector<1x2x32xi1>
    %314 = vector.shape_cast %313 : vector<1x2x32xi1> to vector<2x32xi1>
    %315 = arith.select %314, %309, %247 : vector<2x32xi1>, vector<2x32xf32>
    %316 = vector.extract_strided_slice %238 {offsets = [2, 0], sizes = [2, 128], strides = [1, 1]} : vector<8x128xf32> to vector<2x128xf32>
    %cst_90 = arith.constant dense<0.000000e+00> : vector<2x128xf32>
    %317 = tpu.matmul %312, %229, %cst_90 {dimension_numbers = #tpu.dot_dimension_numbers<[1], [0], [0], [1], [0, 0, 1, 1], [], []>} : vector<2x32xf32>, vector<32x128xf32>, vector<2x128xf32> -> vector<2x128xf32>
    %318 = vector.broadcast %233 : vector<1x128xf32> to vector<2x128xf32>
    %319 = arith.addf %317, %318 : vector<2x128xf32>
    %320 = vector.extract_strided_slice %316 {offsets = [0, 0], sizes = [2, 32], strides = [1, 1]} : vector<2x128xf32> to vector<2x32xf32>
    %321 = vector.extract_strided_slice %319 {offsets = [0, 0], sizes = [2, 32], strides = [1, 1]} : vector<2x128xf32> to vector<2x32xf32>
    %322 = arith.addf %320, %321 : vector<2x32xf32>
    %323 = arith.negf %322 : vector<2x32xf32>
    %324 = math.exp %323 : vector<2x32xf32>
    %cst_91 = arith.constant 1.000000e+00 : f32
    %325 = vector.broadcast %cst_91 : f32 to vector<2x32xf32>
    %326 = arith.addf %325, %324 : vector<2x32xf32>
    %327 = arith.divf %325, %326 : vector<2x32xf32>
    %328 = vector.extract_strided_slice %316 {offsets = [0, 32], sizes = [2, 32], strides = [1, 1]} : vector<2x128xf32> to vector<2x32xf32>
    %329 = vector.extract_strided_slice %319 {offsets = [0, 32], sizes = [2, 32], strides = [1, 1]} : vector<2x128xf32> to vector<2x32xf32>
    %330 = arith.addf %328, %329 : vector<2x32xf32>
    %331 = arith.negf %330 : vector<2x32xf32>
    %332 = math.exp %331 : vector<2x32xf32>
    %cst_92 = arith.constant 1.000000e+00 : f32
    %333 = vector.broadcast %cst_92 : f32 to vector<2x32xf32>
    %334 = arith.addf %333, %332 : vector<2x32xf32>
    %335 = arith.divf %333, %334 : vector<2x32xf32>
    %336 = vector.extract_strided_slice %316 {offsets = [0, 64], sizes = [2, 32], strides = [1, 1]} : vector<2x128xf32> to vector<2x32xf32>
    %337 = vector.extract_strided_slice %319 {offsets = [0, 64], sizes = [2, 32], strides = [1, 1]} : vector<2x128xf32> to vector<2x32xf32>
    %338 = arith.mulf %327, %337 : vector<2x32xf32>
    %339 = arith.addf %336, %338 : vector<2x32xf32>
    %340 = math.tanh %339 : vector<2x32xf32>
    %cst_93 = arith.constant 1.000000e+00 : f32
    %341 = vector.broadcast %cst_93 : f32 to vector<2x32xf32>
    %342 = arith.subf %341, %335 : vector<2x32xf32>
    %343 = arith.mulf %342, %340 : vector<2x32xf32>
    %344 = arith.mulf %335, %312 : vector<2x32xf32>
    %345 = arith.addf %343, %344 : vector<2x32xf32>
    %cst_94 = arith.constant dense<0.000000e+00> : vector<2x128xf32>
    %346 = tpu.matmul %345, %230, %cst_94 {dimension_numbers = #tpu.dot_dimension_numbers<[1], [0], [0], [1], [0, 0, 1, 1], [], []>} : vector<2x32xf32>, vector<32x128xf32>, vector<2x128xf32> -> vector<2x128xf32>
    %347 = vector.broadcast %234 : vector<1x128xf32> to vector<2x128xf32>
    %348 = arith.addf %346, %347 : vector<2x128xf32>
    %cst_95 = arith.constant dense<0.000000e+00> : vector<2x128xf32>
    %349 = tpu.matmul %315, %231, %cst_95 {dimension_numbers = #tpu.dot_dimension_numbers<[1], [0], [0], [1], [0, 0, 1, 1], [], []>} : vector<2x32xf32>, vector<32x128xf32>, vector<2x128xf32> -> vector<2x128xf32>
    %350 = vector.broadcast %235 : vector<1x128xf32> to vector<2x128xf32>
    %351 = arith.addf %349, %350 : vector<2x128xf32>
    %352 = vector.extract_strided_slice %348 {offsets = [0, 0], sizes = [2, 32], strides = [1, 1]} : vector<2x128xf32> to vector<2x32xf32>
    %353 = vector.extract_strided_slice %351 {offsets = [0, 0], sizes = [2, 32], strides = [1, 1]} : vector<2x128xf32> to vector<2x32xf32>
    %354 = arith.addf %352, %353 : vector<2x32xf32>
    %355 = arith.negf %354 : vector<2x32xf32>
    %356 = math.exp %355 : vector<2x32xf32>
    %cst_96 = arith.constant 1.000000e+00 : f32
    %357 = vector.broadcast %cst_96 : f32 to vector<2x32xf32>
    %358 = arith.addf %357, %356 : vector<2x32xf32>
    %359 = arith.divf %357, %358 : vector<2x32xf32>
    %360 = vector.extract_strided_slice %348 {offsets = [0, 32], sizes = [2, 32], strides = [1, 1]} : vector<2x128xf32> to vector<2x32xf32>
    %361 = vector.extract_strided_slice %351 {offsets = [0, 32], sizes = [2, 32], strides = [1, 1]} : vector<2x128xf32> to vector<2x32xf32>
    %362 = arith.addf %360, %361 : vector<2x32xf32>
    %363 = arith.negf %362 : vector<2x32xf32>
    %364 = math.exp %363 : vector<2x32xf32>
    %cst_97 = arith.constant 1.000000e+00 : f32
    %365 = vector.broadcast %cst_97 : f32 to vector<2x32xf32>
    %366 = arith.addf %365, %364 : vector<2x32xf32>
    %367 = arith.divf %365, %366 : vector<2x32xf32>
    %368 = vector.extract_strided_slice %348 {offsets = [0, 64], sizes = [2, 32], strides = [1, 1]} : vector<2x128xf32> to vector<2x32xf32>
    %369 = vector.extract_strided_slice %351 {offsets = [0, 64], sizes = [2, 32], strides = [1, 1]} : vector<2x128xf32> to vector<2x32xf32>
    %370 = arith.mulf %359, %369 : vector<2x32xf32>
    %371 = arith.addf %368, %370 : vector<2x32xf32>
    %372 = math.tanh %371 : vector<2x32xf32>
    %cst_98 = arith.constant 1.000000e+00 : f32
    %373 = vector.broadcast %cst_98 : f32 to vector<2x32xf32>
    %374 = arith.subf %373, %367 : vector<2x32xf32>
    %375 = arith.mulf %374, %372 : vector<2x32xf32>
    %376 = arith.mulf %367, %315 : vector<2x32xf32>
    %377 = arith.addf %375, %376 : vector<2x32xf32>
    %378 = vector.extract_strided_slice %245 {offsets = [1, 0, 0], sizes = [1, 2, 32], strides = [1, 1, 1]} : vector<4x2x32xi1> to vector<1x2x32xi1>
    %379 = vector.shape_cast %378 : vector<1x2x32xi1> to vector<2x32xi1>
    %380 = arith.select %379, %345, %312 : vector<2x32xi1>, vector<2x32xf32>
    %381 = vector.extract_strided_slice %245 {offsets = [1, 0, 0], sizes = [1, 2, 32], strides = [1, 1, 1]} : vector<4x2x32xi1> to vector<1x2x32xi1>
    %382 = vector.shape_cast %381 : vector<1x2x32xi1> to vector<2x32xi1>
    %383 = arith.select %382, %377, %315 : vector<2x32xi1>, vector<2x32xf32>
    %384 = vector.extract_strided_slice %238 {offsets = [4, 0], sizes = [2, 128], strides = [1, 1]} : vector<8x128xf32> to vector<2x128xf32>
    %cst_99 = arith.constant dense<0.000000e+00> : vector<2x128xf32>
    %385 = tpu.matmul %380, %229, %cst_99 {dimension_numbers = #tpu.dot_dimension_numbers<[1], [0], [0], [1], [0, 0, 1, 1], [], []>} : vector<2x32xf32>, vector<32x128xf32>, vector<2x128xf32> -> vector<2x128xf32>
    %386 = vector.broadcast %233 : vector<1x128xf32> to vector<2x128xf32>
    %387 = arith.addf %385, %386 : vector<2x128xf32>
    %388 = vector.extract_strided_slice %384 {offsets = [0, 0], sizes = [2, 32], strides = [1, 1]} : vector<2x128xf32> to vector<2x32xf32>
    %389 = vector.extract_strided_slice %387 {offsets = [0, 0], sizes = [2, 32], strides = [1, 1]} : vector<2x128xf32> to vector<2x32xf32>
    %390 = arith.addf %388, %389 : vector<2x32xf32>
    %391 = arith.negf %390 : vector<2x32xf32>
    %392 = math.exp %391 : vector<2x32xf32>
    %cst_100 = arith.constant 1.000000e+00 : f32
    %393 = vector.broadcast %cst_100 : f32 to vector<2x32xf32>
    %394 = arith.addf %393, %392 : vector<2x32xf32>
    %395 = arith.divf %393, %394 : vector<2x32xf32>
    %396 = vector.extract_strided_slice %384 {offsets = [0, 32], sizes = [2, 32], strides = [1, 1]} : vector<2x128xf32> to vector<2x32xf32>
    %397 = vector.extract_strided_slice %387 {offsets = [0, 32], sizes = [2, 32], strides = [1, 1]} : vector<2x128xf32> to vector<2x32xf32>
    %398 = arith.addf %396, %397 : vector<2x32xf32>
    %399 = arith.negf %398 : vector<2x32xf32>
    %400 = math.exp %399 : vector<2x32xf32>
    %cst_101 = arith.constant 1.000000e+00 : f32
    %401 = vector.broadcast %cst_101 : f32 to vector<2x32xf32>
    %402 = arith.addf %401, %400 : vector<2x32xf32>
    %403 = arith.divf %401, %402 : vector<2x32xf32>
    %404 = vector.extract_strided_slice %384 {offsets = [0, 64], sizes = [2, 32], strides = [1, 1]} : vector<2x128xf32> to vector<2x32xf32>
    %405 = vector.extract_strided_slice %387 {offsets = [0, 64], sizes = [2, 32], strides = [1, 1]} : vector<2x128xf32> to vector<2x32xf32>
    %406 = arith.mulf %395, %405 : vector<2x32xf32>
    %407 = arith.addf %404, %406 : vector<2x32xf32>
    %408 = math.tanh %407 : vector<2x32xf32>
    %cst_102 = arith.constant 1.000000e+00 : f32
    %409 = vector.broadcast %cst_102 : f32 to vector<2x32xf32>
    %410 = arith.subf %409, %403 : vector<2x32xf32>
    %411 = arith.mulf %410, %408 : vector<2x32xf32>
    %412 = arith.mulf %403, %380 : vector<2x32xf32>
    %413 = arith.addf %411, %412 : vector<2x32xf32>
    %cst_103 = arith.constant dense<0.000000e+00> : vector<2x128xf32>
    %414 = tpu.matmul %413, %230, %cst_103 {dimension_numbers = #tpu.dot_dimension_numbers<[1], [0], [0], [1], [0, 0, 1, 1], [], []>} : vector<2x32xf32>, vector<32x128xf32>, vector<2x128xf32> -> vector<2x128xf32>
    %415 = vector.broadcast %234 : vector<1x128xf32> to vector<2x128xf32>
    %416 = arith.addf %414, %415 : vector<2x128xf32>
    %cst_104 = arith.constant dense<0.000000e+00> : vector<2x128xf32>
    %417 = tpu.matmul %383, %231, %cst_104 {dimension_numbers = #tpu.dot_dimension_numbers<[1], [0], [0], [1], [0, 0, 1, 1], [], []>} : vector<2x32xf32>, vector<32x128xf32>, vector<2x128xf32> -> vector<2x128xf32>
    %418 = vector.broadcast %235 : vector<1x128xf32> to vector<2x128xf32>
    %419 = arith.addf %417, %418 : vector<2x128xf32>
    %420 = vector.extract_strided_slice %416 {offsets = [0, 0], sizes = [2, 32], strides = [1, 1]} : vector<2x128xf32> to vector<2x32xf32>
    %421 = vector.extract_strided_slice %419 {offsets = [0, 0], sizes = [2, 32], strides = [1, 1]} : vector<2x128xf32> to vector<2x32xf32>
    %422 = arith.addf %420, %421 : vector<2x32xf32>
    %423 = arith.negf %422 : vector<2x32xf32>
    %424 = math.exp %423 : vector<2x32xf32>
    %cst_105 = arith.constant 1.000000e+00 : f32
    %425 = vector.broadcast %cst_105 : f32 to vector<2x32xf32>
    %426 = arith.addf %425, %424 : vector<2x32xf32>
    %427 = arith.divf %425, %426 : vector<2x32xf32>
    %428 = vector.extract_strided_slice %416 {offsets = [0, 32], sizes = [2, 32], strides = [1, 1]} : vector<2x128xf32> to vector<2x32xf32>
    %429 = vector.extract_strided_slice %419 {offsets = [0, 32], sizes = [2, 32], strides = [1, 1]} : vector<2x128xf32> to vector<2x32xf32>
    %430 = arith.addf %428, %429 : vector<2x32xf32>
    %431 = arith.negf %430 : vector<2x32xf32>
    %432 = math.exp %431 : vector<2x32xf32>
    %cst_106 = arith.constant 1.000000e+00 : f32
    %433 = vector.broadcast %cst_106 : f32 to vector<2x32xf32>
    %434 = arith.addf %433, %432 : vector<2x32xf32>
    %435 = arith.divf %433, %434 : vector<2x32xf32>
    %436 = vector.extract_strided_slice %416 {offsets = [0, 64], sizes = [2, 32], strides = [1, 1]} : vector<2x128xf32> to vector<2x32xf32>
    %437 = vector.extract_strided_slice %419 {offsets = [0, 64], sizes = [2, 32], strides = [1, 1]} : vector<2x128xf32> to vector<2x32xf32>
    %438 = arith.mulf %427, %437 : vector<2x32xf32>
    %439 = arith.addf %436, %438 : vector<2x32xf32>
    %440 = math.tanh %439 : vector<2x32xf32>
    %cst_107 = arith.constant 1.000000e+00 : f32
    %441 = vector.broadcast %cst_107 : f32 to vector<2x32xf32>
    %442 = arith.subf %441, %435 : vector<2x32xf32>
    %443 = arith.mulf %442, %440 : vector<2x32xf32>
    %444 = arith.mulf %435, %383 : vector<2x32xf32>
    %445 = arith.addf %443, %444 : vector<2x32xf32>
    %446 = vector.extract_strided_slice %245 {offsets = [2, 0, 0], sizes = [1, 2, 32], strides = [1, 1, 1]} : vector<4x2x32xi1> to vector<1x2x32xi1>
    %447 = vector.shape_cast %446 : vector<1x2x32xi1> to vector<2x32xi1>
    %448 = arith.select %447, %413, %380 : vector<2x32xi1>, vector<2x32xf32>
    %449 = vector.extract_strided_slice %245 {offsets = [2, 0, 0], sizes = [1, 2, 32], strides = [1, 1, 1]} : vector<4x2x32xi1> to vector<1x2x32xi1>
    %450 = vector.shape_cast %449 : vector<1x2x32xi1> to vector<2x32xi1>
    %451 = arith.select %450, %445, %383 : vector<2x32xi1>, vector<2x32xf32>
    %452 = vector.extract_strided_slice %238 {offsets = [6, 0], sizes = [2, 128], strides = [1, 1]} : vector<8x128xf32> to vector<2x128xf32>
    %cst_108 = arith.constant dense<0.000000e+00> : vector<2x128xf32>
    %453 = tpu.matmul %448, %229, %cst_108 {dimension_numbers = #tpu.dot_dimension_numbers<[1], [0], [0], [1], [0, 0, 1, 1], [], []>} : vector<2x32xf32>, vector<32x128xf32>, vector<2x128xf32> -> vector<2x128xf32>
    %454 = vector.broadcast %233 : vector<1x128xf32> to vector<2x128xf32>
    %455 = arith.addf %453, %454 : vector<2x128xf32>
    %456 = vector.extract_strided_slice %452 {offsets = [0, 0], sizes = [2, 32], strides = [1, 1]} : vector<2x128xf32> to vector<2x32xf32>
    %457 = vector.extract_strided_slice %455 {offsets = [0, 0], sizes = [2, 32], strides = [1, 1]} : vector<2x128xf32> to vector<2x32xf32>
    %458 = arith.addf %456, %457 : vector<2x32xf32>
    %459 = arith.negf %458 : vector<2x32xf32>
    %460 = math.exp %459 : vector<2x32xf32>
    %cst_109 = arith.constant 1.000000e+00 : f32
    %461 = vector.broadcast %cst_109 : f32 to vector<2x32xf32>
    %462 = arith.addf %461, %460 : vector<2x32xf32>
    %463 = arith.divf %461, %462 : vector<2x32xf32>
    %464 = vector.extract_strided_slice %452 {offsets = [0, 32], sizes = [2, 32], strides = [1, 1]} : vector<2x128xf32> to vector<2x32xf32>
    %465 = vector.extract_strided_slice %455 {offsets = [0, 32], sizes = [2, 32], strides = [1, 1]} : vector<2x128xf32> to vector<2x32xf32>
    %466 = arith.addf %464, %465 : vector<2x32xf32>
    %467 = arith.negf %466 : vector<2x32xf32>
    %468 = math.exp %467 : vector<2x32xf32>
    %cst_110 = arith.constant 1.000000e+00 : f32
    %469 = vector.broadcast %cst_110 : f32 to vector<2x32xf32>
    %470 = arith.addf %469, %468 : vector<2x32xf32>
    %471 = arith.divf %469, %470 : vector<2x32xf32>
    %472 = vector.extract_strided_slice %452 {offsets = [0, 64], sizes = [2, 32], strides = [1, 1]} : vector<2x128xf32> to vector<2x32xf32>
    %473 = vector.extract_strided_slice %455 {offsets = [0, 64], sizes = [2, 32], strides = [1, 1]} : vector<2x128xf32> to vector<2x32xf32>
    %474 = arith.mulf %463, %473 : vector<2x32xf32>
    %475 = arith.addf %472, %474 : vector<2x32xf32>
    %476 = math.tanh %475 : vector<2x32xf32>
    %cst_111 = arith.constant 1.000000e+00 : f32
    %477 = vector.broadcast %cst_111 : f32 to vector<2x32xf32>
    %478 = arith.subf %477, %471 : vector<2x32xf32>
    %479 = arith.mulf %478, %476 : vector<2x32xf32>
    %480 = arith.mulf %471, %448 : vector<2x32xf32>
    %481 = arith.addf %479, %480 : vector<2x32xf32>
    %cst_112 = arith.constant dense<0.000000e+00> : vector<2x128xf32>
    %482 = tpu.matmul %481, %230, %cst_112 {dimension_numbers = #tpu.dot_dimension_numbers<[1], [0], [0], [1], [0, 0, 1, 1], [], []>} : vector<2x32xf32>, vector<32x128xf32>, vector<2x128xf32> -> vector<2x128xf32>
    %483 = vector.broadcast %234 : vector<1x128xf32> to vector<2x128xf32>
    %484 = arith.addf %482, %483 : vector<2x128xf32>
    %cst_113 = arith.constant dense<0.000000e+00> : vector<2x128xf32>
    %485 = tpu.matmul %451, %231, %cst_113 {dimension_numbers = #tpu.dot_dimension_numbers<[1], [0], [0], [1], [0, 0, 1, 1], [], []>} : vector<2x32xf32>, vector<32x128xf32>, vector<2x128xf32> -> vector<2x128xf32>
    %486 = vector.broadcast %235 : vector<1x128xf32> to vector<2x128xf32>
    %487 = arith.addf %485, %486 : vector<2x128xf32>
    %488 = vector.extract_strided_slice %484 {offsets = [0, 0], sizes = [2, 32], strides = [1, 1]} : vector<2x128xf32> to vector<2x32xf32>
    %489 = vector.extract_strided_slice %487 {offsets = [0, 0], sizes = [2, 32], strides = [1, 1]} : vector<2x128xf32> to vector<2x32xf32>
    %490 = arith.addf %488, %489 : vector<2x32xf32>
    %491 = arith.negf %490 : vector<2x32xf32>
    %492 = math.exp %491 : vector<2x32xf32>
    %cst_114 = arith.constant 1.000000e+00 : f32
    %493 = vector.broadcast %cst_114 : f32 to vector<2x32xf32>
    %494 = arith.addf %493, %492 : vector<2x32xf32>
    %495 = arith.divf %493, %494 : vector<2x32xf32>
    %496 = vector.extract_strided_slice %484 {offsets = [0, 32], sizes = [2, 32], strides = [1, 1]} : vector<2x128xf32> to vector<2x32xf32>
    %497 = vector.extract_strided_slice %487 {offsets = [0, 32], sizes = [2, 32], strides = [1, 1]} : vector<2x128xf32> to vector<2x32xf32>
    %498 = arith.addf %496, %497 : vector<2x32xf32>
    %499 = arith.negf %498 : vector<2x32xf32>
    %500 = math.exp %499 : vector<2x32xf32>
    %cst_115 = arith.constant 1.000000e+00 : f32
    %501 = vector.broadcast %cst_115 : f32 to vector<2x32xf32>
    %502 = arith.addf %501, %500 : vector<2x32xf32>
    %503 = arith.divf %501, %502 : vector<2x32xf32>
    %504 = vector.extract_strided_slice %484 {offsets = [0, 64], sizes = [2, 32], strides = [1, 1]} : vector<2x128xf32> to vector<2x32xf32>
    %505 = vector.extract_strided_slice %487 {offsets = [0, 64], sizes = [2, 32], strides = [1, 1]} : vector<2x128xf32> to vector<2x32xf32>
    %506 = arith.mulf %495, %505 : vector<2x32xf32>
    %507 = arith.addf %504, %506 : vector<2x32xf32>
    %508 = math.tanh %507 : vector<2x32xf32>
    %cst_116 = arith.constant 1.000000e+00 : f32
    %509 = vector.broadcast %cst_116 : f32 to vector<2x32xf32>
    %510 = arith.subf %509, %503 : vector<2x32xf32>
    %511 = arith.mulf %510, %508 : vector<2x32xf32>
    %512 = arith.mulf %503, %451 : vector<2x32xf32>
    %513 = arith.addf %511, %512 : vector<2x32xf32>
    %514 = vector.extract_strided_slice %245 {offsets = [3, 0, 0], sizes = [1, 2, 32], strides = [1, 1, 1]} : vector<4x2x32xi1> to vector<1x2x32xi1>
    %515 = vector.shape_cast %514 : vector<1x2x32xi1> to vector<2x32xi1>
    %516 = arith.select %515, %513, %451 : vector<2x32xi1>, vector<2x32xf32>
    %c552 = arith.constant 552 : index
    %c0_117 = arith.constant 0 : index
    %517 = vector.load %arg2[%c552, %c0_117] : memref<592x128xf32, #tpu.memory_space<vmem>>, vector<32x128xf32>
    %c584 = arith.constant 584 : index
    %c0_118 = arith.constant 0 : index
    %518 = vector.load %arg2[%c584, %c0_118] : memref<592x128xf32, #tpu.memory_space<vmem>>, vector<1x128xf32>
    %519 = arith.addf %114, %516 : vector<2x32xf32>
    %cst_119 = arith.constant dense<0.000000e+00> : vector<2x128xf32>
    %520 = tpu.matmul %519, %517, %cst_119 {dimension_numbers = #tpu.dot_dimension_numbers<[1], [0], [0], [1], [0, 0, 1, 1], [], []>} : vector<2x32xf32>, vector<32x128xf32>, vector<2x128xf32> -> vector<2x128xf32>
    %521 = vector.broadcast %518 : vector<1x128xf32> to vector<2x128xf32>
    %522 = arith.addf %520, %521 : vector<2x128xf32>
    %c0_120 = arith.constant 0 : index
    %c0_121 = arith.constant 0 : index
    %523 = vector.load %arg3[%c0_120, %c0_121] : memref<2x128xf32, #tpu.memory_space<vmem>>, vector<2x128xf32>
    tpu.vector_store %arg3[%c0_120, %c0_121], %522 {strides = array<i32>} : memref<2x128xf32, #tpu.memory_space<vmem>>, vector<2x128xf32>,
    return
  }
}

</mosaic_0001>

<bundles_post_ra>
// kernel: tpu_custom_call.1
= control target key start
LH: loop header
LB: loop body
LE: loop exit
PB: predicated region body
PF: predicated region fallthrough
CT: control target
= control target key end

     0   :  { %8 = vsyncpa [#allocation3], 0  ;;  %s5998_s0 = inlined_call_operand.vmem [shape: s32[10,8], index: 0, kind: input, shape index: {}]   ;;  %s5999_s1 = inlined_call_operand.vmem [shape: s32[2,1], index: 1, kind: input, shape index: {}]   ;;  %s6000_s2 = inlined_call_operand.hbm [shape: f32[592,128], index: 2, kind: input, shape index: {}]   ;;  %s6001_s3 = inlined_call_operand.hbm [shape: f32[2,128], index: 3, kind: output, shape index: {}]  }
   0x1   :  { %9 = vsyncpa [#allocation4], 0  ;;  %s5245_s12 = smov [#allocation2]  }
   0x2   :  { %s19_s13 = sshll.u32 %s5245_s12, 4  ;;  %s20_s13 = int_to_ptr.vmem [resolvable:$true] %s19_s13 }
   0x3   :  { %s5209_s14 = scalar_lea.vmem %s20_s13, 9472  ;;  %p5214_p1 = scmp.lt.s32.totalorder %s20_s13, %s20_s13 }
   0x4   :  { %p5210_p0 = scmp.ne.s32.totalorder %s20_s13, %s5209_s14  ;;  %p5215_p2 = scmp.lt.s32.totalorder %s5209_s14, %s5209_s14 }
   0x6   :  { %p5216_p3 = por %p5215_p2, %p5214_p1 }
   0x8   :  { %p5217_p4 = pnand %p5216_p3, %p5210_p0 }
   0xa   :  { %5220 = shalt.err (!%p5217_p4)
}
   0xb   :  { %s5246_s15 = smov 128   ;;  %s5247_s16 = smov 8  }
   0xc   :  { %25 = dma.hbm_to_vmem [thread:$0]  %s6000_s2, 9472, %s20_s13, [#allocation3], %s5246_s15, %s5246_s15, %s5247_s16  }
   0xd   :  { %5241 = dma.done.wait [#allocation3], 9472  }
   0xe   :  { %5242 = vsyncadd [#allocation3], 4294957824  ;;  %v62_v0 = vlaneseq  ;;  %v29_v4 = vld [vmem:[%s5998_s0] sm:$0x3]  ;;  %v38_v5 = vld [vmem:[#allocation2 + $0x38] sm:$0xff]  ;;  %v5248_v16 = vmov 0.0  }
   0xf   :  { %v37_v6 = vld [vmem:[#allocation2 + $0x30] sm:$0xff]  ;;  %4697 = vmatprep.subr.mxu0 %v38_v5  ;;  %v36_v8 = vld [vmem:[#allocation2 + $0x28] sm:$0xff]  ;;  %v43_v10 = vld [vmem:[#allocation2 + $0x60] sm:$0xff]  ;;  %vm84_vm0 = vcmask 523264   ;;  %vm166_vm3 = vcmask 261120   ;;  %vm5249_vm4 = vmmov 0  }
  0x10   :  { %v5278_v1 = vshrl.u32 %v62_v0, 7  ;;  %4698 = vmatpush3.msra.mxu0 %v38_v5  ;;  %v35_v11 = vld [vmem:[#allocation2 + $0x20] sm:$0xff]  ;;  %4716 = vmatprep.subr.mxu1 %v43_v10  ;;  %v34_v12 = vld [vmem:[#allocation2 + $0x18] sm:$0xff]  ;;  %v33_v13 = vld [vmem:[#allocation2 + $0x10] sm:$0xff]  ;;  %v5290_v17 = vand.u32 127, %v62_v0  ;;  %s5250_s2 = smov 96  }
  0x11   :  { %4699 = vmatprep.subr.mxu0 %v37_v6  ;;  %4717 = vmatpush3.msra.mxu1 %v43_v10  ;;  %v32_v14 = vld [vmem:[#allocation2 + $0x8] sm:$0xff]  ;;  %v31_v15 = vld [vmem:[#allocation2] sm:$0xff]  ;;  %v42_v22 = vld [vmem:[#allocation2 + $0x58] sm:$0xff]  ;;  %vm402_vm5 = vcmask 57344   ;;  %s5251_s21 = smov 64   ;;  %vm428_vm6 = vcmask 64512  }
  0x12   :  { %v64_v2 = vsub.s32 0, %v5278_v1  ;;  %v71_v3 = vsub.s32 1, %v5278_v1  ;;  %4700 = vmatpush3.msra.mxu0 %v37_v6  ;;  %4718 = vmatprep.subr.mxu1 %v42_v22  ;;  %v41_v23 = vld [vmem:[#allocation2 + $0x50] sm:$0xff]  ;;  %v40_v24 = vld [vmem:[#allocation2 + $0x48] sm:$0xff]  ;;  %v39_v26 = vld [vmem:[#allocation2 + $0x40] sm:$0xff]  ;;  %vm583_vm7 = vcmask 1041409  }
  0x13   :  { %4701 = vmatprep.subr.mxu0 %v36_v8  ;;  %4719 = vmatpush3.msra.mxu1 %v42_v22  ;;  %vm586_vm8 = vcmask 254976   ;;  %v30_v6 = vld [vmem:[%s5998_s0 + $0x2] sm:$0xff]  ;;  %s5254_s25 = smov [#allocation5]  }
  0x14   :  { %v65_v7 = vrot.slane %v29_v4, %v64_v2  ;;  %v72_v9 = vrot.slane %v29_v4, %v71_v3  ;;  %4702 = vmatpush3.msra.mxu0 %v36_v8  ;;  %4720 = vmatprep.subr.mxu1 %v41_v23  ;;  %v894_v8 = vsub.s32 2, %v5278_v1  ;;  %s4405_s26 = sshll.u32 %s5254_s25, 4  ;;  %s4406_s26 = int_to_ptr.vmem [resolvable:$true] %s4405_s26 }
  0x15   :  { %4703 = vmatprep.subr.mxu0 %v35_v11  ;;  %4721 = vmatpush3.msra.mxu1 %v41_v23  ;;  %s5221_s27 = scalar_lea.vmem %s4406_s26, 32  ;;  %p5226_p6 = scmp.lt.s32.totalorder %s4406_s26, %s4406_s26 }
  0x16   :  { %67 = vbcast.lane.b32.xlu0 %v65_v7, 256  ;;  %4704 = vmatpush3.msra.mxu0 %v35_v11  ;;  %v881_v7 = vrot.slane %v30_v6, %v64_v2  ;;  %v895_v10 = vrot.slane %v30_v6, %v894_v8  ;;  %p5222_p5 = scmp.ne.s32.totalorder %s4406_s26, %s5221_s27  ;;  %p5227_p7 = scmp.lt.s32.totalorder %s5221_s27, %s5221_s27 }
  0x17   :  { %4705 = vmatprep.subr.mxu0 %v34_v12  ;;  %4722 = vmatprep.subr.mxu1 %v40_v24 }
  0x18   :  { %4706 = vmatpush3.msra.mxu0 %v34_v12  ;;  %4723 = vmatpush3.msra.mxu1 %v40_v24  ;;  %v915_v12 = vsub.s32 5, %v5278_v1  ;;  %p5228_p8 = por %p5227_p7, %p5226_p6 }
  0x19   :  { %4707 = vmatprep.subr.mxu0 %v33_v13  ;;  %4727 = vmatprep.subr.mxu1 %v5248_v16 }
  0x1a   :  { %74 = vbcast.lane.b32.xlu0 %v72_v9, 256  ;;  %4708 = vmatpush3.msra.mxu0 %v33_v13  ;;  %v901_v9 = vsub.s32 3, %v5278_v1  ;;  %v916_v13 = vrot.slane %v30_v6, %v915_v12  ;;  %v55_v12 = vld [vmem:[#allocation2 + $0xc0] sm:$0xff]  ;;  %p5229_p9 = pnand %p5228_p8, %p5222_p5 }
  0x1b   :  { %4709 = vmatprep.subr.mxu0 %v32_v14 }
  0x1c   :  { %4710 = vmatpush3.msra.mxu0 %v32_v14  ;;  %v902_v11 = vrot.slane %v30_v6, %v901_v9  ;;  %v929_v14 = vsub.s32 7, %v5278_v1 }
  0x1d   :  { %4711 = vmatprep.subr.mxu0 %v31_v15 }
  0x1e   :  { %4712 = vmatpush3.msra.mxu0 %v31_v15  ;;  %v930_v15 = vrot.slane %v30_v6, %v929_v14  ;;  %v52_v14 = vld [vmem:[#allocation2 + $0xa8] sm:$0xff] }
  0x1f   :  { %4747 = vmatprep.subr.mxu0 %v5248_v16 }
  0x88   :  { %v68_v18 = vpop.permute.xlu0 %67 }
  0x89   :  { %vm78_vm1 = vcmp.eq.s32.totalorder %v68_v18, %v5290_v17 }
  0x8a   :  { %v4414_v19 = vsel %vm78_vm1, 1.0, %v5248_v16 }
  0x8b   :  { %4713 = vmatprep.mubr.msk.f32.mxu0 %vm84_vm0, %v4414_v19 }
  0x8c   :  { %v75_v20 = vpop.permute.xlu0 %74 }
  0x8d   :  { %vm79_vm2 = vcmp.eq.s32.totalorder %v75_v20, %v5290_v17 }
  0x8e   :  { %v4415_v21 = vsel %vm79_vm2, 1.0, %v5248_v16  ;;  %vm2547_vm2 = vcmask 1042434  }
  0x8f   :  { %4714 = vmatmul.mubr.msk.f32.vlgmr.msra.gmra.mxu0 %vm84_vm0, %v4415_v21 }
  0x90   :  { %4755 = vmatprep.mubr.msk.f32.mxu0 %vm5249_vm4, %v5248_v16 }
 0x14f   :  { %v4715_v25 = vpop.f32.mrf.mxu0 }
 0x150   :  { %v5301_v29 = vadd.f32 %v4715_v25, %v39_v26 }
 0x151   :  { %v157_v27 = vpop.f32.mrf.mxu0 }
 0x152   :  { %v5299_v28 = vadd.f32 %v157_v27, %v39_v26  ;;  %v888_v27 = vrot.slane %v30_v6, %v71_v3  ;;  %v854_v3 = vld [vmem:[#allocation2 + $0x108] sm:$0xff] }
 0x154   :  { %4724 = vmatprep.mubr.msk.f32.mxu1 %vm166_vm3, %v5299_v28 }
 0x155   :  { %4725 = vmatmul.mubr.msk.f32.vlgmr.msra.gmra.mxu1 %vm166_vm3, %v5301_v29 }
 0x156   :  { %4729 = vmatprep.mubr.msk.f32.mxu1 %vm5249_vm4, %v5248_v16 }
 0x215   :  { %v4726_v30 = vpop.f32.mrf.mxu1 }
 0x217   :  { %v239_v31 = vpop.f32.mrf.mxu1 }
 0x218   :  { %249 = vrot.lane.b32.xlu1 %v239_v31, %s5250_s2 }
 0x21c   :  { %326 = vrot.lane.b32.xlu1 %v4726_v30, %s5250_s2 }
 0x28a   :  { %v250_v32 = vpop.permute.xlu1 %249 }
 0x28b   :  { %4728 = vmatpush3.xpose.msk.msra.mxu1 %vm166_vm3, %v250_v32  ;;  %v47_v32 = vld [vmem:[#allocation2 + $0x80] sm:$0xff] }
 0x28c   :  { %4732 = vmatprep.subr.mxu1 %v5248_v16  ;;  %4748 = vmatpush3.msra.mxu0 %v47_v32 }
 0x28d   :  { %4749 = vmatprep.subr.mxu0 %v5248_v16 }
 0x28e   :  { %4730 = vmatmul.mubr.msk.f32.vlgmr.msra.gmra.mxu1 %vm166_vm3, %v239_v31  ;;  %v327_v33 = vpop.permute.xlu1 %326 }
 0x28f   :  { %4733 = vmatpush3.xpose.msk.msra.mxu1 %vm166_vm3, %v327_v33  ;;  %4734 = vmatprep.mubr.msk.f32.mxu1 %vm5249_vm4, %v5248_v16  ;;  %v46_v33 = vld [vmem:[#allocation2 + $0x78] sm:$0xff] }
 0x290   :  { %4737 = vmatprep.subr.mxu1 %v5248_v16  ;;  %4750 = vmatpush3.msra.mxu0 %v46_v33 }
 0x291   :  { %4751 = vmatprep.subr.mxu0 %v5248_v16 }
 0x292   :  { %4735 = vmatmul.mubr.msk.f32.vlgmr.msra.gmra.mxu1 %vm166_vm3, %v4726_v30 }
 0x293   :  { %4739 = vmatprep.mubr.msk.f32.mxu1 %vm5249_vm4, %v5248_v16 }
 0x34e   :  { %v321_v34 = vpop.f32.mrf.mxu1 }
 0x34f   :  { %v403_v35 = vsel %vm402_vm5, %v321_v34, -inf }
 0x350   :  { %404 = vmax.xlane.f32.xlu0 %v403_v35  ;;  %v4731_v36 = vpop.f32.mrf.mxu1  ;;  %v44_v35 = vld [vmem:[#allocation2 + $0x68] sm:$0xff] }
 0x352   :  { %v398_v37 = vpop.f32.mrf.mxu1 }
 0x353   :  { %v406_v38 = vsel %vm402_vm5, %v398_v37, -inf }
 0x354   :  { %407 = vmax.xlane.f32.xlu1 %v406_v38  ;;  %v4736_v39 = vpop.f32.mrf.mxu1 }
 0x365   :  { %425 = vrot.lane.b32.xlu1 %v239_v31, %s5251_s21 }
 0x3d9   :  { %v405_v40 = vpop.xlane.xlu0 %404 }
 0x3da   :  { %v409_v41 = vsub.f32 %v321_v34, %v405_v40  ;;  %v45_v34 = vld [vmem:[#allocation2 + $0x70] sm:$0xff] }
 0x3db   :  { %4752 = vmatpush3.msra.mxu0 %v45_v34 }
 0x3dc   :  { %v411_v42 = vmul.f32 1.442695, %v409_v41  ;;  %4753 = vmatprep.subr.mxu0 %v5248_v16  ;;  %v4426_v41 = vld [vmem:[#allocation2 + $0xca] ss:$0 sm:$0xff] }
 0x3dd   :  { %v408_v43 = vpop.xlane.xlu1 %407  ;;  %4754 = vmatpush3.msra.mxu0 %v44_v35  ;;  %v855_v35 = vld [vmem:[#allocation2 + $0x110] sm:$0xff] }
 0x3de   :  { %5101 = vpow2.f32 %v411_v42  ;;  %v410_v44 = vsub.f32 %v398_v37, %v408_v43  ;;  %4777 = vmatprep.subr.mxu0 %v854_v3 }
 0x3e0   :  { %v413_v45 = vmul.f32 1.442695, %v410_v44 }
 0x3e1   :  { %v426_v46 = vpop.permute.xlu1 %425 }
 0x3e2   :  { %5103 = vpow2.f32 %v413_v45  ;;  %4738 = vmatpush3.msra.mxu1 %v426_v46  ;;  %v4427_v45 = vld [vmem:[#allocation2 + $0xcb] ss:$0 sm:$0xff] }
 0x3e3   :  { %4742 = vmatprep.subr.mxu1 %v5248_v16 }
 0x3eb   :  { %v5102_v47 = vpop.eup %5101 }
 0x3ec   :  { %v415_v48 = vsel %vm402_vm5, %v5102_v47, 0.0 }
 0x3ed   :  { %416 = vadd.xlane.f32.xlu0 %v415_v48 }
 0x3ef   :  { %v5104_v49 = vpop.eup %5103 }
 0x3f0   :  { %v418_v50 = vsel %vm402_vm5, %v5104_v49, 0.0 }
 0x3f1   :  { %419 = vadd.xlane.f32.xlu0 %v418_v50 }
 0x407   :  { %502 = vrot.lane.b32.xlu0 %v4726_v30, %s5251_s21  ;;  %v922_v30 = vsub.s32 6, %v5278_v1 }
 0x409   :  { %v923_v31 = vrot.slane %v30_v6, %v922_v30 }
 0x476   :  { %v417_v51 = vpop.xlane.xlu0 %416 }
 0x477   :  { %5105 = vrcp.f32 %v417_v51 }
 0x47a   :  { %v420_v52 = vpop.xlane.xlu0 %419 }
 0x47b   :  { %5107 = vrcp.f32 %v420_v52  ;;  %v853_v52 = vld [vmem:[#allocation2 + $0x100] sm:$0xff] }
 0x47e   :  { %v503_v55 = vpop.permute.xlu0 %502 }
 0x484   :  { %v5106_v53 = vpop.eup %5105 }
 0x485   :  { %v423_v54 = vmul.f32 %v5106_v53, %v5102_v47  ;;  %v852_v53 = vld [vmem:[#allocation2 + $0xf8] sm:$0xff] }
 0x487   :  { %4740 = vmatmul.mubr.msk.f32.vlgmr.msra.gmra.mxu1 %vm428_vm6, %v423_v54  ;;  %v851_v54 = vld [vmem:[#allocation2 + $0xf0] sm:$0xff] }
 0x488   :  { %v5108_v56 = vpop.eup %5107  ;;  %4743 = vmatpush3.msra.mxu1 %v503_v55  ;;  %4744 = vmatprep.mubr.msk.f32.mxu1 %vm5249_vm4, %v5248_v16 }
 0x489   :  { %v424_v57 = vmul.f32 %v5108_v56, %v5104_v49  ;;  %4758 = vmatprep.subr.mxu1 %v5248_v16  ;;  %v850_v56 = vld [vmem:[#allocation2 + $0xe8] sm:$0xff] }
 0x48b   :  { %4745 = vmatmul.mubr.msk.f32.vlgmr.msra.gmra.mxu1 %vm428_vm6, %v424_v57 }
 0x48c   :  { %4774 = vmatprep.mubr.msk.f32.mxu1 %vm5249_vm4, %v5248_v16  ;;  %4759 = vmatpush3.msra.mxu1 %v55_v12 }
 0x48d   :  { %4760 = vmatprep.subr.mxu1 %v5248_v16 }
 0x547   :  { %v498_v58 = vpop.f32.mrf.mxu1 }
 0x548   :  { %v578_v63 = vadd.f32 %v498_v58, %v5299_v28  ;;  %v908_v28 = vsub.s32 4, %v5278_v1  ;;  %v849_v58 = vld [vmem:[#allocation2 + $0xe0] sm:$0xff] }
 0x549   :  { %v4741_v59 = vpop.f32.mrf.mxu1 }
 0x54a   :  { %v848_v59 = vld [vmem:[#allocation2 + $0xd8] sm:$0xff] }
 0x54b   :  { %v574_v60 = vpop.f32.mrf.mxu1 }
 0x54c   :  { %v579_v61 = vadd.f32 %v574_v60, %v5301_v29  ;;  %v909_v29 = vrot.slane %v30_v6, %v908_v28 }
 0x54d   :  { %v4746_v62 = vpop.f32.mrf.mxu1 }
 0x54e   :  { %v582_v0 = vrot.slane %v579_v61, 7  ;;  %v847_v62 = vld [vmem:[#allocation2 + $0xd0] sm:$0xff] }
 0x550   :  { %v584_v4 = vsel %vm583_vm7, %v582_v0, %v578_v63 }
 0x551   :  { %v587_v5 = vsel %vm586_vm8, %v584_v4, 0.0 }
 0x552   :  { %588 = vadd.xlane.f32.xlu1 %v587_v5 }
 0x563   :  { %883 = vbcast.lane.b32.xlu1 %v881_v7, 256 }
 0x567   :  { %897 = vbcast.lane.b32.xlu1 %v895_v10, 256 }
 0x56b   :  { %904 = vbcast.lane.b32.xlu1 %v902_v11, 256 }
 0x56f   :  { %918 = vbcast.lane.b32.xlu1 %v916_v13, 256  ;;  %v54_v13 = vld [vmem:[#allocation2 + $0xb8] sm:$0xff] }
 0x570   :  { %4761 = vmatpush3.msra.mxu1 %v54_v13 }
 0x571   :  { %4762 = vmatprep.subr.mxu1 %v5248_v16 }
 0x573   :  { %932 = vbcast.lane.b32.xlu1 %v930_v15, 256  ;;  %v51_v15 = vld [vmem:[#allocation2 + $0xa0] sm:$0xff] }
 0x5db   :  { %v589_v18 = vpop.xlane.xlu1 %588 }
 0x5dc   :  { %v591_v19 = vmul.f32 0.03125, %v589_v18  ;;  %v50_v18 = vld [vmem:[#allocation2 + $0x98] sm:$0xff] }
 0x5de   :  { %v593_v2 = vrot.slane %v591_v19, 1  ;;  %v596_v20 = vsub.f32 %v578_v63, %v591_v19  ;;  %v49_v19 = vld [vmem:[#allocation2 + $0x90] sm:$0xff] }
 0x5df   :  { %v884_v46 = vpop.permute.xlu1 %883 }
 0x5e0   :  { %v597_v21 = vsub.f32 %v579_v61, %v593_v2  ;;  %v598_v23 = vmul.f32 %v596_v20, %v596_v20  ;;  %vm934_vm9 = vcmp.eq.s32.totalorder %v884_v46, %v5290_v17  ;;  %v48_v2 = vld [vmem:[#allocation2 + $0x88] sm:$0xff] }
 0x5e1   :  { %v4434_v50 = vsel %vm934_vm9, 1.0, %v5248_v16  ;;  %vm2556_vm9 = vcmask 1045509  }
 0x5e2   :  { %v599_v22 = vmul.f32 %v597_v21, %v597_v21 }
 0x5e3   :  { %v898_v55 = vpop.permute.xlu1 %897 }
 0x5e4   :  { %v602_v24 = vrot.slane %v599_v22, 7  ;;  %vm936_vm11 = vcmp.eq.s32.totalorder %v898_v55, %v5290_v17 }
 0x5e5   :  { %v4436_v4 = vsel %vm936_vm11, 1.0, %v5248_v16  ;;  %vm2562_vm11 = vcmask 1047559  }
 0x5e6   :  { %v603_v25 = vsel %vm583_vm7, %v602_v24, %v598_v23 }
 0x5e7   :  { %v605_v26 = vsel %vm586_vm8, %v603_v25, 0.0  ;;  %v905_v60 = vpop.permute.xlu1 %904 }
 0x5e8   :  { %606 = vadd.xlane.f32.xlu0 %v605_v26  ;;  %vm937_vm12 = vcmp.eq.s32.totalorder %v905_v60, %v5290_v17 }
 0x5e9   :  { %v4437_v6 = vsel %vm937_vm12, 1.0, %v5248_v16 }
 0x5eb   :  { %v919_v0 = vpop.permute.xlu1 %918 }
 0x5ec   :  { %vm939_vm14 = vcmp.eq.s32.totalorder %v919_v0, %v5290_v17 }
 0x5ed   :  { %v4439_v9 = vsel %vm939_vm14, 1.0, %v5248_v16 }
 0x5ef   :  { %v933_v8 = vpop.permute.xlu1 %932 }
 0x5f0   :  { %vm941_vm1 = vcmp.eq.s32.totalorder %v933_v8, %v5290_v17 }
 0x5f1   :  { %v4441_v11 = vsel %vm941_vm1, 1.0, %v5248_v16 }
 0x5fe   :  { %890 = vbcast.lane.b32.xlu0 %v888_v27, 256 }
 0x602   :  { %911 = vbcast.lane.b32.xlu0 %v909_v29, 256 }
 0x606   :  { %925 = vbcast.lane.b32.xlu0 %v923_v31, 256 }
 0x671   :  { %v607_v1 = vpop.xlane.xlu0 %606 }
 0x672   :  { %v608_v36 = vmul.f32 0.03125, %v607_v1 }
 0x674   :  { %v609_v37 = vadd.f32 1e-05, %v608_v36 }
 0x675   :  { %v891_v57 = vpop.permute.xlu0 %890 }
 0x676   :  { %5109 = vrsqrt.f32 %v609_v37  ;;  %vm935_vm10 = vcmp.eq.s32.totalorder %v891_v57, %v5290_v17 }
 0x677   :  { %v4435_v63 = vsel %vm935_vm10, 1.0, %v5248_v16  ;;  %vm2559_vm10 = vcmask 1046534  }
 0x679   :  { %v912_v61 = vpop.permute.xlu0 %911 }
 0x67a   :  { %vm938_vm13 = vcmp.eq.s32.totalorder %v912_v61, %v5290_v17 }
 0x67b   :  { %v4438_v7 = vsel %vm938_vm13, 1.0, %v5248_v16 }
 0x67d   :  { %v926_v5 = vpop.permute.xlu0 %925 }
 0x67e   :  { %vm940_vm15 = vcmp.eq.s32.totalorder %v926_v5, %v5290_v17  ;;  %v53_v17 = vld [vmem:[#allocation2 + $0xb0] sm:$0xff] }
 0x67f   :  { %v4440_v10 = vsel %vm940_vm15, 1.0, %v5248_v16  ;;  %4763 = vmatpush3.msra.mxu1 %v53_v17 }
 0x680   :  { %4764 = vmatprep.subr.mxu1 %v5248_v16 }
 0x681   :  { %4765 = vmatpush3.msra.mxu1 %v52_v14 }
 0x682   :  { %4766 = vmatprep.subr.mxu1 %v5248_v16 }
 0x683   :  { %v5110_v38 = vpop.eup %5109  ;;  %4767 = vmatpush3.msra.mxu1 %v51_v15 }
 0x684   :  { %v612_v39 = vrot.slane %v5110_v38, 1  ;;  %v615_v40 = vmul.f32 %v5110_v38, %v596_v20  ;;  %4768 = vmatprep.subr.mxu1 %v5248_v16  ;;  %v859_v20 = vld [vmem:[#allocation2 + $0x130] sm:$0xff] }
 0x685   :  { %4769 = vmatpush3.msra.mxu1 %v50_v18 }
 0x686   :  { %v616_v42 = vmul.f32 %v612_v39, %v597_v21  ;;  %v621_v43 = vmul.f32 %v4426_v41, %v615_v40  ;;  %4770 = vmatprep.subr.mxu1 %v5248_v16  ;;  %v4428_v21 = vld [vmem:[#allocation2 + $0xc8] ss:$0 sm:$0xff]  ;;  %v857_v40 = vld [vmem:[#allocation2 + $0x120] sm:$0xff] }
 0x687   :  { %4771 = vmatpush3.msra.mxu1 %v49_v19  ;;  %v858_v39 = vld [vmem:[#allocation2 + $0x128] sm:$0xff] }
 0x688   :  { %v622_v44 = vmul.f32 %v4426_v41, %v616_v42  ;;  %v5362_v48 = vadd.f32 %v4427_v45, %v621_v43  ;;  %4772 = vmatprep.subr.mxu1 %v5248_v16  ;;  %v856_v42 = vld [vmem:[#allocation2 + $0x118] sm:$0xff] }
 0x689   :  { %4773 = vmatpush3.msra.mxu1 %v48_v2 }
 0x68a   :  { %v5359_v47 = vadd.f32 %v4427_v45, %v622_v44  ;;  %4805 = vmatprep.subr.mxu1 %v859_v20 }
 0x68c   :  { %v635_v49 = vrot.slane %v5359_v47, 7 }
 0x68e   :  { %v636_v51 = vsel %vm583_vm7, %v635_v49, %v5362_v48 }
 0x68f   :  { %4756 = vmatmul.mubr.msk.f32.vlgmr.msra.gmra.mxu0 %vm166_vm3, %v636_v51 }
 0x690   :  { %4778 = vmatpush3.msra.mxu0 %v854_v3  ;;  %4793 = vmatprep.mubr.msk.f32.mxu0 %vm84_vm0, %v4434_v50 }
 0x691   :  { %4779 = vmatprep.subr.mxu0 %v853_v52 }
 0x692   :  { %4780 = vmatpush3.msra.mxu0 %v853_v52 }
 0x693   :  { %4781 = vmatprep.subr.mxu0 %v852_v53 }
 0x694   :  { %4782 = vmatpush3.msra.mxu0 %v852_v53 }
 0x695   :  { %4783 = vmatprep.subr.mxu0 %v851_v54 }
 0x696   :  { %4784 = vmatpush3.msra.mxu0 %v851_v54 }
 0x697   :  { %4785 = vmatprep.subr.mxu0 %v850_v56 }
 0x698   :  { %4786 = vmatpush3.msra.mxu0 %v850_v56 }
 0x699   :  { %4787 = vmatprep.subr.mxu0 %v849_v58 }
 0x69a   :  { %4788 = vmatpush3.msra.mxu0 %v849_v58 }
 0x69b   :  { %4789 = vmatprep.subr.mxu0 %v848_v59 }
 0x69c   :  { %4790 = vmatpush3.msra.mxu0 %v848_v59 }
 0x69d   :  { %4791 = vmatprep.subr.mxu0 %v847_v62 }
 0x69e   :  { %4792 = vmatpush3.msra.mxu0 %v847_v62 }
 0x69f   :  { %4794 = vmatmul.mubr.msk.f32.vlgmr.msra.gmra.mxu0 %vm84_vm0, %v4435_v63  ;;  %4825 = vmatprep.subr.mxu0 %v5248_v16 }
 0x6a0   :  { %4796 = vmatprep.mubr.msk.f32.mxu0 %vm84_vm0, %v4436_v4 }
 0x6a3   :  { %4797 = vmatmul.mubr.msk.f32.gmra.mxu0 %vm84_vm0, %v4437_v6 }
 0x6a4   :  { %4799 = vmatprep.mubr.msk.f32.mxu0 %vm84_vm0, %v4438_v7 }
 0x6a7   :  { %4800 = vmatmul.mubr.msk.f32.gmra.mxu0 %vm84_vm0, %v4439_v9 }
 0x6a8   :  { %4802 = vmatprep.mubr.msk.f32.mxu0 %vm84_vm0, %v4440_v10 }
 0x6ab   :  { %4803 = vmatmul.mubr.msk.f32.gmra.mxu0 %vm84_vm0, %v4441_v11 }
 0x6ac   :  { %4827 = vmatprep.mubr.msk.f32.mxu0 %vm5249_vm4, %v5248_v16 }
 0x74f   :  { %v705_v22 = vpop.f32.mrf.mxu0 }
 0x750   :  { %v706_v23 = vadd.f32 %v4428_v21, %v705_v22 }
 0x751   :  { %v4757_v24 = vpop.f32.mrf.mxu0 }
 0x752   :  { %v709_v25 = vmul.f32 %v706_v23, %v706_v23 }
 0x754   :  { %v710_v26 = vmul.f32 %v709_v25, %v706_v23 }
 0x756   :  { %v711_v27 = vmul.f32 0.044715, %v710_v26 }
 0x758   :  { %v712_v28 = vadd.f32 %v711_v27, %v706_v23 }
 0x75a   :  { %v713_v29 = vmul.f32 0.7978846, %v712_v28 }
 0x75c   :  { %5111 = vtanh.f32 %v713_v29 }
 0x75f   :  { %v4795_v30 = vpop.f32.mrf.mxu0 }
 0x760   :  { %v5408_v44 = vadd.f32 %v4795_v30, %v855_v35 }
 0x761   :  { %v1048_v31 = vpop.f32.mrf.mxu0 }
 0x762   :  { %v5401_v36 = vadd.f32 %v1048_v31, %v855_v35 }
 0x763   :  { %v4798_v32 = vpop.f32.mrf.mxu0 }
 0x764   :  { %v5417_v49 = vadd.f32 %v4798_v32, %v855_v35 }
 0x765   :  { %v1058_v1 = vpop.f32.mrf.mxu0 }
 0x766   :  { %v5406_v43 = vadd.f32 %v1058_v1, %v855_v35 }
 0x767   :  { %v4801_v38 = vpop.f32.mrf.mxu0 }
 0x768   :  { %v5419_v51 = vadd.f32 %v4801_v38, %v855_v35 }
 0x769   :  { %v5112_v33 = vpop.eup %5111  ;;  %v1068_v41 = vpop.f32.mrf.mxu0 }
 0x76a   :  { %v715_v34 = vadd.f32 1.0, %v5112_v33  ;;  %v5415_v46 = vadd.f32 %v1068_v41, %v855_v35 }
 0x76b   :  { %v4804_v45 = vpop.f32.mrf.mxu0 }
 0x76c   :  { %v716_v3 = vmul.f32 0.5, %v715_v34  ;;  %v5427_v53 = vadd.f32 %v4804_v45, %v855_v35 }
 0x76d   :  { %v1078_v50 = vpop.f32.mrf.mxu0 }
 0x76e   :  { %v717_v37 = vmul.f32 %v716_v3, %v706_v23  ;;  %v5425_v52 = vadd.f32 %v1078_v50, %v855_v35 }
 0x770   :  { %4775 = vmatmul.mubr.msk.f32.vlgmr.msra.gmra.mxu1 %vm84_vm0, %v717_v37 }
 0x771   :  { %4806 = vmatpush3.msra.mxu1 %v859_v20  ;;  %4813 = vmatprep.mubr.msk.f32.mxu1 %vm166_vm3, %v5401_v36 }
 0x772   :  { %4807 = vmatprep.subr.mxu1 %v858_v39 }
 0x773   :  { %4808 = vmatpush3.msra.mxu1 %v858_v39 }
 0x774   :  { %4809 = vmatprep.subr.mxu1 %v857_v40 }
 0x775   :  { %4810 = vmatpush3.msra.mxu1 %v857_v40 }
 0x776   :  { %4811 = vmatprep.subr.mxu1 %v856_v42 }
 0x777   :  { %4812 = vmatpush3.msra.mxu1 %v856_v42 }
 0x778   :  { %4814 = vmatmul.mubr.msk.f32.vlgmr.msra.gmra.mxu1 %vm166_vm3, %v5408_v44  ;;  %4830 = vmatprep.subr.mxu1 %v5248_v16 }
 0x779   :  { %4816 = vmatprep.mubr.msk.f32.mxu1 %vm166_vm3, %v5406_v43 }
 0x77c   :  { %4817 = vmatmul.mubr.msk.f32.gmra.mxu1 %vm166_vm3, %v5417_v49 }
 0x77d   :  { %4819 = vmatprep.mubr.msk.f32.mxu1 %vm166_vm3, %v5415_v46 }
 0x780   :  { %4820 = vmatmul.mubr.msk.f32.gmra.mxu1 %vm166_vm3, %v5419_v51 }
 0x781   :  { %4822 = vmatprep.mubr.msk.f32.mxu1 %vm166_vm3, %v5425_v52 }
 0x784   :  { %4823 = vmatmul.mubr.msk.f32.gmra.mxu1 %vm166_vm3, %v5427_v53 }
 0x785   :  { %4832 = vmatprep.mubr.msk.f32.mxu1 %vm5249_vm4, %v5248_v16 }
 0x830   :  { %v5437_v54 = vpop.f32.mrf.mxu1 }
 0x832   :  { %v4776_v55 = vpop.f32.mrf.mxu1 }
 0x838   :  { %v5439_v56 = vpop.f32.mrf.mxu1 }
 0x839   :  { %1294 = vrot.lane.b32.xlu1 %v5439_v56, %s5250_s2 }
 0x83a   :  { %v5443_v57 = vpop.f32.mrf.mxu1 }
 0x83b   :  { %1217 = vrot.lane.b32.xlu0 %v5443_v57, %s5250_s2 }
 0x83c   :  { %v5447_v58 = vpop.f32.mrf.mxu1 }
 0x83d   :  { %1448 = vrot.lane.b32.xlu1 %v5447_v58, %s5250_s2 }
 0x83e   :  { %v5451_v59 = vpop.f32.mrf.mxu1 }
 0x83f   :  { %1371 = vrot.lane.b32.xlu0 %v5451_v59, %s5250_s2 }
 0x840   :  { %v5455_v60 = vpop.f32.mrf.mxu1 }
 0x841   :  { %1602 = vrot.lane.b32.xlu1 %v5455_v60, %s5250_s2 }
 0x842   :  { %v5459_v61 = vpop.f32.mrf.mxu1 }
 0x843   :  { %1525 = vrot.lane.b32.xlu0 %v5459_v61, %s5250_s2 }
 0x844   :  { %v5463_v62 = vpop.f32.mrf.mxu1 }
 0x845   :  { %1756 = vrot.lane.b32.xlu1 %v5463_v62, %s5250_s2 }
 0x846   :  { %v5467_v63 = vpop.f32.mrf.mxu1 }
 0x847   :  { %1679 = vrot.lane.b32.xlu0 %v5467_v63, %s5250_s2 }
 0x8ab   :  { %v1295_v0 = vpop.permute.xlu1 %1294 }
 0x8ac   :  { %4831 = vmatpush3.xpose.msk.msra.mxu1 %vm166_vm3, %v1295_v0 }
 0x8ad   :  { %v1218_v4 = vpop.permute.xlu0 %1217  ;;  %4840 = vmatprep.subr.mxu1 %v5248_v16 }
 0x8ae   :  { %4826 = vmatpush3.xpose.msk.msra.mxu0 %vm166_vm3, %v1218_v4 }
 0x8af   :  { %4833 = vmatmul.mubr.msk.f32.vlgmr.msra.gmra.mxu1 %vm166_vm3, %v5439_v56  ;;  %v1449_v5 = vpop.permute.xlu1 %1448  ;;  %4835 = vmatprep.subr.mxu0 %v5248_v16 }
 0x8b0   :  { %4841 = vmatpush3.xpose.msk.msra.mxu1 %vm166_vm3, %v1449_v5  ;;  %4842 = vmatprep.mubr.msk.f32.mxu1 %vm5249_vm4, %v5248_v16 }
 0x8b1   :  { %4828 = vmatmul.mubr.msk.f32.vlgmr.msra.gmra.mxu0 %vm166_vm3, %v5443_v57  ;;  %v1372_v6 = vpop.permute.xlu0 %1371  ;;  %4850 = vmatprep.subr.mxu1 %v5248_v16 }
 0x8b2   :  { %4836 = vmatpush3.xpose.msk.msra.mxu0 %vm166_vm3, %v1372_v6  ;;  %4837 = vmatprep.mubr.msk.f32.mxu0 %vm5249_vm4, %v5248_v16 }
 0x8b3   :  { %4843 = vmatmul.mubr.msk.f32.vlgmr.msra.gmra.mxu1 %vm166_vm3, %v5447_v58  ;;  %v1603_v7 = vpop.permute.xlu1 %1602  ;;  %4845 = vmatprep.subr.mxu0 %v5248_v16 }
 0x8b4   :  { %4851 = vmatpush3.xpose.msk.msra.mxu1 %vm166_vm3, %v1603_v7  ;;  %4852 = vmatprep.mubr.msk.f32.mxu1 %vm5249_vm4, %v5248_v16 }
 0x8b5   :  { %4838 = vmatmul.mubr.msk.f32.vlgmr.msra.gmra.mxu0 %vm166_vm3, %v5451_v59  ;;  %v1526_v8 = vpop.permute.xlu0 %1525  ;;  %4860 = vmatprep.subr.mxu1 %v5248_v16 }
 0x8b6   :  { %4846 = vmatpush3.xpose.msk.msra.mxu0 %vm166_vm3, %v1526_v8  ;;  %4847 = vmatprep.mubr.msk.f32.mxu0 %vm5249_vm4, %v5248_v16 }
 0x8b7   :  { %4853 = vmatmul.mubr.msk.f32.vlgmr.msra.gmra.mxu1 %vm166_vm3, %v5455_v60  ;;  %v1757_v9 = vpop.permute.xlu1 %1756  ;;  %4855 = vmatprep.subr.mxu0 %v5248_v16 }
 0x8b8   :  { %4861 = vmatpush3.xpose.msk.msra.mxu1 %vm166_vm3, %v1757_v9  ;;  %4862 = vmatprep.mubr.msk.f32.mxu1 %vm5249_vm4, %v5248_v16 }
 0x8b9   :  { %4848 = vmatmul.mubr.msk.f32.vlgmr.msra.gmra.mxu0 %vm166_vm3, %v5459_v61  ;;  %v1680_v10 = vpop.permute.xlu0 %1679  ;;  %4870 = vmatprep.subr.mxu1 %v5248_v16 }
 0x8ba   :  { %4856 = vmatpush3.xpose.msk.msra.mxu0 %vm166_vm3, %v1680_v10  ;;  %4857 = vmatprep.mubr.msk.f32.mxu0 %vm5249_vm4, %v5248_v16 }
 0x8bb   :  { %4863 = vmatmul.mubr.msk.f32.vlgmr.msra.gmra.mxu1 %vm166_vm3, %v5463_v62  ;;  %4865 = vmatprep.subr.mxu0 %v5248_v16 }
 0x8bc   :  { %4872 = vmatprep.mubr.msk.f32.mxu1 %vm5249_vm4, %v5248_v16 }
 0x8bd   :  { %4858 = vmatmul.mubr.msk.f32.vlgmr.msra.gmra.mxu0 %vm166_vm3, %v5467_v63 }
 0x8be   :  { %4867 = vmatprep.mubr.msk.f32.mxu0 %vm5249_vm4, %v5248_v16 }
 0x96f   :  { %v1366_v11 = vpop.f32.mrf.mxu1 }
 0x970   :  { %v1835_v12 = vsel %vm402_vm5, %v1366_v11, -inf }
 0x971   :  { %v1289_v13 = vpop.f32.mrf.mxu0  ;;  %1836 = vmax.xlane.f32.xlu1 %v1835_v12  ;;  %v4834_v17 = vpop.f32.mrf.mxu1 }
 0x972   :  { %v1832_v14 = vsel %vm402_vm5, %v1289_v13, -inf }
 0x973   :  { %v4829_v15 = vpop.f32.mrf.mxu0  ;;  %1833 = vmax.xlane.f32.xlu0 %v1832_v14  ;;  %v1520_v18 = vpop.f32.mrf.mxu1 }
 0x974   :  { %v1841_v26 = vsel %vm402_vm5, %v1520_v18, -inf }
 0x975   :  { %v1443_v19 = vpop.f32.mrf.mxu0  ;;  %v4844_v2 = vpop.f32.mrf.mxu1 }
 0x976   :  { %v1838_v20 = vsel %vm402_vm5, %v1443_v19, -inf }
 0x977   :  { %v4839_v21 = vpop.f32.mrf.mxu0  ;;  %1839 = vmax.xlane.f32.xlu0 %v1838_v20  ;;  %v1674_v22 = vpop.f32.mrf.mxu1 }
 0x978   :  { %v1847_v32 = vsel %vm402_vm5, %v1674_v22, -inf }
 0x979   :  { %v1597_v23 = vpop.f32.mrf.mxu0  ;;  %v4854_v24 = vpop.f32.mrf.mxu1 }
 0x97a   :  { %v1844_v25 = vsel %vm402_vm5, %v1597_v23, -inf }
 0x97b   :  { %v4849_v27 = vpop.f32.mrf.mxu0  ;;  %1845 = vmax.xlane.f32.xlu1 %v1844_v25  ;;  %1842 = vmax.xlane.f32.xlu0 %v1841_v26  ;;  %v1828_v28 = vpop.f32.mrf.mxu1 }
 0x97c   :  { %v1853_v34 = vsel %vm402_vm5, %v1828_v28, -inf }
 0x97d   :  { %v1751_v29 = vpop.f32.mrf.mxu0  ;;  %v4864_v30 = vpop.f32.mrf.mxu1 }
 0x97e   :  { %v1850_v31 = vsel %vm402_vm5, %v1751_v29, -inf }
 0x97f   :  { %v4859_v33 = vpop.f32.mrf.mxu0  ;;  %1851 = vmax.xlane.f32.xlu1 %v1850_v31  ;;  %1848 = vmax.xlane.f32.xlu0 %v1847_v32 }
 0x983   :  { %1854 = vmax.xlane.f32.xlu0 %v1853_v34 }
 0x990   :  { %1920 = vrot.lane.b32.xlu1 %v5443_v57, %s5251_s21 }
 0x994   :  { %2072 = vrot.lane.b32.xlu1 %v5451_v59, %s5251_s21 }
 0x998   :  { %2148 = vrot.lane.b32.xlu1 %v5447_v58, %s5251_s21 }
 0x999   :  { %1996 = vrot.lane.b32.xlu0 %v5439_v56, %s5251_s21 }
 0x99c   :  { %2300 = vrot.lane.b32.xlu1 %v5455_v60, %s5251_s21 }
 0x99d   :  { %2224 = vrot.lane.b32.xlu0 %v5459_v61, %s5251_s21 }
 0x9fa   :  { %v1837_v35 = vpop.xlane.xlu1 %1836 }
 0x9fb   :  { %v1857_v3 = vsub.f32 %v1366_v11, %v1837_v35 }
 0x9fc   :  { %v1834_v1 = vpop.xlane.xlu0 %1833 }
 0x9fd   :  { %v1866_v37 = vmul.f32 1.442695, %v1857_v3  ;;  %v1856_v38 = vsub.f32 %v1289_v13, %v1834_v1 }
 0x9ff   :  { %5113 = vpow2.f32 %v1866_v37  ;;  %v1864_v39 = vmul.f32 1.442695, %v1856_v38 }
 0xa00   :  { %v1840_v40 = vpop.xlane.xlu0 %1839 }
 0xa01   :  { %5115 = vpow2.f32 %v1864_v39  ;;  %v1858_v41 = vsub.f32 %v1443_v19, %v1840_v40 }
 0xa03   :  { %v1868_v42 = vmul.f32 1.442695, %v1858_v41 }
 0xa04   :  { %v1846_v45 = vpop.xlane.xlu1 %1845  ;;  %v1843_v50 = vpop.xlane.xlu0 %1842 }
 0xa05   :  { %5117 = vpow2.f32 %v1868_v42  ;;  %v1860_v55 = vsub.f32 %v1597_v23, %v1846_v45  ;;  %v1859_v56 = vsub.f32 %v1520_v18, %v1843_v50 }
 0xa07   :  { %v1872_v57 = vmul.f32 1.442695, %v1860_v55  ;;  %v1870_v58 = vmul.f32 1.442695, %v1859_v56 }
 0xa08   :  { %v1852_v59 = vpop.xlane.xlu1 %1851  ;;  %v1849_v60 = vpop.xlane.xlu0 %1848 }
 0xa09   :  { %5119 = vpow2.f32 %v1872_v57  ;;  %v1862_v61 = vsub.f32 %v1751_v29, %v1852_v59  ;;  %v1861_v0 = vsub.f32 %v1674_v22, %v1849_v60 }
 0xa0a   :  { %5121 = vpow2.f32 %v1870_v58 }
 0xa0b   :  { %v1876_v4 = vmul.f32 1.442695, %v1862_v61  ;;  %v1874_v5 = vmul.f32 1.442695, %v1861_v0 }
 0xa0c   :  { %v5114_v6 = vpop.eup %5113  ;;  %v1921_v7 = vpop.permute.xlu1 %1920 }
 0xa0d   :  { %v1855_v8 = vpop.xlane.xlu0 %1854  ;;  %5123 = vpow2.f32 %v1876_v4  ;;  %4866 = vmatpush3.msra.mxu0 %v1921_v7  ;;  %v1883_v10 = vsel %vm402_vm5, %v5114_v6, 0.0 }
 0xa0e   :  { %v1863_v9 = vsub.f32 %v1828_v28, %v1855_v8  ;;  %v5116_v11 = vpop.eup %5115  ;;  %5125 = vpow2.f32 %v1874_v5  ;;  %1884 = vadd.xlane.f32.xlu0 %v1883_v10  ;;  %4875 = vmatprep.subr.mxu0 %v5248_v16 }
 0xa0f   :  { %v1880_v13 = vsel %vm402_vm5, %v5116_v11, 0.0 }
 0xa10   :  { %v1878_v12 = vmul.f32 1.442695, %v1863_v9  ;;  %1881 = vadd.xlane.f32.xlu1 %v1880_v13  ;;  %v2073_v27 = vpop.permute.xlu1 %2072 }
 0xa11   :  { %v1997_v17 = vpop.permute.xlu0 %1996 }
 0xa12   :  { %5127 = vpow2.f32 %v1878_v12  ;;  %4871 = vmatpush3.msra.mxu1 %v1997_v17  ;;  %v5118_v14 = vpop.eup %5117 }
 0xa13   :  { %4880 = vmatprep.subr.mxu1 %v5248_v16  ;;  %v1886_v15 = vsel %vm402_vm5, %v5118_v14, 0.0 }
 0xa14   :  { %1887 = vadd.xlane.f32.xlu1 %v1886_v15  ;;  %v2149_v28 = vpop.permute.xlu1 %2148 }
 0xa15   :  { %v2225_v29 = vpop.permute.xlu0 %2224 }
 0xa16   :  { %v5120_v18 = vpop.eup %5119 }
 0xa17   :  { %v5122_v19 = vpop.eup %5121  ;;  %v1892_v2 = vsel %vm402_vm5, %v5120_v18, 0.0 }
 0xa18   :  { %1893 = vadd.xlane.f32.xlu1 %v1892_v2  ;;  %v1889_v20 = vsel %vm402_vm5, %v5122_v19, 0.0  ;;  %v2301_v30 = vpop.permute.xlu1 %2300 }
 0xa19   :  { %1890 = vadd.xlane.f32.xlu0 %v1889_v20 }
 0xa1a   :  { %v5124_v21 = vpop.eup %5123 }
 0xa1b   :  { %v5546_v22 = vpop.eup %5125  ;;  %v1898_v23 = vsel %vm402_vm5, %v5124_v21, 0.0 }
 0xa1c   :  { %1899 = vadd.xlane.f32.xlu1 %v1898_v23  ;;  %v1895_v24 = vsel %vm402_vm5, %v5546_v22, 0.0 }
 0xa1d   :  { %1896 = vadd.xlane.f32.xlu0 %v1895_v24 }
 0xa1f   :  { %v5551_v25 = vpop.eup %5127 }
 0xa20   :  { %v1901_v26 = vsel %vm402_vm5, %v5551_v25, 0.0  ;;  %vm2550_vm5 = vcmask 1043459  }
 0xa21   :  { %1902 = vadd.xlane.f32.xlu0 %v1901_v26 }
 0xa2d   :  { %2452 = vrot.lane.b32.xlu1 %v5463_v62, %s5251_s21 }
 0xa37   :  { %2376 = vrot.lane.b32.xlu0 %v5467_v63, %s5251_s21 }
 0xa97   :  { %v1885_v31 = vpop.xlane.xlu0 %1884 }
 0xa98   :  { %5129 = vrcp.f32 %v1885_v31 }
 0xa99   :  { %v1882_v32 = vpop.xlane.xlu1 %1881 }
 0xa9a   :  { %5131 = vrcp.f32 %v1882_v32 }
 0xa9d   :  { %v1888_v33 = vpop.xlane.xlu1 %1887 }
 0xa9e   :  { %5133 = vrcp.f32 %v1888_v33 }
 0xaa1   :  { %v1894_v34 = vpop.xlane.xlu1 %1893 }
 0xaa2   :  { %5135 = vrcp.f32 %v1894_v34  ;;  %v1891_v35 = vpop.xlane.xlu0 %1890 }
 0xaa3   :  { %5137 = vrcp.f32 %v1891_v35 }
 0xaa5   :  { %v5130_v3 = vpop.eup %5129  ;;  %v1900_v1 = vpop.xlane.xlu1 %1899 }
 0xaa6   :  { %5139 = vrcp.f32 %v1900_v1  ;;  %v1897_v62 = vpop.xlane.xlu0 %1896  ;;  %v1913_v37 = vmul.f32 %v5130_v3, %v5114_v6 }
 0xaa7   :  { %v5132_v63 = vpop.eup %5131  ;;  %5141 = vrcp.f32 %v1897_v62 }
 0xaa8   :  { %4873 = vmatmul.mubr.msk.f32.vlgmr.msra.gmra.mxu1 %vm428_vm6, %v1913_v37  ;;  %v1912_v38 = vmul.f32 %v5132_v63, %v5116_v11 }
 0xaa9   :  { %4881 = vmatpush3.msra.mxu1 %v2149_v28  ;;  %4882 = vmatprep.mubr.msk.f32.mxu1 %vm5249_vm4, %v5248_v16  ;;  %v2453_v61 = vpop.permute.xlu1 %2452 }
 0xaaa   :  { %v1903_v39 = vpop.xlane.xlu0 %1902  ;;  %4868 = vmatmul.mubr.msk.f32.vlgmr.msra.gmra.mxu0 %vm428_vm6, %v1912_v38  ;;  %4890 = vmatprep.subr.mxu1 %v5248_v16 }
 0xaab   :  { %v5134_v40 = vpop.eup %5133  ;;  %5143 = vrcp.f32 %v1903_v39  ;;  %4876 = vmatpush3.msra.mxu0 %v2073_v27  ;;  %4877 = vmatprep.mubr.msk.f32.mxu0 %vm5249_vm4, %v5248_v16 }
 0xaac   :  { %4885 = vmatprep.subr.mxu0 %v5248_v16  ;;  %v1914_v41 = vmul.f32 %v5134_v40, %v5118_v14 }
 0xaae   :  { %4878 = vmatmul.mubr.msk.f32.vlgmr.msra.gmra.mxu0 %vm428_vm6, %v1914_v41  ;;  %v2377_v56 = vpop.permute.xlu0 %2376 }
 0xaaf   :  { %v5136_v42 = vpop.eup %5135  ;;  %4886 = vmatpush3.msra.mxu0 %v2225_v29  ;;  %4887 = vmatprep.mubr.msk.f32.mxu0 %vm5249_vm4, %v5248_v16 }
 0xab0   :  { %v5138_v45 = vpop.eup %5137  ;;  %4895 = vmatprep.subr.mxu0 %v5248_v16  ;;  %v1916_v50 = vmul.f32 %v5136_v42, %v5120_v18 }
 0xab1   :  { %v1915_v55 = vmul.f32 %v5138_v45, %v5122_v19 }
 0xab2   :  { %4888 = vmatmul.mubr.msk.f32.vlgmr.msra.gmra.mxu0 %vm428_vm6, %v1916_v50 }
 0xab3   :  { %v5140_v57 = vpop.eup %5139  ;;  %4883 = vmatmul.mubr.msk.f32.vlgmr.msra.gmra.mxu1 %vm428_vm6, %v1915_v55  ;;  %4896 = vmatpush3.msra.mxu0 %v2377_v56 }
 0xab4   :  { %v5142_v58 = vpop.eup %5141  ;;  %4891 = vmatpush3.msra.mxu1 %v2301_v30  ;;  %4892 = vmatprep.mubr.msk.f32.mxu1 %vm5249_vm4, %v5248_v16  ;;  %v1918_v59 = vmul.f32 %v5140_v57, %v5124_v21 }
 0xab5   :  { %4897 = vmatprep.mubr.msk.f32.mxu0 %vm5249_vm4, %v5248_v16  ;;  %4900 = vmatprep.subr.mxu1 %v5248_v16  ;;  %v1917_v60 = vmul.f32 %v5142_v58, %v5546_v22 }
 0xab6   :  { %4898 = vmatmul.mubr.msk.f32.vlgmr.msra.gmra.mxu0 %vm428_vm6, %v1918_v59  ;;  %4905 = vmatprep.subr.mxu0 %v5248_v16 }
 0xab7   :  { %4893 = vmatmul.mubr.msk.f32.vlgmr.msra.gmra.mxu1 %vm428_vm6, %v1917_v60  ;;  %4913 = vmatprep.mubr.msk.f32.mxu0 %vm5249_vm4, %v5248_v16 }
 0xab8   :  { %v5144_v0 = vpop.eup %5143  ;;  %4901 = vmatpush3.msra.mxu1 %v2453_v61  ;;  %4902 = vmatprep.mubr.msk.f32.mxu1 %vm5249_vm4, %v5248_v16 }
 0xab9   :  { %v1919_v4 = vmul.f32 %v5144_v0, %v5551_v25  ;;  %4916 = vmatprep.subr.mxu1 %v5248_v16 }
 0xabb   :  { %4903 = vmatmul.mubr.msk.f32.vlgmr.msra.gmra.mxu1 %vm428_vm6, %v1919_v4  ;;  %vm2553_vm6 = vcmask 1044484  }
 0xabc   :  { %4932 = vmatprep.mubr.msk.f32.mxu1 %vm5249_vm4, %v5248_v16 }
 0xb68   :  { %v2068_v5 = vpop.f32.mrf.mxu1 }
 0xb69   :  { %v2529_v9 = vadd.f32 %v2068_v5, %v5408_v44 }
 0xb6a   :  { %v1992_v6 = vpop.f32.mrf.mxu0  ;;  %v4874_v7 = vpop.f32.mrf.mxu1 }
 0xb6b   :  { %v2544_v13 = vrot.slane %v2529_v9, 7  ;;  %v2528_v17 = vadd.f32 %v1992_v6, %v5401_v36 }
 0xb6c   :  { %v4869_v8 = vpop.f32.mrf.mxu0 }
 0xb6d   :  { %v2545_v44 = vsel %vm583_vm7, %v2544_v13, %v2528_v17 }
 0xb6e   :  { %v2144_v10 = vpop.f32.mrf.mxu0 }
 0xb6f   :  { %v2530_v11 = vadd.f32 %v2144_v10, %v5406_v43 }
 0xb70   :  { %v4879_v12 = vpop.f32.mrf.mxu0 }
 0xb71   :  { %v2546_v15 = vrot.slane %v2530_v11, 6 }
 0xb72   :  { %v2296_v14 = vpop.f32.mrf.mxu0 }
 0xb73   :  { %v2220_v18 = vpop.f32.mrf.mxu1  ;;  %v2532_v19 = vadd.f32 %v2296_v14, %v5415_v46  ;;  %v2548_v43 = vsel %vm2547_vm2, %v2546_v15, %v2545_v44 }
 0xb74   :  { %v2531_v2 = vadd.f32 %v2220_v18, %v5417_v49  ;;  %v4889_v20 = vpop.f32.mrf.mxu0 }
 0xb75   :  { %v4884_v21 = vpop.f32.mrf.mxu1  ;;  %v2552_v24 = vrot.slane %v2532_v19, 4 }
 0xb76   :  { %v2549_v22 = vrot.slane %v2531_v2, 5  ;;  %v2448_v23 = vpop.f32.mrf.mxu0 }
 0xb77   :  { %v2372_v25 = vpop.f32.mrf.mxu1  ;;  %v2534_v36 = vadd.f32 %v2448_v23, %v5425_v52  ;;  %v863_v23 = vld [vmem:[#allocation2 + $0x150] sm:$0xff] }
 0xb78   :  { %v2551_v26 = vsel %vm2550_vm5, %v2549_v22, %v2548_v43  ;;  %v2533_v46 = vadd.f32 %v2372_v25, %v5419_v51  ;;  %v4899_v27 = vpop.f32.mrf.mxu0  ;;  %v862_v43 = vld [vmem:[#allocation2 + $0x148] sm:$0xff]  ;;  %4906 = vmatpush3.msra.mxu0 %v863_v23  ;;  %v860_v25 = vld [vmem:[#allocation2 + $0x138] sm:$0xff] }
 0xb79   :  { %v4894_v49 = vpop.f32.mrf.mxu1  ;;  %v2554_v29 = vsel %vm2553_vm6, %v2552_v24, %v2551_v26  ;;  %v2558_v30 = vrot.slane %v2534_v36, 2  ;;  %4907 = vmatprep.subr.mxu0 %v5248_v16  ;;  %v861_v24 = vld [vmem:[#allocation2 + $0x140] sm:$0xff]  ;;  %v866_v23 = vld [vmem:[#allocation2 + $0x168] sm:$0xff] }
 0xb7a   :  { %v2555_v28 = vrot.slane %v2533_v46, 3  ;;  %4908 = vmatpush3.msra.mxu0 %v862_v43  ;;  %v4482_v49 = vld [vmem:[#allocation2 + $0x19a] ss:$0 sm:$0xff]  ;;  %v865_v43 = vld [vmem:[#allocation2 + $0x160] sm:$0xff] }
 0xb7b   :  { %v2524_v31 = vpop.f32.mrf.mxu1  ;;  %4909 = vmatprep.subr.mxu0 %v5248_v16 }
 0xb7c   :  { %v2535_v32 = vadd.f32 %v2524_v31, %v5427_v53  ;;  %v2557_v33 = vsel %vm2556_vm9, %v2555_v28, %v2554_v29  ;;  %4910 = vmatpush3.msra.mxu0 %v861_v24  ;;  %v864_v24 = vld [vmem:[#allocation2 + $0x158] sm:$0xff] }
 0xb7d   :  { %v4904_v34 = vpop.f32.mrf.mxu1  ;;  %v2560_v35 = vsel %vm2559_vm10, %v2558_v30, %v2557_v33  ;;  %4911 = vmatprep.subr.mxu0 %v5248_v16 }
 0xb7e   :  { %v2561_v52 = vrot.slane %v2535_v32, 1  ;;  %4912 = vmatpush3.msra.mxu0 %v860_v25  ;;  %v4484_v25 = vld [vmem:[#allocation2 + $0x198] ss:$0 sm:$0xff] }
 0xb7f   :  { %4935 = vmatprep.subr.mxu0 %v5248_v16 }
 0xb80   :  { %v2563_v51 = vsel %vm2562_vm11, %v2561_v52, %v2560_v35 }
 0xb81   :  { %v2565_v3 = vsel %vm166_vm3, %v2563_v51, 0.0 }
 0xb82   :  { %2566 = vadd.xlane.f32.xlu0 %v2565_v3 }
 0xc0b   :  { %v2567_v1 = vpop.xlane.xlu0 %2566 }
 0xc0c   :  { %v2568_v62 = vmul.f32 0.03125, %v2567_v1 }
 0xc0e   :  { %v2570_v37 = vrot.slane %v2568_v62, 1  ;;  %v2571_v63 = vrot.slane %v2568_v62, 2  ;;  %v2572_v38 = vrot.slane %v2568_v62, 3  ;;  %v2573_v39 = vrot.slane %v2568_v62, 4 }
 0xc0f   :  { %v2574_v53 = vrot.slane %v2568_v62, 5  ;;  %v2575_v40 = vrot.slane %v2568_v62, 6  ;;  %v2576_v41 = vrot.slane %v2568_v62, 7  ;;  %v2585_v42 = vsub.f32 %v2528_v17, %v2568_v62 }
 0xc10   :  { %v2586_v45 = vsub.f32 %v2529_v9, %v2570_v37  ;;  %v2587_v50 = vsub.f32 %v2530_v11, %v2571_v63  ;;  %v2588_v55 = vsub.f32 %v2531_v2, %v2572_v38  ;;  %v2589_v56 = vsub.f32 %v2532_v19, %v2573_v39 }
 0xc11   :  { %v2590_v57 = vsub.f32 %v2533_v46, %v2574_v53  ;;  %v2591_v58 = vsub.f32 %v2534_v36, %v2575_v40  ;;  %v2592_v59 = vsub.f32 %v2535_v32, %v2576_v41  ;;  %v2593_v5 = vmul.f32 %v2585_v42, %v2585_v42 }
 0xc12   :  { %v2594_v60 = vmul.f32 %v2586_v45, %v2586_v45  ;;  %v2595_v61 = vmul.f32 %v2587_v50, %v2587_v50  ;;  %v2596_v0 = vmul.f32 %v2588_v55, %v2588_v55  ;;  %v2597_v4 = vmul.f32 %v2589_v56, %v2589_v56 }
 0xc13   :  { %v2598_v6 = vmul.f32 %v2590_v57, %v2590_v57  ;;  %v2599_v10 = vmul.f32 %v2591_v58, %v2591_v58  ;;  %v2600_v12 = vmul.f32 %v2592_v59, %v2592_v59 }
 0xc14   :  { %v2609_v7 = vrot.slane %v2594_v60, 7  ;;  %v2611_v8 = vrot.slane %v2595_v61, 6  ;;  %v2613_v17 = vrot.slane %v2596_v0, 5  ;;  %v2615_v11 = vrot.slane %v2597_v4, 4  ;;  %v4483_v60 = vld [vmem:[#allocation2 + $0x19b] ss:$0 sm:$0xff] }
 0xc15   :  { %v2617_v15 = vrot.slane %v2598_v6, 3  ;;  %v2619_v19 = vrot.slane %v2599_v10, 2  ;;  %v2621_v20 = vrot.slane %v2600_v12, 1 }
 0xc16   :  { %v2610_v13 = vsel %vm583_vm7, %v2609_v7, %v2593_v5 }
 0xc17   :  { %v2612_v9 = vsel %vm2547_vm2, %v2611_v8, %v2610_v13 }
 0xc18   :  { %v2614_v14 = vsel %vm2550_vm5, %v2613_v17, %v2612_v9 }
 0xc19   :  { %v2616_v18 = vsel %vm2553_vm6, %v2615_v11, %v2614_v14 }
 0xc1a   :  { %v2618_v2 = vsel %vm2556_vm9, %v2617_v15, %v2616_v18 }
 0xc1b   :  { %v2620_v21 = vsel %vm2559_vm10, %v2619_v19, %v2618_v2  ;;  %v871_v2 = vld [vmem:[#allocation2 + $0x190] sm:$0xff] }
 0xc1c   :  { %v2622_v44 = vsel %vm2562_vm11, %v2621_v20, %v2620_v21  ;;  %4917 = vmatpush3.msra.mxu1 %v871_v2  ;;  %v870_v20 = vld [vmem:[#allocation2 + $0x188] sm:$0xff]  ;;  %v869_v21 = vld [vmem:[#allocation2 + $0x180] sm:$0xff] }
 0xc1d   :  { %v2624_v22 = vsel %vm166_vm3, %v2622_v44, 0.0  ;;  %4918 = vmatprep.subr.mxu1 %v5248_v16  ;;  %v868_v44 = vld [vmem:[#allocation2 + $0x178] sm:$0xff] }
 0xc1e   :  { %2625 = vadd.xlane.f32.xlu1 %v2624_v22  ;;  %4919 = vmatpush3.msra.mxu1 %v870_v20  ;;  %v867_v22 = vld [vmem:[#allocation2 + $0x170] sm:$0xff] }
 0xc1f   :  { %4920 = vmatprep.subr.mxu1 %v5248_v16 }
 0xc20   :  { %4921 = vmatpush3.msra.mxu1 %v869_v21 }
 0xc21   :  { %4922 = vmatprep.subr.mxu1 %v5248_v16 }
 0xc22   :  { %4923 = vmatpush3.msra.mxu1 %v868_v44 }
 0xc23   :  { %4924 = vmatprep.subr.mxu1 %v5248_v16 }
 0xc24   :  { %4925 = vmatpush3.msra.mxu1 %v867_v22 }
 0xc25   :  { %4926 = vmatprep.subr.mxu1 %v5248_v16 }
 0xc26   :  { %4927 = vmatpush3.msra.mxu1 %v866_v23 }
 0xc27   :  { %4928 = vmatprep.subr.mxu1 %v5248_v16 }
 0xc28   :  { %4929 = vmatpush3.msra.mxu1 %v865_v43 }
 0xc29   :  { %4930 = vmatprep.subr.mxu1 %v5248_v16 }
 0xc2a   :  { %4931 = vmatpush3.msra.mxu1 %v864_v24 }
 0xc2b   :  { %4957 = vmatprep.subr.mxu1 %v5248_v16 }
 0xca7   :  { %v2626_v36 = vpop.xlane.xlu1 %2625 }
 0xca8   :  { %v2627_v26 = vmul.f32 0.03125, %v2626_v36 }
 0xcaa   :  { %v2628_v46 = vadd.f32 1e-05, %v2627_v26 }
 0xcac   :  { %5145 = vrsqrt.f32 %v2628_v46 }
 0xcb9   :  { %v5146_v27 = vpop.eup %5145 }
 0xcba   :  { %v2631_v28 = vrot.slane %v5146_v27, 1  ;;  %v2632_v29 = vrot.slane %v5146_v27, 2  ;;  %v2633_v30 = vrot.slane %v5146_v27, 3  ;;  %v2634_v31 = vrot.slane %v5146_v27, 4 }
 0xcbb   :  { %v2635_v32 = vrot.slane %v5146_v27, 5  ;;  %v2636_v33 = vrot.slane %v5146_v27, 6  ;;  %v2637_v34 = vrot.slane %v5146_v27, 7  ;;  %v2646_v52 = vmul.f32 %v5146_v27, %v2585_v42 }
 0xcbc   :  { %v2647_v35 = vmul.f32 %v2631_v28, %v2586_v45  ;;  %v2648_v51 = vmul.f32 %v2632_v29, %v2587_v50  ;;  %v2649_v3 = vmul.f32 %v2633_v30, %v2588_v55  ;;  %v2650_v1 = vmul.f32 %v2634_v31, %v2589_v56 }
 0xcbd   :  { %v2651_v62 = vmul.f32 %v2635_v32, %v2590_v57  ;;  %v2652_v37 = vmul.f32 %v2636_v33, %v2591_v58  ;;  %v2653_v63 = vmul.f32 %v2637_v34, %v2592_v59  ;;  %v2658_v38 = vmul.f32 %v4482_v49, %v2646_v52  ;;  %v4486_v52 = vld [vmem:[#allocation2 + $0x199] ss:$0 sm:$0xff] }
 0xcbe   :  { %v2659_v39 = vmul.f32 %v4482_v49, %v2647_v35  ;;  %v2660_v53 = vmul.f32 %v4482_v49, %v2648_v51  ;;  %v2661_v40 = vmul.f32 %v4482_v49, %v2649_v3  ;;  %v2662_v41 = vmul.f32 %v4482_v49, %v2650_v1 }
 0xcbf   :  { %v2663_v61 = vmul.f32 %v4482_v49, %v2651_v62  ;;  %v2664_v0 = vmul.f32 %v4482_v49, %v2652_v37  ;;  %v2665_v4 = vmul.f32 %v4482_v49, %v2653_v63  ;;  %v5627_v50 = vadd.f32 %v4483_v60, %v2658_v38 }
 0xcc0   :  { %v5619_v5 = vadd.f32 %v4483_v60, %v2659_v39  ;;  %v5621_v6 = vadd.f32 %v4483_v60, %v2660_v53  ;;  %v5623_v42 = vadd.f32 %v4483_v60, %v2661_v40  ;;  %v5625_v45 = vadd.f32 %v4483_v60, %v2662_v41 }
 0xcc1   :  { %v5629_v55 = vadd.f32 %v4483_v60, %v2663_v61  ;;  %v5633_v58 = vadd.f32 %v4483_v60, %v2664_v0  ;;  %v5635_v59 = vadd.f32 %v4483_v60, %v2665_v4 }
 0xcc2   :  { %v2690_v56 = vrot.slane %v5619_v5, 7  ;;  %v2692_v57 = vrot.slane %v5621_v6, 6  ;;  %v2694_v8 = vrot.slane %v5623_v42, 5  ;;  %v2696_v12 = vrot.slane %v5625_v45, 4 }
 0xcc3   :  { %v2698_v17 = vrot.slane %v5629_v55, 3  ;;  %v2700_v11 = vrot.slane %v5633_v58, 2  ;;  %v2702_v15 = vrot.slane %v5635_v59, 1 }
 0xcc4   :  { %v2691_v7 = vsel %vm583_vm7, %v2690_v56, %v5627_v50 }
 0xcc5   :  { %v2693_v10 = vsel %vm2547_vm2, %v2692_v57, %v2691_v7 }
 0xcc6   :  { %v2695_v13 = vsel %vm2550_vm5, %v2694_v8, %v2693_v10 }
 0xcc7   :  { %v2697_v9 = vsel %vm2553_vm6, %v2696_v12, %v2695_v13 }
 0xcc8   :  { %v2699_v14 = vsel %vm2556_vm9, %v2698_v17, %v2697_v9 }
 0xcc9   :  { %v2701_v18 = vsel %vm2559_vm10, %v2700_v11, %v2699_v14 }
 0xcca   :  { %v2703_v19 = vsel %vm2562_vm11, %v2702_v15, %v2701_v18 }
 0xccb   :  { %4914 = vmatmul.mubr.msk.f32.vlgmr.msra.gmra.mxu0 %vm166_vm3, %v2703_v19 }
 0xccc   :  { %4943 = vmatprep.mubr.msk.f32.mxu0 %vm5249_vm4, %v5248_v16 }
 0xd8b   :  { %v2772_v36 = vpop.f32.mrf.mxu0 }
 0xd8c   :  { %v2773_v26 = vadd.f32 %v4484_v25, %v2772_v36 }
 0xd8d   :  { %v4915_v46 = vpop.f32.mrf.mxu0 }
 0xd8e   :  { %v2776_v27 = vmul.f32 %v2773_v26, %v2773_v26 }
 0xd90   :  { %v2777_v49 = vmul.f32 %v2776_v27, %v2773_v26 }
 0xd92   :  { %v2778_v28 = vmul.f32 0.044715, %v2777_v49 }
 0xd94   :  { %v2779_v29 = vadd.f32 %v2778_v28, %v2773_v26 }
 0xd96   :  { %v2780_v30 = vmul.f32 0.7978846, %v2779_v29 }
 0xd98   :  { %5147 = vtanh.f32 %v2780_v30 }
 0xda5   :  { %v5148_v31 = vpop.eup %5147 }
 0xda6   :  { %v2782_v32 = vadd.f32 1.0, %v5148_v31 }
 0xda8   :  { %v2783_v33 = vmul.f32 0.5, %v2782_v32 }
 0xdaa   :  { %v2784_v34 = vmul.f32 %v2783_v33, %v2773_v26 }
 0xdac   :  { %4933 = vmatmul.mubr.msk.f32.vlgmr.msra.gmra.mxu1 %vm84_vm0, %v2784_v34 }
 0xdad   :  { %4965 = vmatprep.mubr.msk.f32.mxu1 %vm5249_vm4, %v5248_v16 }
 0xe6c   :  { %v2858_v35 = vpop.f32.mrf.mxu1 }
 0xe6d   :  { %v2859_v51 = vadd.f32 %v4486_v52, %v2858_v35 }
 0xe6e   :  { %v4934_v3 = vpop.f32.mrf.mxu1 }
 0xe6f   :  { %v2863_v1 = vrot.slane %v2859_v51, 1  ;;  %v2864_v62 = vrot.slane %v2859_v51, 2  ;;  %v2865_v37 = vrot.slane %v2859_v51, 3  ;;  %v2866_v63 = vrot.slane %v2859_v51, 4 }
 0xe70   :  { %v2867_v38 = vrot.slane %v2859_v51, 5  ;;  %v2868_v39 = vrot.slane %v2859_v51, 6  ;;  %v2869_v53 = vrot.slane %v2859_v51, 7  ;;  %v2878_v0 = vadd.f32 %v2859_v51, %v5627_v50 }
 0xe71   :  { %v2879_v40 = vadd.f32 %v2863_v1, %v5619_v5  ;;  %v2880_v41 = vadd.f32 %v2864_v62, %v5621_v6  ;;  %v2881_v60 = vadd.f32 %v2865_v37, %v5623_v42  ;;  %v2882_v61 = vadd.f32 %v2866_v63, %v5625_v45 }
 0xe72   :  { %v2883_v4 = vadd.f32 %v2867_v38, %v5629_v55  ;;  %v2884_v7 = vadd.f32 %v2868_v39, %v5633_v58  ;;  %v2885_v8 = vadd.f32 %v2869_v53, %v5635_v59 }
 0xe73   :  { %v2894_v56 = vrot.slane %v2879_v40, 7  ;;  %v2896_v57 = vrot.slane %v2880_v41, 6  ;;  %v2898_v12 = vrot.slane %v2881_v60, 5  ;;  %v2900_v6 = vrot.slane %v2882_v61, 4 }
 0xe74   :  { %v2902_v13 = vrot.slane %v2883_v4, 3  ;;  %v2904_v50 = vrot.slane %v2884_v7, 2  ;;  %v2906_v17 = vrot.slane %v2885_v8, 1 }
 0xe75   :  { %v2895_v10 = vsel %vm583_vm7, %v2894_v56, %v2878_v0  ;;  %v3022_v56 = vld [vmem:[#allocation2 + $0x1a0] sm:$0xff] }
 0xe76   :  { %v2897_v5 = vsel %vm2547_vm2, %v2896_v57, %v2895_v10 }
 0xe77   :  { %v2899_v42 = vsel %vm2550_vm5, %v2898_v12, %v2897_v5  ;;  %v4488_v12 = vld [vmem:[#allocation2 + $0x19c] ss:$0 sm:$0xff] }
 0xe78   :  { %v2901_v45 = vsel %vm2553_vm6, %v2900_v6, %v2899_v42 }
 0xe79   :  { %v2903_v55 = vsel %vm2556_vm9, %v2902_v13, %v2901_v45 }
 0xe7a   :  { %v2905_v9 = vsel %vm2559_vm10, %v2904_v50, %v2903_v55 }
 0xe7b   :  { %v2907_v58 = vsel %vm2562_vm11, %v2906_v17, %v2905_v9 }
 0xe7c   :  { %v2909_v59 = vsel %vm166_vm3, %v2907_v58, 0.0 }
 0xe7d   :  { %2910 = vadd.xlane.f32.xlu0 %v2909_v59 }
 0xf06   :  { %v2911_v11 = vpop.xlane.xlu0 %2910 }
 0xf07   :  { %v2912_v14 = vmul.f32 0.03125, %v2911_v11 }
 0xf09   :  { %v2914_v15 = vrot.slane %v2912_v14, 1  ;;  %v2915_v18 = vrot.slane %v2912_v14, 2  ;;  %v2916_v19 = vrot.slane %v2912_v14, 3  ;;  %v2917_v2 = vrot.slane %v2912_v14, 4 }
 0xf0a   :  { %v2918_v20 = vrot.slane %v2912_v14, 5  ;;  %v2919_v21 = vrot.slane %v2912_v14, 6  ;;  %v2920_v44 = vrot.slane %v2912_v14, 7  ;;  %v2929_v22 = vsub.f32 %v2878_v0, %v2912_v14  ;;  %v3024_v0 = vld [vmem:[#allocation2 + $0x1b0] sm:$0xff] }
 0xf0b   :  { %v2930_v23 = vsub.f32 %v2879_v40, %v2914_v15  ;;  %v2931_v43 = vsub.f32 %v2880_v41, %v2915_v18  ;;  %v2932_v24 = vsub.f32 %v2881_v60, %v2916_v19  ;;  %v2933_v25 = vsub.f32 %v2882_v61, %v2917_v2  ;;  %v3025_v61 = vld [vmem:[#allocation2 + $0x1b8] sm:$0xff] }
 0xf0c   :  { %v2934_v36 = vsub.f32 %v2883_v4, %v2918_v20  ;;  %v2935_v26 = vsub.f32 %v2884_v7, %v2919_v21  ;;  %v2936_v46 = vsub.f32 %v2885_v8, %v2920_v44  ;;  %v2937_v30 = vmul.f32 %v2929_v22, %v2929_v22  ;;  %4936 = vmatpush3.msra.mxu0 %v3025_v61  ;;  %v3023_v4 = vld [vmem:[#allocation2 + $0x1a8] sm:$0xff] }
 0xf0d   :  { %v2938_v27 = vmul.f32 %v2930_v23, %v2930_v23  ;;  %v2939_v49 = vmul.f32 %v2931_v43, %v2931_v43  ;;  %v2940_v28 = vmul.f32 %v2932_v24, %v2932_v24  ;;  %v2941_v29 = vmul.f32 %v2933_v25, %v2933_v25  ;;  %4937 = vmatprep.subr.mxu0 %v5248_v16 }
 0xf0e   :  { %v2942_v31 = vmul.f32 %v2934_v36, %v2934_v36  ;;  %v2943_v34 = vmul.f32 %v2935_v26, %v2935_v26  ;;  %v2944_v52 = vmul.f32 %v2936_v46, %v2936_v46  ;;  %4938 = vmatpush3.msra.mxu0 %v3024_v0  ;;  %v5721_v0 = vld [vmem:[#allocation2 + $0x221] ss:$0 sm:$0xff] }
 0xf0f   :  { %v2953_v32 = vrot.slane %v2938_v27, 7  ;;  %v2955_v33 = vrot.slane %v2939_v49, 6  ;;  %v2957_v51 = vrot.slane %v2940_v28, 5  ;;  %v2959_v1 = vrot.slane %v2941_v29, 4  ;;  %4939 = vmatprep.subr.mxu0 %v5248_v16  ;;  %v4489_v27 = vld [vmem:[#allocation2 + $0x19d] ss:$0 sm:$0xff] }
 0xf10   :  { %v2961_v37 = vrot.slane %v2942_v31, 3  ;;  %v2963_v38 = vrot.slane %v2943_v34, 2  ;;  %v2965_v53 = vrot.slane %v2944_v52, 1  ;;  %4940 = vmatpush3.msra.mxu0 %v3023_v4 }
 0xf11   :  { %v2954_v35 = vsel %vm583_vm7, %v2953_v32, %v2937_v30  ;;  %4941 = vmatprep.subr.mxu0 %v5248_v16 }
 0xf12   :  { %v2956_v3 = vsel %vm2547_vm2, %v2955_v33, %v2954_v35  ;;  %4942 = vmatpush3.msra.mxu0 %v3022_v56 }
 0xf13   :  { %v2958_v62 = vsel %vm2550_vm5, %v2957_v51, %v2956_v3  ;;  %4946 = vmatprep.subr.mxu0 %v5248_v16 }
 0xf14   :  { %v2960_v63 = vsel %vm2553_vm6, %v2959_v1, %v2958_v62 }
 0xf15   :  { %v2962_v39 = vsel %vm2556_vm9, %v2961_v37, %v2960_v63 }
 0xf16   :  { %v2964_v40 = vsel %vm2559_vm10, %v2963_v38, %v2962_v39  ;;  %v5698_v38 = vld [vmem:[#allocation2 + $0x1d8] sm:$0xff] }
 0xf17   :  { %v2966_v41 = vsel %vm2562_vm11, %v2965_v53, %v2964_v40  ;;  %v5702_v53 = vld [vmem:[#allocation2 + $0x1d0] sm:$0xff]  ;;  %v5708_v40 = vld [vmem:[#allocation2 + $0x1c8] sm:$0xff] }
 0xf18   :  { %v2968_v60 = vsel %vm166_vm3, %v2966_v41, 0.0  ;;  %v5712_v41 = vld [vmem:[#allocation2 + $0x1c0] sm:$0xff] }
 0xf19   :  { %2969 = vadd.xlane.f32.xlu0 %v2968_v60 }
 0xfa2   :  { %v2970_v57 = vpop.xlane.xlu0 %2969 }
 0xfa3   :  { %v2971_v7 = vmul.f32 0.03125, %v2970_v57 }
 0xfa5   :  { %v2972_v8 = vadd.f32 1e-05, %v2971_v7  ;;  %v4490_v7 = vld [vmem:[#allocation2 + $0x220] ss:$0 sm:$0xff] }
 0xfa7   :  { %5149 = vrsqrt.f32 %v2972_v8 }
 0xfb4   :  { %v5150_v10 = vpop.eup %5149 }
 0xfb5   :  { %v2975_v5 = vrot.slane %v5150_v10, 1  ;;  %v2976_v6 = vrot.slane %v5150_v10, 2  ;;  %v2977_v42 = vrot.slane %v5150_v10, 3  ;;  %v2978_v13 = vrot.slane %v5150_v10, 4 }
 0xfb6   :  { %v2979_v45 = vrot.slane %v5150_v10, 5  ;;  %v2980_v50 = vrot.slane %v5150_v10, 6  ;;  %v2981_v55 = vrot.slane %v5150_v10, 7  ;;  %v2990_v17 = vmul.f32 %v5150_v10, %v2929_v22 }
 0xfb7   :  { %v2991_v9 = vmul.f32 %v2975_v5, %v2930_v23  ;;  %v2992_v58 = vmul.f32 %v2976_v6, %v2931_v43  ;;  %v2993_v59 = vmul.f32 %v2977_v42, %v2932_v24  ;;  %v2994_v11 = vmul.f32 %v2978_v13, %v2933_v25 }
 0xfb8   :  { %v2995_v14 = vmul.f32 %v2979_v45, %v2934_v36  ;;  %v2996_v15 = vmul.f32 %v2980_v50, %v2935_v26  ;;  %v2997_v18 = vmul.f32 %v2981_v55, %v2936_v46  ;;  %v3002_v19 = vmul.f32 %v4488_v12, %v2990_v17 }
 0xfb9   :  { %v3003_v2 = vmul.f32 %v4488_v12, %v2991_v9  ;;  %v3004_v20 = vmul.f32 %v4488_v12, %v2992_v58  ;;  %v3005_v21 = vmul.f32 %v4488_v12, %v2993_v59  ;;  %v3006_v44 = vmul.f32 %v4488_v12, %v2994_v11  ;;  %v5735_v9 = vld [vmem:[%s5999_s1] sm:$0x3]  ;;  %v5740_v11 = vld [vmem:[#allocation2 + $0x218] sm:$0xff]  ;;  %s5253_s1 = smov 32  }
 0xfba   :  { %v3007_v49 = vmul.f32 %v4488_v12, %v2995_v14  ;;  %v3008_v28 = vmul.f32 %v4488_v12, %v2996_v15  ;;  %v3009_v29 = vmul.f32 %v4488_v12, %v2997_v18  ;;  %v3014_v23 = vadd.f32 %v4489_v27, %v3002_v19  ;;  %v5742_v14 = vld [vmem:[#allocation2 + $0x210] sm:$0xff]  ;;  %v5745_v15 = vld [vmem:[#allocation2 + $0x1f8] sm:$0xff]  ;;  %v5748_v18 = vld [vmem:[#allocation2 + $0x208] sm:$0xff] }
 0xfbb   :  { %v3015_v30 = vadd.f32 %v4489_v27, %v3003_v2  ;;  %v3016_v31 = vadd.f32 %v4489_v27, %v3004_v20  ;;  %v3017_v32 = vadd.f32 %v4489_v27, %v3005_v21  ;;  %v3018_v22 = vadd.f32 %v4489_v27, %v3006_v44  ;;  %v5750_v19 = vld [vmem:[#allocation2 + $0x1f0] sm:$0xff]  ;;  %4958 = vmatpush3.msra.mxu1 %v5745_v15  ;;  %v5755_v2 = vld [vmem:[#allocation2 + $0x200] sm:$0xff]  ;;  %v5758_v20 = vld [vmem:[#allocation2 + $0x1e8] sm:$0xff] }
 0xfbc   :  { %v3019_v43 = vadd.f32 %v4489_v27, %v3007_v49  ;;  %v3020_v36 = vadd.f32 %v4489_v27, %v3008_v28  ;;  %v3021_v26 = vadd.f32 %v4489_v27, %v3009_v29  ;;  %v5252_v50 = vmov 0   ;;  %4959 = vmatprep.subr.mxu1 %v5248_v16  ;;  %v5764_v21 = vld [vmem:[#allocation2 + $0x1e0] sm:$0xff] }
 0xfbd   :  { %v3054_v24 = vrot.slane %v3015_v30, 7  ;;  %v3056_v25 = vrot.slane %v3016_v31, 6  ;;  %v3058_v33 = vrot.slane %v3017_v32, 5  ;;  %v3060_v52 = vrot.slane %v3018_v22, 4  ;;  %5099 = vset.pattern.permute.xlu1 %v5252_v50  ;;  %5100 = vset.pattern.permute.xlu0 %v5252_v50  ;;  %v5793_v32 = vld [vmem:[#allocation2 + $0x223] ss:$0 sm:$0xff] }
 0xfbe   :  { %v3062_v51 = vrot.slane %v3019_v43, 3  ;;  %v3064_v1 = vrot.slane %v3020_v36, 2  ;;  %v3066_v37 = vrot.slane %v3021_v26, 1  ;;  %vm3141_vm0 = vcmp.gt.s32.totalorder %v5735_v9, 0  ;;  %4960 = vmatpush3.msra.mxu1 %v5750_v19  ;;  %v5822_v36 = vld [vmem:[#allocation2 + $0x222] ss:$0 sm:$0xff] }
 0xfbf   :  { %v3055_v46 = vsel %vm583_vm7, %v3054_v24, %v3014_v23  ;;  %v3427_v59 = vsel %vm3141_vm0, 1, %v5252_v50  ;;  %4961 = vmatprep.subr.mxu1 %v5248_v16  ;;  %vm3142_vm13 = vcmp.gt.s32.totalorder %v5735_v9, 1  ;;  %vm3143_vm15 = vcmp.gt.s32.totalorder %v5735_v9, 2 }
 0xfc0   :  { %v3057_v34 = vsel %vm2547_vm2, %v3056_v25, %v3055_v46  ;;  %4962 = vmatpush3.msra.mxu1 %v5758_v20 }
 0xfc1   :  { %v3059_v35 = vsel %vm2550_vm5, %v3058_v33, %v3057_v34  ;;  %4963 = vmatprep.subr.mxu1 %v5248_v16 }
 0xfc2   :  { %v3061_v3 = vsel %vm2553_vm6, %v3060_v52, %v3059_v35  ;;  %4964 = vmatpush3.msra.mxu1 %v5764_v21 }
 0xfc3   :  { %v3063_v62 = vsel %vm2556_vm9, %v3062_v51, %v3061_v3  ;;  %4979 = vmatprep.subr.mxu1 %v5248_v16 }
 0xfc4   :  { %v3065_v63 = vsel %vm2559_vm10, %v3064_v1, %v3063_v62 }
 0xfc5   :  { %v3067_v39 = vsel %vm2562_vm11, %v3066_v37, %v3065_v63 }
 0xfc6   :  { %4944 = vmatmul.mubr.msk.f32.vlgmr.msra.gmra.mxu0 %vm166_vm3, %v3067_v39 }
 0xfc7   :  { %4947 = vmatpush3.msra.mxu0 %v5698_v38  ;;  %4954 = vmatprep.mubr.msk.f32.mxu0 %vm5249_vm4, %v5248_v16 }
 0xfc8   :  { %4948 = vmatprep.subr.mxu0 %v5248_v16 }
 0xfc9   :  { %4949 = vmatpush3.msra.mxu0 %v5702_v53 }
 0xfca   :  { %4950 = vmatprep.subr.mxu0 %v5248_v16 }
 0xfcb   :  { %4951 = vmatpush3.msra.mxu0 %v5708_v40 }
 0xfcc   :  { %4952 = vmatprep.subr.mxu0 %v5248_v16 }
 0xfcd   :  { %4953 = vmatpush3.msra.mxu0 %v5712_v41 }
 0xfce   :  { %4955 = vmatmul.mubr.f32.vlgmr.msra.gmra.mxu0 %v5248_v16  ;;  %4968 = vmatprep.subr.mxu0 %v5248_v16 }
 0xfcf   :  { %4976 = vmatprep.mubr.msk.f32.mxu0 %vm5249_vm4, %v5248_v16  ;;  %4969 = vmatpush3.msra.mxu0 %v5740_v11 }
 0xfd0   :  { %4970 = vmatprep.subr.mxu0 %v5248_v16 }
 0xfd1   :  { %4971 = vmatpush3.msra.mxu0 %v5742_v14 }
 0xfd2   :  { %4972 = vmatprep.subr.mxu0 %v5248_v16 }
 0xfd3   :  { %4973 = vmatpush3.msra.mxu0 %v5748_v18 }
 0xfd4   :  { %4974 = vmatprep.subr.mxu0 %v5248_v16 }
 0xfd5   :  { %4975 = vmatpush3.msra.mxu0 %v5755_v2 }
 0xfd6   :  { %4977 = vmatmul.mubr.f32.vlgmr.msra.gmra.mxu0 %v5248_v16  ;;  %4990 = vmatprep.subr.mxu0 %v5248_v16 }
 0xfd7   :  { %4991 = vmatpush3.msra.mxu0 %v5745_v15  ;;  %4998 = vmatprep.mubr.msk.f32.mxu0 %vm5249_vm4, %v5248_v16 }
 0xfd8   :  { %4992 = vmatprep.subr.mxu0 %v5248_v16 }
 0xfd9   :  { %4993 = vmatpush3.msra.mxu0 %v5750_v19 }
 0xfda   :  { %4994 = vmatprep.subr.mxu0 %v5248_v16 }
 0xfdb   :  { %4995 = vmatpush3.msra.mxu0 %v5758_v20 }
 0xfdc   :  { %4996 = vmatprep.subr.mxu0 %v5248_v16 }
 0xfdd   :  { %4997 = vmatpush3.msra.mxu0 %v5764_v21 }
 0xfde   :  { %5012 = vmatprep.subr.mxu0 %v5248_v16 }
0x1086   :  { %v3136_v60 = vpop.f32.mrf.mxu0 }
0x1087   :  { %v5725_v8 = vadd.f32 %v4490_v7, %v3136_v60 }
0x1088   :  { %v4945_v61 = vpop.f32.mrf.mxu0 }
0x108e   :  { %v3218_v4 = vpop.f32.mrf.mxu0 }
0x108f   :  { %v3219_v56 = vadd.f32 %v5721_v0, %v3218_v4 }
0x1090   :  { %v4956_v57 = vpop.f32.mrf.mxu0 }
0x1091   :  { %3230 = vrot.lane.b32.xlu1 %v3219_v56, %s5251_s21  ;;  %v3222_v10 = vadd.f32 %v3219_v56, %v5725_v8 }
0x1093   :  { %v4493_v12 = vmul.f32 -1.442695, %v3222_v10 }
0x1095   :  { %5151 = vpow2.f32 %v4493_v12 }
0x1096   :  { %v3397_v22 = vpop.f32.mrf.mxu0 }
0x1097   :  { %v3398_v23 = vadd.f32 %v5793_v32, %v3397_v22 }
0x1098   :  { %v4978_v43 = vpop.f32.mrf.mxu0 }
0x10a2   :  { %v5152_v5 = vpop.eup %5151 }
0x10a3   :  { %v3226_v6 = vadd.f32 1.0, %v5152_v5 }
0x10a5   :  { %5153 = vrcp.f32 %v3226_v6 }
0x10b2   :  { %v5154_v42 = vpop.eup %5153 }
0x10b3   :  { %v3240_v44 = vsub.f32 1.0, %v5154_v42  ;;  %v3246_v49 = vmul.f32 0.0, %v5154_v42 }
0x1103   :  { %v3231_v13 = vpop.permute.xlu1 %3230 }
0x1104   :  { %v3233_v45 = vmul.f32 %v5154_v42, %v3231_v13 }
0x1106   :  { %3235 = vrot.lane.b32.xlu0 %v3233_v45, %s5251_s21 }
0x1178   :  { %v3236_v55 = vpop.permute.xlu0 %3235 }
0x1179   :  { %v3238_v17 = vadd.f32 %v3236_v55, %v5725_v8 }
0x117b   :  { %5155 = vtanh.f32 %v3238_v17 }
0x1188   :  { %v5156_v58 = vpop.eup %5155 }
0x1189   :  { %3242 = vrot.lane.b32.xlu1 %v5156_v58, %s5250_s2 }
0x118d   :  { %3429 = vperm.xlu1 %5099, %v3427_v59  }
0x11fb   :  { %v3243_v27 = vpop.permute.xlu1 %3242 }
0x11fc   :  { %v3245_v28 = vmul.f32 %v3243_v27, %v3240_v44 }
0x11fe   :  { %v3247_v29 = vadd.f32 %v3246_v49, %v3245_v28  ;;  %v3716_v28 = vsel %vm3142_vm13, 1, %v5252_v50 }
0x1200   :  { %3253 = vrot.lane.b32.xlu0 %v3247_v29, %s5250_s2 }
0x1204   :  { %3409 = vrot.lane.b32.xlu0 %v3398_v23, %s5251_s21 }
0x1208   :  { %v5784_v30 = vpop.permute.xlu1 %3429 }
0x1209   :  { %vm3431_vm12 = vcmp.eq.s32.totalorder %v5784_v30, 1 }
0x120a   :  { %v5789_v31 = vsel %vm3431_vm12, %v3247_v29, 0.0 }
0x120b   :  { %3435 = vrot.lane.b32.xlu1 %v5789_v31, %s5250_s2  ;;  %v3535_v29 = vrot.slane %v5789_v31, 6 }
0x1272   :  { %v3254_v24 = vpop.permute.xlu0 %3253 }
0x1273   :  { %4966 = vmatmul.mubr.msk.f32.vlgmr.msra.gmra.mxu1 %vm166_vm3, %v3254_v24 }
0x1274   :  { %4980 = vmatpush3.msra.mxu1 %v5698_v38  ;;  %4987 = vmatprep.mubr.msk.f32.mxu1 %vm5249_vm4, %v5248_v16 }
0x1275   :  { %4981 = vmatprep.subr.mxu1 %v5248_v16 }
0x1276   :  { %4982 = vmatpush3.msra.mxu1 %v5702_v53  ;;  %v3410_v63 = vpop.permute.xlu0 %3409 }
0x1277   :  { %4983 = vmatprep.subr.mxu1 %v5248_v16 }
0x1278   :  { %4984 = vmatpush3.msra.mxu1 %v5708_v40 }
0x1279   :  { %4985 = vmatprep.subr.mxu1 %v5248_v16 }
0x127a   :  { %4986 = vmatpush3.msra.mxu1 %v5712_v41 }
0x127b   :  { %5001 = vmatprep.subr.mxu1 %v5248_v16 }
0x127d   :  { %v5808_v25 = vpop.permute.xlu1 %3435 }
0x127e   :  { %4988 = vmatmul.mubr.msk.f32.vlgmr.msra.gmra.mxu1 %vm166_vm3, %v5808_v25 }
0x127f   :  { %5002 = vmatpush3.msra.mxu1 %v5740_v11  ;;  %5009 = vmatprep.mubr.msk.f32.mxu1 %vm5249_vm4, %v5248_v16 }
0x1280   :  { %5003 = vmatprep.subr.mxu1 %v5248_v16 }
0x1281   :  { %5004 = vmatpush3.msra.mxu1 %v5742_v14 }
0x1282   :  { %5005 = vmatprep.subr.mxu1 %v5248_v16 }
0x1283   :  { %5006 = vmatpush3.msra.mxu1 %v5748_v18 }
0x1284   :  { %5007 = vmatprep.subr.mxu1 %v5248_v16 }
0x1285   :  { %5008 = vmatpush3.msra.mxu1 %v5755_v2 }
0x1286   :  { %5023 = vmatprep.subr.mxu1 %v5248_v16 }
0x1333   :  { %v3323_v26 = vpop.f32.mrf.mxu1 }
0x1334   :  { %v3324_v46 = vadd.f32 %v5822_v36, %v3323_v26 }
0x1335   :  { %v4967_v33 = vpop.f32.mrf.mxu1 }
0x1336   :  { %v3401_v34 = vadd.f32 %v3398_v23, %v3324_v46 }
0x1338   :  { %v4497_v52 = vmul.f32 -1.442695, %v3401_v34 }
0x133a   :  { %5157 = vpow2.f32 %v4497_v52 }
0x133e   :  { %v3505_v35 = vpop.f32.mrf.mxu1 }
0x133f   :  { %v3506_v51 = vadd.f32 %v5721_v0, %v3505_v35 }
0x1340   :  { %v4989_v3 = vpop.f32.mrf.mxu1 }
0x1341   :  { %v3510_v1 = vrot.slane %v3506_v51, 6 }
0x1343   :  { %3519 = vrot.lane.b32.xlu1 %v3510_v1, %s5251_s21  ;;  %v3512_v61 = vadd.f32 %v3510_v1, %v5725_v8 }
0x1345   :  { %v4499_v4 = vmul.f32 -1.442695, %v3512_v61 }
0x1347   :  { %v5158_v62 = vpop.eup %5157 }
0x1348   :  { %v3405_v37 = vadd.f32 1.0, %v5158_v62 }
0x134a   :  { %5159 = vrcp.f32 %v3405_v37 }
0x134b   :  { %5161 = vpow2.f32 %v4499_v4 }
0x1357   :  { %v5160_v39 = vpop.eup %5159 }
0x1358   :  { %v3412_v60 = vmul.f32 %v5160_v39, %v3410_v63  ;;  %v5162_v56 = vpop.eup %5161  ;;  %v3419_v17 = vsub.f32 1.0, %v5160_v39  ;;  %v3425_v59 = vmul.f32 0.0, %v5160_v39 }
0x1359   :  { %v3516_v57 = vadd.f32 1.0, %v5162_v56 }
0x135a   :  { %3414 = vrot.lane.b32.xlu0 %v3412_v60, %s5251_s21 }
0x135b   :  { %5163 = vrcp.f32 %v3516_v57 }
0x1368   :  { %v5164_v7 = vpop.eup %5163 }
0x1369   :  { %v3529_v22 = vsub.f32 1.0, %v5164_v7  ;;  %v3537_v43 = vmul.f32 %v5164_v7, %v3535_v29 }
0x13b5   :  { %v3520_v10 = vpop.permute.xlu1 %3519 }
0x13b6   :  { %v3522_v12 = vmul.f32 %v5164_v7, %v3520_v10 }
0x13b8   :  { %3524 = vrot.lane.b32.xlu1 %v3522_v12, %s5251_s21 }
0x13cc   :  { %v3415_v5 = vpop.permute.xlu0 %3414 }
0x13cd   :  { %v3417_v6 = vadd.f32 %v3415_v5, %v3324_v46 }
0x13cf   :  { %5165 = vtanh.f32 %v3417_v6 }
0x13dc   :  { %v5166_v42 = vpop.eup %5165 }
0x13dd   :  { %3421 = vrot.lane.b32.xlu0 %v5166_v42, %s5250_s2 }
0x142a   :  { %v3525_v13 = vpop.permute.xlu1 %3524 }
0x142b   :  { %v3527_v45 = vadd.f32 %v3525_v13, %v5725_v8 }
0x142d   :  { %5167 = vtanh.f32 %v3527_v45 }
0x143a   :  { %v5168_v55 = vpop.eup %5167 }
0x143b   :  { %3531 = vrot.lane.b32.xlu1 %v5168_v55, %s5250_s2 }
0x144f   :  { %v3422_v58 = vpop.permute.xlu0 %3421 }
0x1450   :  { %v3424_v44 = vmul.f32 %v3422_v58, %v3419_v17 }
0x1452   :  { %v3426_v27 = vadd.f32 %v3425_v59, %v3424_v44 }
0x1454   :  { %v5836_v49 = vsel %vm3431_vm12, %v3426_v27, 0.0 }
0x1455   :  { %3616 = vrot.lane.b32.xlu0 %v5836_v49, %s5250_s2 }
0x1459   :  { %3718 = vperm.xlu0 %5100, %v3716_v28  }
0x14ad   :  { %v3532_v23 = vpop.permute.xlu1 %3531 }
0x14ae   :  { %v3534_v24 = vmul.f32 %v3532_v23, %v3529_v22 }
0x14b0   :  { %v3538_v26 = vadd.f32 %v3537_v43, %v3534_v24 }
0x14b2   :  { %v3540_v46 = vrot.slane %v3538_v26, 2 }
0x14b4   :  { %3541 = vrot.lane.b32.xlu1 %v3540_v46, %s5250_s2 }
0x14c7   :  { %v3617_v33 = vpop.permute.xlu0 %3616 }
0x14c8   :  { %5010 = vmatmul.mubr.msk.f32.vlgmr.msra.gmra.mxu1 %vm166_vm3, %v3617_v33  ;;  %v4007_v33 = vsel %vm3143_vm15, 1, %v5252_v50 }
0x14c9   :  { %5024 = vmatpush3.msra.mxu1 %v5745_v15  ;;  %5031 = vmatprep.mubr.msk.f32.mxu1 %vm5249_vm4, %v5248_v16 }
0x14ca   :  { %5025 = vmatprep.subr.mxu1 %v5248_v16 }
0x14cb   :  { %5026 = vmatpush3.msra.mxu1 %v5750_v19 }
0x14cc   :  { %5027 = vmatprep.subr.mxu1 %v5248_v16 }
0x14cd   :  { %5028 = vmatpush3.msra.mxu1 %v5758_v20 }
0x14ce   :  { %5029 = vmatprep.subr.mxu1 %v5248_v16 }
0x14cf   :  { %5030 = vmatpush3.msra.mxu1 %v5764_v21 }
0x14d0   :  { %5045 = vmatprep.subr.mxu1 %v5248_v16 }
0x14d4   :  { %v5855_v31 = vpop.permute.xlu0 %3718 }
0x14d5   :  { %vm3720_vm14 = vcmp.eq.s32.totalorder %v5855_v31, 1 }
0x1526   :  { %v3542_v30 = vpop.permute.xlu1 %3541 }
0x1527   :  { %4999 = vmatmul.mubr.msk.f32.vlgmr.msra.gmra.mxu0 %vm166_vm3, %v3542_v30  ;;  %v5869_v34 = vsel %vm3720_vm14, %v3542_v30, %v5808_v25 }
0x1528   :  { %5013 = vmatpush3.msra.mxu0 %v5698_v38  ;;  %5020 = vmatprep.mubr.msk.f32.mxu0 %vm5249_vm4, %v5248_v16  ;;  %v3824_v44 = vrot.slane %v5869_v34, 4 }
0x1529   :  { %5014 = vmatprep.subr.mxu0 %v5248_v16 }
0x152a   :  { %5015 = vmatpush3.msra.mxu0 %v5702_v53 }
0x152b   :  { %5016 = vmatprep.subr.mxu0 %v5248_v16 }
0x152c   :  { %5017 = vmatpush3.msra.mxu0 %v5708_v40 }
0x152d   :  { %5018 = vmatprep.subr.mxu0 %v5248_v16 }
0x152e   :  { %5019 = vmatpush3.msra.mxu0 %v5712_v41 }
0x152f   :  { %5021 = vmatmul.mubr.msk.f32.vlgmr.msra.gmra.mxu0 %vm166_vm3, %v5869_v34  ;;  %5034 = vmatprep.subr.mxu0 %v5248_v16 }
0x1530   :  { %5035 = vmatpush3.msra.mxu0 %v5740_v11  ;;  %5042 = vmatprep.mubr.msk.f32.mxu0 %vm5249_vm4, %v5248_v16 }
0x1531   :  { %5036 = vmatprep.subr.mxu0 %v5248_v16 }
0x1532   :  { %5037 = vmatpush3.msra.mxu0 %v5742_v14 }
0x1533   :  { %5038 = vmatprep.subr.mxu0 %v5248_v16 }
0x1534   :  { %5039 = vmatpush3.msra.mxu0 %v5748_v18 }
0x1535   :  { %5040 = vmatprep.subr.mxu0 %v5248_v16 }
0x1536   :  { %5041 = vmatpush3.msra.mxu0 %v5755_v2 }
0x1537   :  { %5056 = vmatprep.subr.mxu0 %v5248_v16 }
0x1588   :  { %v3686_v25 = vpop.f32.mrf.mxu1 }
0x1589   :  { %v3687_v52 = vadd.f32 %v5793_v32, %v3686_v25 }
0x158a   :  { %v5011_v35 = vpop.f32.mrf.mxu1 }
0x158b   :  { %3698 = vrot.lane.b32.xlu1 %v3687_v52, %s5251_s21 }
0x15e7   :  { %v3611_v51 = vpop.f32.mrf.mxu0 }
0x15e8   :  { %v3612_v3 = vadd.f32 %v5822_v36, %v3611_v51 }
0x15e9   :  { %v5000_v1 = vpop.f32.mrf.mxu0 }
0x15ea   :  { %v3690_v62 = vadd.f32 %v3687_v52, %v3612_v3 }
0x15ec   :  { %v4502_v37 = vmul.f32 -1.442695, %v3690_v62 }
0x15ee   :  { %5169 = vpow2.f32 %v4502_v37 }
0x15ef   :  { %v3794_v63 = vpop.f32.mrf.mxu0 }
0x15f0   :  { %v3795_v39 = vadd.f32 %v5721_v0, %v3794_v63 }
0x15f1   :  { %v5022_v60 = vpop.f32.mrf.mxu0 }
0x15f2   :  { %v3799_v61 = vrot.slane %v3795_v39, 4 }
0x15f4   :  { %3808 = vrot.lane.b32.xlu1 %v3799_v61, %s5251_s21  ;;  %v3801_v12 = vadd.f32 %v3799_v61, %v5725_v8 }
0x15f6   :  { %v4504_v5 = vmul.f32 -1.442695, %v3801_v12 }
0x15fb   :  { %v5170_v4 = vpop.eup %5169 }
0x15fc   :  { %v3694_v56 = vadd.f32 1.0, %v5170_v4 }
0x15fd   :  { %v3699_v7 = vpop.permute.xlu1 %3698 }
0x15fe   :  { %5171 = vrcp.f32 %v3694_v56 }
0x15ff   :  { %5173 = vpow2.f32 %v4504_v5 }
0x160b   :  { %v5172_v57 = vpop.eup %5171 }
0x160c   :  { %v3701_v10 = vmul.f32 %v5172_v57, %v3699_v7  ;;  %v5174_v6 = vpop.eup %5173  ;;  %v3708_v22 = vsub.f32 1.0, %v5172_v57  ;;  %v3714_v43 = vmul.f32 %v5172_v57, %v5836_v49 }
0x160d   :  { %v3805_v42 = vadd.f32 1.0, %v5174_v6 }
0x160e   :  { %3703 = vrot.lane.b32.xlu0 %v3701_v10, %s5251_s21 }
0x160f   :  { %5175 = vrcp.f32 %v3805_v42 }
0x161c   :  { %v5176_v13 = vpop.eup %5175 }
0x161d   :  { %v3818_v25 = vsub.f32 1.0, %v5176_v13 }
0x1666   :  { %v3809_v45 = vpop.permute.xlu1 %3808 }
0x1667   :  { %v3811_v55 = vmul.f32 %v5176_v13, %v3809_v45 }
0x1669   :  { %3813 = vrot.lane.b32.xlu1 %v3811_v55, %s5251_s21 }
0x1680   :  { %v3704_v17 = vpop.permute.xlu0 %3703 }
0x1681   :  { %v3706_v58 = vadd.f32 %v3704_v17, %v3612_v3 }
0x1683   :  { %5177 = vtanh.f32 %v3706_v58 }
0x1690   :  { %v5178_v59 = vpop.eup %5177 }
0x1691   :  { %3710 = vrot.lane.b32.xlu0 %v5178_v59, %s5250_s2 }
0x1695   :  { %3825 = vrot.lane.b32.xlu0 %v3824_v44, %s5253_s1 }
0x16db   :  { %v3814_v27 = vpop.permute.xlu1 %3813 }
0x16dc   :  { %v3816_v28 = vadd.f32 %v3814_v27, %v5725_v8 }
0x16de   :  { %5179 = vtanh.f32 %v3816_v28 }
0x16eb   :  { %v5180_v29 = vpop.eup %5179 }
0x16ec   :  { %3820 = vrot.lane.b32.xlu1 %v5180_v29, %s5250_s2 }
0x1703   :  { %v3711_v23 = vpop.permute.xlu0 %3710 }
0x1704   :  { %v3713_v24 = vmul.f32 %v3711_v23, %v3708_v22 }
0x1706   :  { %v3715_v26 = vadd.f32 %v3714_v43, %v3713_v24 }
0x1707   :  { %v3826_v30 = vpop.permute.xlu0 %3825 }
0x1708   :  { %v5903_v46 = vsel %vm3720_vm14, %v3715_v26, %v5836_v49  ;;  %v3828_v35 = vmul.f32 %v5176_v13, %v3826_v30 }
0x1709   :  { %3907 = vrot.lane.b32.xlu1 %v5903_v46, %s5250_s2 }
0x170d   :  { %4009 = vperm.xlu1 %5099, %v4007_v33  }
0x175e   :  { %v3821_v52 = vpop.permute.xlu1 %3820 }
0x175f   :  { %v3823_v51 = vmul.f32 %v3821_v52, %v3818_v25 }
0x1761   :  { %v3829_v3 = vadd.f32 %v3828_v35, %v3823_v51  ;;  %v4430_v51 = vld [vmem:[#allocation2 + $0xc9] ss:$0 sm:$0xff] }
0x1763   :  { %v3831_v1 = vrot.slane %v3829_v3, 4  ;;  %v792_v3 = vadd.f32 %v4430_v51, %v5437_v54 }
0x1765   :  { %3832 = vrot.lane.b32.xlu0 %v3831_v1, %s5250_s2  ;;  %v796_v1 = vrot.slane %v792_v3, 1 }
0x177b   :  { %v3908_v62 = vpop.permute.xlu1 %3907 }
0x177c   :  { %5043 = vmatmul.mubr.msk.f32.vlgmr.msra.gmra.mxu0 %vm166_vm3, %v3908_v62  ;;  %v800_v62 = vadd.f32 %v796_v1, %v5359_v47 }
0x177d   :  { %5057 = vmatpush3.msra.mxu0 %v5745_v15  ;;  %5064 = vmatprep.mubr.msk.f32.mxu0 %vm5249_vm4, %v5248_v16 }
0x177e   :  { %5058 = vmatprep.subr.mxu0 %v5248_v16 }
0x177f   :  { %5059 = vmatpush3.msra.mxu0 %v5750_v19 }
0x1780   :  { %5060 = vmatprep.subr.mxu0 %v5248_v16 }
0x1781   :  { %5061 = vmatpush3.msra.mxu0 %v5758_v20 }
0x1782   :  { %5062 = vmatprep.subr.mxu0 %v5248_v16 }
0x1783   :  { %5063 = vmatpush3.msra.mxu0 %v5764_v21 }
0x1784   :  { %5078 = vmatprep.subr.mxu0 %v5248_v16 }
0x1788   :  { %v5925_v15 = vpop.permute.xlu1 %4009 }
0x1789   :  { %vm4011_vm1 = vcmp.eq.s32.totalorder %v5925_v15, 1  ;;  %v799_v15 = vadd.f32 %v792_v3, %v5362_v48 }
0x17d7   :  { %v3833_v49 = vpop.permute.xlu0 %3832 }
0x17d8   :  { %5032 = vmatmul.mubr.msk.f32.vlgmr.msra.gmra.mxu1 %vm166_vm3, %v3833_v49 }
0x17d9   :  { %5046 = vmatpush3.msra.mxu1 %v5698_v38  ;;  %5053 = vmatprep.mubr.msk.f32.mxu1 %vm5249_vm4, %v5248_v16  ;;  %v4013_v38 = vsel %vm4011_vm1, %v3833_v49, %v5869_v34  ;;  %v803_v49 = vrot.slane %v800_v62, 7 }
0x17da   :  { %5047 = vmatprep.subr.mxu1 %v5248_v16  ;;  %v4114_v13 = vrot.slane %v4013_v38, 2 }
0x17db   :  { %5048 = vmatpush3.msra.mxu1 %v5702_v53 }
0x17dc   :  { %5049 = vmatprep.subr.mxu1 %v5248_v16 }
0x17dd   :  { %5050 = vmatpush3.msra.mxu1 %v5708_v40 }
0x17de   :  { %5051 = vmatprep.subr.mxu1 %v5248_v16 }
0x17df   :  { %5052 = vmatpush3.msra.mxu1 %v5712_v41 }
0x17e0   :  { %5054 = vmatmul.mubr.msk.f32.vlgmr.msra.gmra.mxu1 %vm166_vm3, %v4013_v38  ;;  %5067 = vmatprep.subr.mxu1 %v5248_v16  ;;  %v804_v38 = vsel %vm583_vm7, %v803_v49, %v799_v15 }
0x17e1   :  { %5068 = vmatpush3.msra.mxu1 %v5740_v11  ;;  %5075 = vmatprep.mubr.msk.f32.mxu1 %vm5249_vm4, %v5248_v16 }
0x17e2   :  { %5069 = vmatprep.subr.mxu1 %v5248_v16 }
0x17e3   :  { %5070 = vmatpush3.msra.mxu1 %v5742_v14 }
0x17e4   :  { %5071 = vmatprep.subr.mxu1 %v5248_v16 }
0x17e5   :  { %5072 = vmatpush3.msra.mxu1 %v5748_v18 }
0x17e6   :  { %5073 = vmatprep.subr.mxu1 %v5248_v16 }
0x17e7   :  { %5074 = vmatpush3.msra.mxu1 %v5755_v2 }
0x183c   :  { %v3977_v53 = vpop.f32.mrf.mxu0 }
0x183d   :  { %v3978_v40 = vadd.f32 %v5793_v32, %v3977_v53  ;;  %v806_v53 = vsel %vm586_vm8, %v804_v38, 0.0 }
0x183e   :  { %v5044_v41 = vpop.f32.mrf.mxu0 }
0x183f   :  { %3989 = vrot.lane.b32.xlu0 %v3978_v40, %s5251_s21 }
0x1898   :  { %v3902_v11 = vpop.f32.mrf.mxu1 }
0x1899   :  { %v3903_v19 = vadd.f32 %v5822_v36, %v3902_v11 }
0x189a   :  { %v5033_v20 = vpop.f32.mrf.mxu1 }
0x189b   :  { %v3981_v21 = vadd.f32 %v3978_v40, %v3903_v19 }
0x189d   :  { %v4507_v14 = vmul.f32 -1.442695, %v3981_v21 }
0x189f   :  { %5181 = vpow2.f32 %v4507_v14 }
0x18a0   :  { %v4084_v31 = vpop.f32.mrf.mxu1 }
0x18a1   :  { %v4085_v18 = vadd.f32 %v5721_v0, %v4084_v31 }
0x18a2   :  { %v5055_v34 = vpop.f32.mrf.mxu1 }
0x18a3   :  { %v4089_v37 = vrot.slane %v4085_v18, 2 }
0x18a5   :  { %4098 = vrot.lane.b32.xlu1 %v4089_v37, %s5251_s21  ;;  %v4091_v4 = vadd.f32 %v4089_v37, %v5725_v8 }
0x18a7   :  { %v4509_v56 = vmul.f32 -1.442695, %v4091_v4 }
0x18ac   :  { %v5182_v2 = vpop.eup %5181 }
0x18ad   :  { %v3985_v63 = vadd.f32 1.0, %v5182_v2 }
0x18af   :  { %5183 = vrcp.f32 %v3985_v63 }
0x18b0   :  { %5185 = vpow2.f32 %v4509_v56 }
0x18b1   :  { %v3990_v60 = vpop.permute.xlu0 %3989 }
0x18bc   :  { %v5184_v39 = vpop.eup %5183 }
0x18bd   :  { %v3992_v61 = vmul.f32 %v5184_v39, %v3990_v60  ;;  %v5186_v57 = vpop.eup %5185  ;;  %v3999_v58 = vsub.f32 1.0, %v5184_v39  ;;  %v4005_v44 = vmul.f32 %v5184_v39, %v5903_v46 }
0x18be   :  { %v4095_v7 = vadd.f32 1.0, %v5186_v57  ;;  %v4305_v57 = vld [vmem:[#allocation2 + $0x238] sm:$0xff] }
0x18bf   :  { %3994 = vrot.lane.b32.xlu0 %v3992_v61, %s5251_s21 }
0x18c0   :  { %5187 = vrcp.f32 %v4095_v7 }
0x18cd   :  { %v5188_v0 = vpop.eup %5187 }
0x1917   :  { %v4099_v10 = vpop.permute.xlu1 %4098 }
0x1918   :  { %v4101_v12 = vmul.f32 %v5188_v0, %v4099_v10  ;;  %v4303_v10 = vld [vmem:[#allocation2 + $0x228] sm:$0xff] }
0x191a   :  { %4103 = vrot.lane.b32.xlu1 %v4101_v12, %s5251_s21 }
0x1931   :  { %v3995_v5 = vpop.permute.xlu0 %3994 }
0x1932   :  { %v3997_v6 = vadd.f32 %v3995_v5, %v3903_v19 }
0x1934   :  { %5189 = vtanh.f32 %v3997_v6 }
0x1941   :  { %v5190_v42 = vpop.eup %5189 }
0x1942   :  { %4001 = vrot.lane.b32.xlu0 %v5190_v42, %s5250_s2 }
0x1946   :  { %4115 = vrot.lane.b32.xlu0 %v4114_v13, %s5253_s1 }
0x198c   :  { %v4104_v45 = vpop.permute.xlu1 %4103 }
0x198d   :  { %v4106_v55 = vadd.f32 %v4104_v45, %v5725_v8  ;;  %v4108_v8 = vsub.f32 1.0, %v5188_v0 }
0x198f   :  { %5191 = vtanh.f32 %v4106_v55 }
0x199c   :  { %v5192_v17 = vpop.eup %5191 }
0x199d   :  { %4110 = vrot.lane.b32.xlu1 %v5192_v17, %s5250_s2 }
0x19b4   :  { %v4002_v59 = vpop.permute.xlu0 %4001 }
0x19b5   :  { %v4004_v27 = vmul.f32 %v4002_v59, %v3999_v58 }
0x19b7   :  { %v4006_v28 = vadd.f32 %v4005_v44, %v4004_v27 }
0x19b8   :  { %v4116_v22 = vpop.permute.xlu0 %4115 }
0x19b9   :  { %v5963_v29 = vsel %vm4011_vm1, %v4006_v28, %v5903_v46  ;;  %v4118_v43 = vmul.f32 %v5188_v0, %v4116_v22  ;;  %v4304_v0 = vld [vmem:[#allocation2 + $0x230] sm:$0xff]  ;;  %v4432_v22 = vld [vmem:[#allocation2 + $0xcc] ss:$0 sm:$0xff] }
0x19ba   :  { %4197 = vrot.lane.b32.xlu1 %v5963_v29, %s5250_s2 }
0x1a0f   :  { %v4111_v23 = vpop.permute.xlu1 %4110 }
0x1a10   :  { %v4113_v24 = vmul.f32 %v4111_v23, %v4108_v8 }
0x1a12   :  { %v4119_v26 = vadd.f32 %v4118_v43, %v4113_v24  ;;  %v4433_v43 = vld [vmem:[#allocation2 + $0xcd] ss:$0 sm:$0xff] }
0x1a14   :  { %v4121_v33 = vrot.slane %v4119_v26, 6 }
0x1a16   :  { %4122 = vrot.lane.b32.xlu0 %v4121_v33, %s5250_s2 }
0x1a2c   :  { %v4198_v30 = vpop.permute.xlu1 %4197 }
0x1a2d   :  { %5076 = vmatmul.mubr.msk.f32.vlgmr.msra.gmra.mxu1 %vm166_vm3, %v4198_v30 }
0x1a88   :  { %v4123_v25 = vpop.permute.xlu0 %4122 }
0x1a89   :  { %5065 = vmatmul.mubr.msk.f32.vlgmr.msra.gmra.mxu0 %vm166_vm3, %v4123_v25 }
0x1a8a   :  { %5086 = vmatprep.mubr.msk.f32.mxu0 %vm5249_vm4, %v5248_v16  ;;  %vm3144_vm4 = vcmp.gt.s32.totalorder %v5735_v9, 3 }
0x1a8b   :  { %v4297_v48 = vsel %vm3144_vm4, 1, %v5252_v50  ;;  %v4306_v50 = vld [vmem:[#allocation2 + $0x240] sm:$0xff] }
0x1a8c   :  { %5079 = vmatpush3.msra.mxu0 %v4306_v50 }
0x1a8d   :  { %5080 = vmatprep.subr.mxu0 %v5248_v16 }
0x1a8e   :  { %5081 = vmatpush3.msra.mxu0 %v4305_v57 }
0x1a8f   :  { %5082 = vmatprep.subr.mxu0 %v5248_v16 }
0x1a90   :  { %5083 = vmatpush3.msra.mxu0 %v4304_v0 }
0x1a91   :  { %5084 = vmatprep.subr.mxu0 %v5248_v16 }
0x1a92   :  { %5085 = vmatpush3.msra.mxu0 %v4303_v10 }
0x1aed   :  { %v4267_v46 = vpop.f32.mrf.mxu1 }
0x1aee   :  { %v4268_v52 = vadd.f32 %v5793_v32, %v4267_v46 }
0x1aef   :  { %v5077_v35 = vpop.f32.mrf.mxu1 }
0x1af0   :  { %4279 = vrot.lane.b32.xlu1 %v4268_v52, %s5251_s21  ;;  %v4513_v35 = vld [vmem:[#allocation2 + $0x248] ss:$0 sm:$0xff] }
0x1b14   :  { %807 = vadd.xlane.f32.xlu1 %v806_v53 }
0x1b49   :  { %v4192_v40 = vpop.f32.mrf.mxu0 }
0x1b4a   :  { %v4193_v32 = vadd.f32 %v5822_v36, %v4192_v40 }
0x1b4b   :  { %v5066_v41 = vpop.f32.mrf.mxu0 }
0x1b4c   :  { %v4271_v11 = vadd.f32 %v4268_v52, %v4193_v32 }
0x1b4e   :  { %v4512_v19 = vmul.f32 -1.442695, %v4271_v11 }
0x1b50   :  { %5193 = vpow2.f32 %v4512_v19 }
0x1b5d   :  { %v5194_v20 = vpop.eup %5193 }
0x1b5e   :  { %v4275_v54 = vadd.f32 1.0, %v5194_v20 }
0x1b60   :  { %5195 = vrcp.f32 %v4275_v54 }
0x1b62   :  { %v4280_v47 = vpop.permute.xlu1 %4279 }
0x1b6d   :  { %v5196_v21 = vpop.eup %5195 }
0x1b6e   :  { %v4282_v14 = vmul.f32 %v5196_v21, %v4280_v47  ;;  %v4289_v12 = vsub.f32 1.0, %v5196_v21  ;;  %v4295_v6 = vmul.f32 %v5196_v21, %v5963_v29 }
0x1b70   :  { %4284 = vrot.lane.b32.xlu0 %v4282_v14, %s5251_s21 }
0x1b74   :  { %4299 = vperm.xlu0 %5100, %v4297_v48  }
0x1b9d   :  { %v808_v34 = vpop.xlane.xlu1 %807 }
0x1b9e   :  { %v809_v37 = vmul.f32 0.03125, %v808_v34 }
0x1ba0   :  { %v811_v2 = vrot.slane %v809_v37, 1  ;;  %v814_v60 = vsub.f32 %v799_v15, %v809_v37 }
0x1ba2   :  { %v815_v63 = vsub.f32 %v800_v62, %v811_v2  ;;  %v816_v4 = vmul.f32 %v814_v60, %v814_v60 }
0x1ba4   :  { %v817_v39 = vmul.f32 %v815_v63, %v815_v63 }
0x1ba6   :  { %v820_v61 = vrot.slane %v817_v39, 7 }
0x1ba8   :  { %v821_v9 = vsel %vm583_vm7, %v820_v61, %v816_v4 }
0x1ba9   :  { %v823_v56 = vsel %vm586_vm8, %v821_v9, 0.0 }
0x1be2   :  { %v4285_v31 = vpop.permute.xlu0 %4284 }
0x1be3   :  { %v4287_v18 = vadd.f32 %v4285_v31, %v4193_v32 }
0x1be5   :  { %5197 = vtanh.f32 %v4287_v18 }
0x1bef   :  { %v4300_v7 = vpop.permute.xlu0 %4299 }
0x1bf0   :  { %vm4301_vm8 = vcmp.eq.s32.totalorder %v4300_v7, 1 }
0x1bf2   :  { %v5198_v36 = vpop.eup %5197 }
0x1bf3   :  { %4291 = vrot.lane.b32.xlu0 %v5198_v36, %s5250_s2 }
0x1c12   :  { %824 = vadd.xlane.f32.xlu0 %v823_v56 }
0x1c65   :  { %v4292_v5 = vpop.permute.xlu0 %4291 }
0x1c66   :  { %v4294_v42 = vmul.f32 %v4292_v5, %v4289_v12 }
0x1c68   :  { %v4296_v13 = vadd.f32 %v4295_v6, %v4294_v42 }
0x1c6a   :  { %v4302_v45 = vsel %vm4301_vm8, %v4296_v13, %v5963_v29 }
0x1c6b   :  { %4310 = vrot.lane.b32.xlu0 %v4302_v45, %s5250_s2  ;;  %v4309_v55 = vrot.slane %v4302_v45, 1 }
0x1c6d   :  { %4312 = vrot.lane.b32.xlu1 %v4309_v55, %s5250_s2 }
0x1c9b   :  { %v825_v17 = vpop.xlane.xlu0 %824 }
0x1c9c   :  { %v826_v58 = vmul.f32 0.03125, %v825_v17 }
0x1c9e   :  { %v827_v59 = vadd.f32 1e-05, %v826_v58 }
0x1ca0   :  { %5199 = vrsqrt.f32 %v827_v59 }
0x1cad   :  { %v5200_v16 = vpop.eup %5199 }
0x1cae   :  { %v830_v44 = vrot.slane %v5200_v16, 1  ;;  %v833_v28 = vmul.f32 %v5200_v16, %v814_v60 }
0x1cb0   :  { %v834_v27 = vmul.f32 %v830_v44, %v815_v63  ;;  %v839_v23 = vmul.f32 %v4432_v22, %v833_v28 }
0x1cb2   :  { %v840_v8 = vmul.f32 %v4432_v22, %v834_v27  ;;  %v845_v33 = vadd.f32 %v4433_v43, %v839_v23 }
0x1cb4   :  { %v846_v24 = vadd.f32 %v4433_v43, %v840_v8 }
0x1cdd   :  { %v4311_v26 = vpop.permute.xlu0 %4310 }
0x1cde   :  { %v4316_v25 = vadd.f32 %v4311_v26, %v845_v33 }
0x1cdf   :  { %v4313_v29 = vpop.permute.xlu1 %4312 }
0x1ce0   :  { %v4317_v30 = vadd.f32 %v4313_v29, %v846_v24 }
0x1ce2   :  { %v4324_v46 = vrot.slane %v4317_v30, 7 }
0x1ce4   :  { %v4325_v52 = vsel %vm583_vm7, %v4324_v46, %v4316_v25 }
0x1ce5   :  { %5087 = vmatmul.mubr.msk.f32.vlgmr.msra.gmra.mxu0 %vm166_vm3, %v4325_v52 }
0x1da5   :  { %v4394_v51 = vpop.f32.mrf.mxu0 }
0x1da6   :  { %v4395_v3 = vadd.f32 %v4513_v35, %v4394_v51 }
0x1da7   :  { %v5088_v1 = vpop.f32.mrf.mxu0 }
0x1da8   :  { %4398 = vst [vmem:[#allocation5] sm:$0x3] %v4395_v3 }
0x1da9   :  { %5232 = shalt.err (!%p5229_p9)
}
0x1daa   :  { %4408 = dma.vmem_to_hbm [thread:$0]  %s4406_s26, 32, %s6001_s3, [#allocation4]  }
0x1dab   :  { %5243 = dma.done.wait [#allocation4], 32  }
0x1dac   :  { %5244 = vsyncadd [#allocation4], 4294967264 }
0x1dad   :  { %4412 = vsyncpa [#allocation3], 1 }
0x1dae   :  { %4413 = vsyncpa [#allocation4], 1 }

</bundles_post_ra>
